<compile_context>
chip_gen: v7x
topology: tpu7x:2x2x1
jax: 0.10.0
libtpu: 0.0.40
codegen_flags: <defaults>
</compile_context>

<pallas_src>
import math
import functools

import numpy as np
import jax
import jax.numpy as jnp
from jax.experimental import pallas as pl
from jax.experimental.pallas import tpu as pltpu


# --------------------------------------------------------------------------- #
# Trace-time (python / numpy) helpers: constants & static scatter plans
# --------------------------------------------------------------------------- #

def _pool_selectors(B, win, wout):
    """Even/odd column selectors for max_pool2d((1,2), stride (1,2)) applied to a
    'flat layout' tensor (channels on sublanes, lane = b*win + t).  Output lane
    b*wout + u.  Only valid conv columns are selected (floor mode, tail dropped)."""
    se = np.zeros((B * win, B * wout), np.float32)
    so = np.zeros((B * win, B * wout), np.float32)
    for b in range(B):
        for u in range(wout):
            se[b * win + 2 * u, b * wout + u] = 1.0
            so[b * win + 2 * u + 1, b * wout + u] = 1.0
    return se, so


def _compact_selector(B, win, wout):
    """Drop invalid tail columns of each batch block: lane b*win + w -> b*wout + w."""
    s = np.zeros((B * win, B * wout), np.float32)
    for b in range(B):
        for w in range(wout):
            s[b * win + w, b * wout + w] = 1.0
    return s


def _view_scatter_plan(n_rows, row_width, view_width):
    """Torch `.view(-1, view_width)` of a row-major (n_rows, row_width) tensor as a
    static scatter plan: dst[dst_row, dst_col : dst_col + (hi-lo)] = src[src_row, lo:hi].
    The plan covers every destination element exactly once."""
    assert (n_rows * row_width) % view_width == 0
    plan = []
    for c in range(n_rows):
        lo = 0
        while lo < row_width:
            f = c * row_width + lo
            r = f // view_width
            hi = min(row_width, lo + (r + 1) * view_width - f)
            plan.append((c, lo, hi, r, f - r * view_width))
            lo = hi
    return tuple(plan)


# --------------------------------------------------------------------------- #
# Fused Pallas kernel
# --------------------------------------------------------------------------- #

def _cvae_kernel(
    x_ref, eps_ref,
    w1_ref, b1_ref, s1e_ref, s1o_ref,
    w2_ref, b2_ref, s2e_ref, s2o_ref,
    wmv_ref, bmv_ref,
    wdl_ref, bdl_ref,
    wd1_ref, bd1_ref,
    wd2_ref, bd2_ref, seld_ref,
    wout_ref, bout_ref,
    recon_ref, mv_ref, z_ref,
    p1_ref, p2_ref, ve_ref, pd1_ref, pd2_ref, vd_ref,
    *, B, L0, latent, C1, C2, KE, KD, D0, P1, enc_plan, dec_plan):

    dot = functools.partial(jnp.dot, preferred_element_type=jnp.float32)
    f32 = jnp.float32

    # ------------------------------ Encoder -------------------------------- #
    x = x_ref[...]                                               # (1, B*L0)

    # conv1 patches (KE, B*L0): row k = x shifted left by k (zero tail).  Columns
    # that cross a batch boundary are never selected by the pool matrices.
    p1_ref[...] = jnp.zeros((KE, B * L0), f32)
    p1_ref[0:1, :] = x
    for k in range(1, KE):
        p1_ref[k:k + 1, 0:B * L0 - k] = x[:, k:]
    c1 = jnp.maximum(dot(w1_ref[...], p1_ref[...]) + b1_ref[...], 0.0)     # (C1, B*L0)

    # max_pool2d (1,2): even/odd valid-column selection + elementwise max
    h1 = jnp.maximum(dot(c1, s1e_ref[...]), dot(c1, s1o_ref[...]))         # (C1, B*P1)

    # conv2 patches (KE*C1, B*P1): block k = h1 shifted left by k
    p2_ref[...] = jnp.zeros((KE * C1, B * P1), f32)
    p2_ref[0:C1, :] = h1
    for k in range(1, KE):
        p2_ref[k * C1:(k + 1) * C1, 0:B * P1 - k] = h1[:, k:]
    c2 = jnp.maximum(dot(w2_ref[...], p2_ref[...]) + b2_ref[...], 0.0)     # (C2, B*P1)

    h2 = jnp.maximum(dot(c2, s2e_ref[...]), dot(c2, s2o_ref[...]))         # (C2, B*P2)

    # torch `.view(-1, hidden_e)` relayout -> (B, hidden_e) scratch (fully overwritten)
    for (c, lo, hi, r, d) in enc_plan:
        ve_ref[r:r + 1, d:d + hi - lo] = h2[c:c + 1, lo:hi]

    # packed [means | log_var] head: ONE matmul, ONE store
    mv = dot(ve_ref[...], wmv_ref[...]) + bmv_ref[...]                     # (B, 2*latent)
    mv_ref[...] = mv

    # reparameterize (vectorized over B): ONE exp, ONE store
    means = mv[:, :latent]
    log_var = mv[:, latent:]
    z = means + eps_ref[...] * jnp.exp(0.5 * log_var)                      # (B, latent)
    z_ref[...] = z

    # ------------------------------ Decoder -------------------------------- #
    hd = dot(z, wdl_ref[...]) + bdl_ref[...]                               # (B, D0)

    # decoder conv1 patches (KD, B*D0), filled straight from hd rows
    # (decoder max_pool2d (1,1) == identity, so no pool selection needed)
    pd1_ref[...] = jnp.zeros((KD, B * D0), f32)
    for k in range(KD):
        for b in range(B):
            pd1_ref[k:k + 1, b * D0:b * D0 + D0 - k] = hd[b:b + 1, k:]
    d1 = jnp.maximum(dot(wd1_ref[...], pd1_ref[...]) + bd1_ref[...], 0.0)  # (C1, B*D0)

    # decoder conv2 patches (KD*C1, B*D0)
    pd2_ref[...] = jnp.zeros((KD * C1, B * D0), f32)
    pd2_ref[0:C1, :] = d1
    for k in range(1, KD):
        pd2_ref[k * C1:(k + 1) * C1, 0:B * D0 - k] = d1[:, k:]
    d2 = jnp.maximum(dot(wd2_ref[...], pd2_ref[...]) + bd2_ref[...], 0.0)  # (C2, B*D0)

    # drop invalid tail columns -> compact (C2, B*V2), then `.view(-1, hidden_d)`
    d2c = dot(d2, seld_ref[...])                                           # (C2, B*V2)
    for (c, lo, hi, r, d) in dec_plan:
        vd_ref[r:r + 1, d:d + hi - lo] = d2c[c:c + 1, lo:hi]

    # output linear: ONE matmul, ONE store
    recon_ref[...] = dot(vd_ref[...], wout_ref[...]) + bout_ref[...]       # (B, D1)


# --------------------------------------------------------------------------- #
# Parameters (synthetic init, torch-equivalent layouts)
# --------------------------------------------------------------------------- #

def init_params(key, enc_layer_sizes, latent_size, dec_layer_sizes):
    """Conv weights stored as (Cout, K*Cin) with column k*Cin+ci == torch W[co, ci, 0, k];
    linear weights stored as (in, out) == torch W.T; [means|log_var] head packed."""
    L0 = enc_layer_sizes[0]
    D0, D1 = dec_layer_sizes
    KE, KD, C1, C2 = 4, 2, 15, 30
    hidden_e = C2 * (((L0 - KE + 1) // 2 - KE + 1) // 2)
    hidden_d = C2 * ((D0 - KD + 1) - KD + 1)

    ks = jax.random.split(key, 14)

    def unif(k, shape, fan_in):
        bound = 1.0 / math.sqrt(fan_in)
        return jax.random.uniform(k, shape, jnp.float32, -bound, bound)

    return dict(
        enc_w1=unif(ks[0], (C1, KE), KE),
        enc_b1=unif(ks[1], (C1, 1), KE),
        enc_w2=unif(ks[2], (C2, KE * C1), KE * C1),
        enc_b2=unif(ks[3], (C2, 1), KE * C1),
        enc_wmv=unif(ks[4], (hidden_e, 2 * latent_size), hidden_e),
        enc_bmv=unif(ks[5], (1, 2 * latent_size), hidden_e),
        dec_wl=unif(ks[6], (latent_size, D0), latent_size),
        dec_bl=unif(ks[7], (1, D0), latent_size),
        dec_w1=unif(ks[8], (C1, KD), KD),
        dec_b1=unif(ks[9], (C1, 1), KD),
        dec_w2=unif(ks[10], (C2, KD * C1), KD * C1),
        dec_b2=unif(ks[11], (C2, 1), KD * C1),
        dec_wout=unif(ks[12], (hidden_d, D1), hidden_d),
        dec_bout=unif(ks[13], (1, D1), hidden_d),
    )


# --------------------------------------------------------------------------- #
# CVAE forward (single pallas_call, no grid)
# --------------------------------------------------------------------------- #

def cvae_forward(params, x, eps):
    """x: (B, L0) float32 (== torch tensor of shape (1, 1, B, L0)); eps: (B, latent)."""
    B, L0 = x.shape
    latent = eps.shape[1]
    C1, C2, KE, KD = 15, 30, 4, 2
    D0 = params["dec_wl"].shape[1]
    D1 = params["dec_wout"].shape[1]

    W1 = L0 - KE + 1              # encoder conv1 output width
    P1 = W1 // 2                  # after (1,2) max pool (floor mode)
    W2 = P1 - KE + 1              # encoder conv2 output width
    P2 = W2 // 2
    hidden_e = C2 * P2
    V1 = D0 - KD + 1              # decoder conv1 output width (pool (1,1) == id)
    V2 = V1 - KD + 1              # decoder conv2 output width
    hidden_d = C2 * V2

    # Trace-time constants (exact 0/1 selectors) and static scatter plans.
    s1e, s1o = _pool_selectors(B, L0, P1)          # (B*L0, B*P1)
    s2e, s2o = _pool_selectors(B, P1, P2)          # (B*P1, B*P2)
    seld = _compact_selector(B, D0, V2)            # (B*D0, B*V2)
    enc_plan = _view_scatter_plan(C2, B * P2, hidden_e)
    dec_plan = _view_scatter_plan(C2, B * V2, hidden_d)

    x_flat = x.reshape(1, B * L0)

    kernel = functools.partial(
        _cvae_kernel, B=B, L0=L0, latent=latent, C1=C1, C2=C2, KE=KE, KD=KD,
        D0=D0, P1=P1, enc_plan=enc_plan, dec_plan=dec_plan)

    vmem = lambda: pl.BlockSpec(memory_space=pltpu.MemorySpace.VMEM)
    out_shapes = (
        jax.ShapeDtypeStruct((B, D1), jnp.float32),            # recon_x
        jax.ShapeDtypeStruct((B, 2 * latent), jnp.float32),    # [means | log_var]
        jax.ShapeDtypeStruct((B, latent), jnp.float32),        # z
    )
    recon_x, mv, z = pl.pallas_call(
        kernel,
        out_shape=out_shapes,
        in_specs=[vmem() for _ in range(21)],
        out_specs=tuple(vmem() for _ in range(3)),
        scratch_shapes=[
            pltpu.VMEM((KE, B * L0), jnp.float32),        # enc conv1 patches
            pltpu.VMEM((KE * C1, B * P1), jnp.float32),   # enc conv2 patches
            pltpu.VMEM((B, hidden_e), jnp.float32),       # encoder view (fully written)
            pltpu.VMEM((KD, B * D0), jnp.float32),        # dec conv1 patches
            pltpu.VMEM((KD * C1, B * D0), jnp.float32),   # dec conv2 patches
            pltpu.VMEM((B, hidden_d), jnp.float32),       # decoder view (fully written)
        ],
    )(
        x_flat, eps,
        params["enc_w1"], params["enc_b1"], jnp.asarray(s1e), jnp.asarray(s1o),
        params["enc_w2"], params["enc_b2"], jnp.asarray(s2e), jnp.asarray(s2o),
        params["enc_wmv"], params["enc_bmv"],
        params["dec_wl"], params["dec_bl"],
        params["dec_w1"], params["dec_b1"],
        params["dec_w2"], params["dec_b2"], jnp.asarray(seld),
        params["dec_wout"], params["dec_bout"],
    )
    means = mv[:, :latent]
    log_var = mv[:, latent:]
    return recon_x, means, log_var, z


# ---------------------------------- main ------------------------------------ #

if __name__ == "__main__":
    enc_layer_sizes = [32]            # Encoder only uses layer_sizes[0]
    latent_size = 8
    dec_layer_sizes = [24, 32]
    B = 4                             # the "H"/batch axis of the NCHW (1,1,B,F) input

    key = jax.random.PRNGKey(0)
    kp, kx, ke = jax.random.split(key, 3)
    params = init_params(kp, enc_layer_sizes, latent_size, dec_layer_sizes)

    x = jax.random.normal(kx, (B, enc_layer_sizes[0]), jnp.float32)
    eps = jax.random.normal(ke, (B, latent_size), jnp.float32)   # reparameterization noise

    fwd = jax.jit(functools.partial(cvae_forward, params))
    recon_x, means, log_var, z = fwd(x, eps)
    jax.block_until_ready((recon_x, means, log_var, z))

    assert recon_x.shape == (B, dec_layer_sizes[1])
    assert means.shape == (B, latent_size)
    assert log_var.shape == (B, latent_size)
    assert z.shape == (B, latent_size)
    assert all(bool(jnp.all(jnp.isfinite(a))) for a in (recon_x, means, log_var, z))
    print("KERNEL_OK")
</pallas_src>

<mosaic_0001>
module attributes {stable_mosaic.version = 11 : i64} {
  func.func @_cvae_kernel(%arg0: memref<1x128xf32, #tpu.memory_space<vmem>>, %arg1: memref<4x8xf32, #tpu.memory_space<vmem>>, %arg2: memref<15x4xf32, #tpu.memory_space<vmem>>, %arg3: memref<15x1xf32, #tpu.memory_space<vmem>>, %arg4: memref<128x56xf32, #tpu.memory_space<vmem>>, %arg5: memref<128x56xf32, #tpu.memory_space<vmem>>, %arg6: memref<30x60xf32, #tpu.memory_space<vmem>>, %arg7: memref<30x1xf32, #tpu.memory_space<vmem>>, %arg8: memref<56x20xf32, #tpu.memory_space<vmem>>, %arg9: memref<56x20xf32, #tpu.memory_space<vmem>>, %arg10: memref<150x16xf32, #tpu.memory_space<vmem>>, %arg11: memref<1x16xf32, #tpu.memory_space<vmem>>, %arg12: memref<8x24xf32, #tpu.memory_space<vmem>>, %arg13: memref<1x24xf32, #tpu.memory_space<vmem>>, %arg14: memref<15x2xf32, #tpu.memory_space<vmem>>, %arg15: memref<15x1xf32, #tpu.memory_space<vmem>>, %arg16: memref<30x30xf32, #tpu.memory_space<vmem>>, %arg17: memref<30x1xf32, #tpu.memory_space<vmem>>, %arg18: memref<96x88xf32, #tpu.memory_space<vmem>>, %arg19: memref<660x32xf32, #tpu.memory_space<vmem>>, %arg20: memref<1x32xf32, #tpu.memory_space<vmem>>, %arg21: memref<4x32xf32, #tpu.memory_space<vmem>>, %arg22: memref<4x16xf32, #tpu.memory_space<vmem>>, %arg23: memref<4x8xf32, #tpu.memory_space<vmem>>, %arg24: memref<4x128xf32, #tpu.memory_space<vmem>>, %arg25: memref<60x56xf32, #tpu.memory_space<vmem>>, %arg26: memref<4x150xf32, #tpu.memory_space<vmem>>, %arg27: memref<2x96xf32, #tpu.memory_space<vmem>>, %arg28: memref<30x96xf32, #tpu.memory_space<vmem>>, %arg29: memref<4x660xf32, #tpu.memory_space<vmem>>) attributes {dimension_semantics = [], scalar_prefetch = 0 : i64, scratch_operands = 6 : i64, tpu.core_type = #tpu.core_type<tc>} {
    %c0 = arith.constant 0 : index
    %c0_0 = arith.constant 0 : index
    %0 = vector.load %arg0[%c0, %c0_0] : memref<1x128xf32, #tpu.memory_space<vmem>>, vector<1x128xf32>
    %cst = arith.constant 0.000000e+00 : f32
    %1 = vector.broadcast %cst : f32 to vector<4x128xf32>
    %c0_1 = arith.constant 0 : index
    %c0_2 = arith.constant 0 : index
    %2 = vector.load %arg24[%c0_1, %c0_2] : memref<4x128xf32, #tpu.memory_space<vmem>>, vector<4x128xf32>
    tpu.vector_store %arg24[%c0_1, %c0_2], %1 {strides = array<i32>} : memref<4x128xf32, #tpu.memory_space<vmem>>, vector<4x128xf32>,
    %c0_3 = arith.constant 0 : index
    %c0_4 = arith.constant 0 : index
    %3 = vector.load %arg24[%c0_3, %c0_4] : memref<4x128xf32, #tpu.memory_space<vmem>>, vector<1x128xf32>
    tpu.vector_store %arg24[%c0_3, %c0_4], %0 {strides = array<i32>} : memref<4x128xf32, #tpu.memory_space<vmem>>, vector<1x128xf32>,
    %4 = vector.extract_strided_slice %0 {offsets = [0, 1], sizes = [1, 127], strides = [1, 1]} : vector<1x128xf32> to vector<1x127xf32>
    %c1 = arith.constant 1 : index
    %c0_5 = arith.constant 0 : index
    %5 = vector.load %arg24[%c1, %c0_5] : memref<4x128xf32, #tpu.memory_space<vmem>>, vector<1x127xf32>
    tpu.vector_store %arg24[%c1, %c0_5], %4 {strides = array<i32>} : memref<4x128xf32, #tpu.memory_space<vmem>>, vector<1x127xf32>,
    %6 = vector.extract_strided_slice %0 {offsets = [0, 2], sizes = [1, 126], strides = [1, 1]} : vector<1x128xf32> to vector<1x126xf32>
    %c2 = arith.constant 2 : index
    %c0_6 = arith.constant 0 : index
    %7 = vector.load %arg24[%c2, %c0_6] : memref<4x128xf32, #tpu.memory_space<vmem>>, vector<1x126xf32>
    tpu.vector_store %arg24[%c2, %c0_6], %6 {strides = array<i32>} : memref<4x128xf32, #tpu.memory_space<vmem>>, vector<1x126xf32>,
    %8 = vector.extract_strided_slice %0 {offsets = [0, 3], sizes = [1, 125], strides = [1, 1]} : vector<1x128xf32> to vector<1x125xf32>
    %c3 = arith.constant 3 : index
    %c0_7 = arith.constant 0 : index
    %9 = vector.load %arg24[%c3, %c0_7] : memref<4x128xf32, #tpu.memory_space<vmem>>, vector<1x125xf32>
    tpu.vector_store %arg24[%c3, %c0_7], %8 {strides = array<i32>} : memref<4x128xf32, #tpu.memory_space<vmem>>, vector<1x125xf32>,
    %c0_8 = arith.constant 0 : index
    %c0_9 = arith.constant 0 : index
    %10 = vector.load %arg2[%c0_8, %c0_9] : memref<15x4xf32, #tpu.memory_space<vmem>>, vector<15x4xf32>
    %c0_10 = arith.constant 0 : index
    %c0_11 = arith.constant 0 : index
    %11 = vector.load %arg24[%c0_10, %c0_11] : memref<4x128xf32, #tpu.memory_space<vmem>>, vector<4x128xf32>
    %cst_12 = arith.constant dense<0.000000e+00> : vector<15x128xf32>
    %12 = tpu.matmul %10, %11, %cst_12 {dimension_numbers = #tpu.dot_dimension_numbers<[1], [0], [0], [1], [0, 0, 1, 1], [], []>} : vector<15x4xf32>, vector<4x128xf32>, vector<15x128xf32> -> vector<15x128xf32>
    %c0_13 = arith.constant 0 : index
    %c0_14 = arith.constant 0 : index
    %13 = vector.load %arg3[%c0_13, %c0_14] : memref<15x1xf32, #tpu.memory_space<vmem>>, vector<15x1xf32>
    %14 = vector.broadcast %13 : vector<15x1xf32> to vector<15x128xf32>
    %15 = arith.addf %12, %14 : vector<15x128xf32>
    %cst_15 = arith.constant 0.000000e+00 : f32
    %16 = vector.broadcast %cst_15 : f32 to vector<15x128xf32>
    %17 = arith.maximumf %15, %16 : vector<15x128xf32>
    %c0_16 = arith.constant 0 : index
    %c0_17 = arith.constant 0 : index
    %18 = vector.load %arg4[%c0_16, %c0_17] : memref<128x56xf32, #tpu.memory_space<vmem>>, vector<128x56xf32>
    %cst_18 = arith.constant dense<0.000000e+00> : vector<15x56xf32>
    %19 = tpu.matmul %17, %18, %cst_18 {dimension_numbers = #tpu.dot_dimension_numbers<[1], [0], [0], [1], [0, 0, 1, 1], [], []>} : vector<15x128xf32>, vector<128x56xf32>, vector<15x56xf32> -> vector<15x56xf32>
    %c0_19 = arith.constant 0 : index
    %c0_20 = arith.constant 0 : index
    %20 = vector.load %arg5[%c0_19, %c0_20] : memref<128x56xf32, #tpu.memory_space<vmem>>, vector<128x56xf32>
    %cst_21 = arith.constant dense<0.000000e+00> : vector<15x56xf32>
    %21 = tpu.matmul %17, %20, %cst_21 {dimension_numbers = #tpu.dot_dimension_numbers<[1], [0], [0], [1], [0, 0, 1, 1], [], []>} : vector<15x128xf32>, vector<128x56xf32>, vector<15x56xf32> -> vector<15x56xf32>
    %22 = arith.maximumf %19, %21 : vector<15x56xf32>
    %cst_22 = arith.constant 0.000000e+00 : f32
    %23 = vector.broadcast %cst_22 : f32 to vector<60x56xf32>
    %c0_23 = arith.constant 0 : index
    %c0_24 = arith.constant 0 : index
    %24 = vector.load %arg25[%c0_23, %c0_24] : memref<60x56xf32, #tpu.memory_space<vmem>>, vector<60x56xf32>
    tpu.vector_store %arg25[%c0_23, %c0_24], %23 {strides = array<i32>} : memref<60x56xf32, #tpu.memory_space<vmem>>, vector<60x56xf32>,
    %c0_25 = arith.constant 0 : index
    %c0_26 = arith.constant 0 : index
    %25 = vector.load %arg25[%c0_25, %c0_26] : memref<60x56xf32, #tpu.memory_space<vmem>>, vector<15x56xf32>
    tpu.vector_store %arg25[%c0_25, %c0_26], %22 {strides = array<i32>} : memref<60x56xf32, #tpu.memory_space<vmem>>, vector<15x56xf32>,
    %26 = vector.extract_strided_slice %22 {offsets = [0, 1], sizes = [15, 55], strides = [1, 1]} : vector<15x56xf32> to vector<15x55xf32>
    %c15 = arith.constant 15 : index
    %c0_27 = arith.constant 0 : index
    %27 = vector.load %arg25[%c15, %c0_27] : memref<60x56xf32, #tpu.memory_space<vmem>>, vector<15x55xf32>
    tpu.vector_store %arg25[%c15, %c0_27], %26 {strides = array<i32>} : memref<60x56xf32, #tpu.memory_space<vmem>>, vector<15x55xf32>,
    %28 = vector.extract_strided_slice %22 {offsets = [0, 2], sizes = [15, 54], strides = [1, 1]} : vector<15x56xf32> to vector<15x54xf32>
    %c30 = arith.constant 30 : index
    %c0_28 = arith.constant 0 : index
    %29 = vector.load %arg25[%c30, %c0_28] : memref<60x56xf32, #tpu.memory_space<vmem>>, vector<15x54xf32>
    tpu.vector_store %arg25[%c30, %c0_28], %28 {strides = array<i32>} : memref<60x56xf32, #tpu.memory_space<vmem>>, vector<15x54xf32>,
    %30 = vector.extract_strided_slice %22 {offsets = [0, 3], sizes = [15, 53], strides = [1, 1]} : vector<15x56xf32> to vector<15x53xf32>
    %c45 = arith.constant 45 : index
    %c0_29 = arith.constant 0 : index
    %31 = vector.load %arg25[%c45, %c0_29] : memref<60x56xf32, #tpu.memory_space<vmem>>, vector<15x53xf32>
    tpu.vector_store %arg25[%c45, %c0_29], %30 {strides = array<i32>} : memref<60x56xf32, #tpu.memory_space<vmem>>, vector<15x53xf32>,
    %c0_30 = arith.constant 0 : index
    %c0_31 = arith.constant 0 : index
    %32 = vector.load %arg6[%c0_30, %c0_31] : memref<30x60xf32, #tpu.memory_space<vmem>>, vector<30x60xf32>
    %c0_32 = arith.constant 0 : index
    %c0_33 = arith.constant 0 : index
    %33 = vector.load %arg25[%c0_32, %c0_33] : memref<60x56xf32, #tpu.memory_space<vmem>>, vector<60x56xf32>
    %cst_34 = arith.constant dense<0.000000e+00> : vector<30x56xf32>
    %34 = tpu.matmul %32, %33, %cst_34 {dimension_numbers = #tpu.dot_dimension_numbers<[1], [0], [0], [1], [0, 0, 1, 1], [], []>} : vector<30x60xf32>, vector<60x56xf32>, vector<30x56xf32> -> vector<30x56xf32>
    %c0_35 = arith.constant 0 : index
    %c0_36 = arith.constant 0 : index
    %35 = vector.load %arg7[%c0_35, %c0_36] : memref<30x1xf32, #tpu.memory_space<vmem>>, vector<30x1xf32>
    %36 = vector.broadcast %35 : vector<30x1xf32> to vector<30x56xf32>
    %37 = arith.addf %34, %36 : vector<30x56xf32>
    %cst_37 = arith.constant 0.000000e+00 : f32
    %38 = vector.broadcast %cst_37 : f32 to vector<30x56xf32>
    %39 = arith.maximumf %37, %38 : vector<30x56xf32>
    %c0_38 = arith.constant 0 : index
    %c0_39 = arith.constant 0 : index
    %40 = vector.load %arg8[%c0_38, %c0_39] : memref<56x20xf32, #tpu.memory_space<vmem>>, vector<56x20xf32>
    %cst_40 = arith.constant dense<0.000000e+00> : vector<30x20xf32>
    %41 = tpu.matmul %39, %40, %cst_40 {dimension_numbers = #tpu.dot_dimension_numbers<[1], [0], [0], [1], [0, 0, 1, 1], [], []>} : vector<30x56xf32>, vector<56x20xf32>, vector<30x20xf32> -> vector<30x20xf32>
    %c0_41 = arith.constant 0 : index
    %c0_42 = arith.constant 0 : index
    %42 = vector.load %arg9[%c0_41, %c0_42] : memref<56x20xf32, #tpu.memory_space<vmem>>, vector<56x20xf32>
    %cst_43 = arith.constant dense<0.000000e+00> : vector<30x20xf32>
    %43 = tpu.matmul %39, %42, %cst_43 {dimension_numbers = #tpu.dot_dimension_numbers<[1], [0], [0], [1], [0, 0, 1, 1], [], []>} : vector<30x56xf32>, vector<56x20xf32>, vector<30x20xf32> -> vector<30x20xf32>
    %44 = arith.maximumf %41, %43 : vector<30x20xf32>
    %45 = vector.extract_strided_slice %44 {offsets = [0, 0], sizes = [1, 20], strides = [1, 1]} : vector<30x20xf32> to vector<1x20xf32>
    %c0_44 = arith.constant 0 : index
    %c0_45 = arith.constant 0 : index
    %46 = vector.load %arg26[%c0_44, %c0_45] : memref<4x150xf32, #tpu.memory_space<vmem>>, vector<1x20xf32>
    tpu.vector_store %arg26[%c0_44, %c0_45], %45 {strides = array<i32>} : memref<4x150xf32, #tpu.memory_space<vmem>>, vector<1x20xf32>,
    %47 = vector.extract_strided_slice %44 {offsets = [1, 0], sizes = [1, 20], strides = [1, 1]} : vector<30x20xf32> to vector<1x20xf32>
    %c0_46 = arith.constant 0 : index
    %c20 = arith.constant 20 : index
    %48 = vector.load %arg26[%c0_46, %c20] : memref<4x150xf32, #tpu.memory_space<vmem>>, vector<1x20xf32>
    tpu.vector_store %arg26[%c0_46, %c20], %47 {strides = array<i32>} : memref<4x150xf32, #tpu.memory_space<vmem>>, vector<1x20xf32>,
    %49 = vector.extract_strided_slice %44 {offsets = [2, 0], sizes = [1, 20], strides = [1, 1]} : vector<30x20xf32> to vector<1x20xf32>
    %c0_47 = arith.constant 0 : index
    %c40 = arith.constant 40 : index
    %50 = vector.load %arg26[%c0_47, %c40] : memref<4x150xf32, #tpu.memory_space<vmem>>, vector<1x20xf32>
    tpu.vector_store %arg26[%c0_47, %c40], %49 {strides = array<i32>} : memref<4x150xf32, #tpu.memory_space<vmem>>, vector<1x20xf32>,
    %51 = vector.extract_strided_slice %44 {offsets = [3, 0], sizes = [1, 20], strides = [1, 1]} : vector<30x20xf32> to vector<1x20xf32>
    %c0_48 = arith.constant 0 : index
    %c60 = arith.constant 60 : index
    %52 = vector.load %arg26[%c0_48, %c60] : memref<4x150xf32, #tpu.memory_space<vmem>>, vector<1x20xf32>
    tpu.vector_store %arg26[%c0_48, %c60], %51 {strides = array<i32>} : memref<4x150xf32, #tpu.memory_space<vmem>>, vector<1x20xf32>,
    %53 = vector.extract_strided_slice %44 {offsets = [4, 0], sizes = [1, 20], strides = [1, 1]} : vector<30x20xf32> to vector<1x20xf32>
    %c0_49 = arith.constant 0 : index
    %c80 = arith.constant 80 : index
    %54 = vector.load %arg26[%c0_49, %c80] : memref<4x150xf32, #tpu.memory_space<vmem>>, vector<1x20xf32>
    tpu.vector_store %arg26[%c0_49, %c80], %53 {strides = array<i32>} : memref<4x150xf32, #tpu.memory_space<vmem>>, vector<1x20xf32>,
    %55 = vector.extract_strided_slice %44 {offsets = [5, 0], sizes = [1, 20], strides = [1, 1]} : vector<30x20xf32> to vector<1x20xf32>
    %c0_50 = arith.constant 0 : index
    %c100 = arith.constant 100 : index
    %56 = vector.load %arg26[%c0_50, %c100] : memref<4x150xf32, #tpu.memory_space<vmem>>, vector<1x20xf32>
    tpu.vector_store %arg26[%c0_50, %c100], %55 {strides = array<i32>} : memref<4x150xf32, #tpu.memory_space<vmem>>, vector<1x20xf32>,
    %57 = vector.extract_strided_slice %44 {offsets = [6, 0], sizes = [1, 20], strides = [1, 1]} : vector<30x20xf32> to vector<1x20xf32>
    %c0_51 = arith.constant 0 : index
    %c120 = arith.constant 120 : index
    %58 = vector.load %arg26[%c0_51, %c120] : memref<4x150xf32, #tpu.memory_space<vmem>>, vector<1x20xf32>
    tpu.vector_store %arg26[%c0_51, %c120], %57 {strides = array<i32>} : memref<4x150xf32, #tpu.memory_space<vmem>>, vector<1x20xf32>,
    %59 = vector.extract_strided_slice %44 {offsets = [7, 0], sizes = [1, 10], strides = [1, 1]} : vector<30x20xf32> to vector<1x10xf32>
    %c0_52 = arith.constant 0 : index
    %c140 = arith.constant 140 : index
    %60 = vector.load %arg26[%c0_52, %c140] : memref<4x150xf32, #tpu.memory_space<vmem>>, vector<1x10xf32>
    tpu.vector_store %arg26[%c0_52, %c140], %59 {strides = array<i32>} : memref<4x150xf32, #tpu.memory_space<vmem>>, vector<1x10xf32>,
    %61 = vector.extract_strided_slice %44 {offsets = [7, 10], sizes = [1, 10], strides = [1, 1]} : vector<30x20xf32> to vector<1x10xf32>
    %c1_53 = arith.constant 1 : index
    %c0_54 = arith.constant 0 : index
    %62 = vector.load %arg26[%c1_53, %c0_54] : memref<4x150xf32, #tpu.memory_space<vmem>>, vector<1x10xf32>
    tpu.vector_store %arg26[%c1_53, %c0_54], %61 {strides = array<i32>} : memref<4x150xf32, #tpu.memory_space<vmem>>, vector<1x10xf32>,
    %63 = vector.extract_strided_slice %44 {offsets = [8, 0], sizes = [1, 20], strides = [1, 1]} : vector<30x20xf32> to vector<1x20xf32>
    %c1_55 = arith.constant 1 : index
    %c10 = arith.constant 10 : index
    %64 = vector.load %arg26[%c1_55, %c10] : memref<4x150xf32, #tpu.memory_space<vmem>>, vector<1x20xf32>
    tpu.vector_store %arg26[%c1_55, %c10], %63 {strides = array<i32>} : memref<4x150xf32, #tpu.memory_space<vmem>>, vector<1x20xf32>,
    %65 = vector.extract_strided_slice %44 {offsets = [9, 0], sizes = [1, 20], strides = [1, 1]} : vector<30x20xf32> to vector<1x20xf32>
    %c1_56 = arith.constant 1 : index
    %c30_57 = arith.constant 30 : index
    %66 = vector.load %arg26[%c1_56, %c30_57] : memref<4x150xf32, #tpu.memory_space<vmem>>, vector<1x20xf32>
    tpu.vector_store %arg26[%c1_56, %c30_57], %65 {strides = array<i32>} : memref<4x150xf32, #tpu.memory_space<vmem>>, vector<1x20xf32>,
    %67 = vector.extract_strided_slice %44 {offsets = [10, 0], sizes = [1, 20], strides = [1, 1]} : vector<30x20xf32> to vector<1x20xf32>
    %c1_58 = arith.constant 1 : index
    %c50 = arith.constant 50 : index
    %68 = vector.load %arg26[%c1_58, %c50] : memref<4x150xf32, #tpu.memory_space<vmem>>, vector<1x20xf32>
    tpu.vector_store %arg26[%c1_58, %c50], %67 {strides = array<i32>} : memref<4x150xf32, #tpu.memory_space<vmem>>, vector<1x20xf32>,
    %69 = vector.extract_strided_slice %44 {offsets = [11, 0], sizes = [1, 20], strides = [1, 1]} : vector<30x20xf32> to vector<1x20xf32>
    %c1_59 = arith.constant 1 : index
    %c70 = arith.constant 70 : index
    %70 = vector.load %arg26[%c1_59, %c70] : memref<4x150xf32, #tpu.memory_space<vmem>>, vector<1x20xf32>
    tpu.vector_store %arg26[%c1_59, %c70], %69 {strides = array<i32>} : memref<4x150xf32, #tpu.memory_space<vmem>>, vector<1x20xf32>,
    %71 = vector.extract_strided_slice %44 {offsets = [12, 0], sizes = [1, 20], strides = [1, 1]} : vector<30x20xf32> to vector<1x20xf32>
    %c1_60 = arith.constant 1 : index
    %c90 = arith.constant 90 : index
    %72 = vector.load %arg26[%c1_60, %c90] : memref<4x150xf32, #tpu.memory_space<vmem>>, vector<1x20xf32>
    tpu.vector_store %arg26[%c1_60, %c90], %71 {strides = array<i32>} : memref<4x150xf32, #tpu.memory_space<vmem>>, vector<1x20xf32>,
    %73 = vector.extract_strided_slice %44 {offsets = [13, 0], sizes = [1, 20], strides = [1, 1]} : vector<30x20xf32> to vector<1x20xf32>
    %c1_61 = arith.constant 1 : index
    %c110 = arith.constant 110 : index
    %74 = vector.load %arg26[%c1_61, %c110] : memref<4x150xf32, #tpu.memory_space<vmem>>, vector<1x20xf32>
    tpu.vector_store %arg26[%c1_61, %c110], %73 {strides = array<i32>} : memref<4x150xf32, #tpu.memory_space<vmem>>, vector<1x20xf32>,
    %75 = vector.extract_strided_slice %44 {offsets = [14, 0], sizes = [1, 20], strides = [1, 1]} : vector<30x20xf32> to vector<1x20xf32>
    %c1_62 = arith.constant 1 : index
    %c130 = arith.constant 130 : index
    %76 = vector.load %arg26[%c1_62, %c130] : memref<4x150xf32, #tpu.memory_space<vmem>>, vector<1x20xf32>
    tpu.vector_store %arg26[%c1_62, %c130], %75 {strides = array<i32>} : memref<4x150xf32, #tpu.memory_space<vmem>>, vector<1x20xf32>,
    %77 = vector.extract_strided_slice %44 {offsets = [15, 0], sizes = [1, 20], strides = [1, 1]} : vector<30x20xf32> to vector<1x20xf32>
    %c2_63 = arith.constant 2 : index
    %c0_64 = arith.constant 0 : index
    %78 = vector.load %arg26[%c2_63, %c0_64] : memref<4x150xf32, #tpu.memory_space<vmem>>, vector<1x20xf32>
    tpu.vector_store %arg26[%c2_63, %c0_64], %77 {strides = array<i32>} : memref<4x150xf32, #tpu.memory_space<vmem>>, vector<1x20xf32>,
    %79 = vector.extract_strided_slice %44 {offsets = [16, 0], sizes = [1, 20], strides = [1, 1]} : vector<30x20xf32> to vector<1x20xf32>
    %c2_65 = arith.constant 2 : index
    %c20_66 = arith.constant 20 : index
    %80 = vector.load %arg26[%c2_65, %c20_66] : memref<4x150xf32, #tpu.memory_space<vmem>>, vector<1x20xf32>
    tpu.vector_store %arg26[%c2_65, %c20_66], %79 {strides = array<i32>} : memref<4x150xf32, #tpu.memory_space<vmem>>, vector<1x20xf32>,
    %81 = vector.extract_strided_slice %44 {offsets = [17, 0], sizes = [1, 20], strides = [1, 1]} : vector<30x20xf32> to vector<1x20xf32>
    %c2_67 = arith.constant 2 : index
    %c40_68 = arith.constant 40 : index
    %82 = vector.load %arg26[%c2_67, %c40_68] : memref<4x150xf32, #tpu.memory_space<vmem>>, vector<1x20xf32>
    tpu.vector_store %arg26[%c2_67, %c40_68], %81 {strides = array<i32>} : memref<4x150xf32, #tpu.memory_space<vmem>>, vector<1x20xf32>,
    %83 = vector.extract_strided_slice %44 {offsets = [18, 0], sizes = [1, 20], strides = [1, 1]} : vector<30x20xf32> to vector<1x20xf32>
    %c2_69 = arith.constant 2 : index
    %c60_70 = arith.constant 60 : index
    %84 = vector.load %arg26[%c2_69, %c60_70] : memref<4x150xf32, #tpu.memory_space<vmem>>, vector<1x20xf32>
    tpu.vector_store %arg26[%c2_69, %c60_70], %83 {strides = array<i32>} : memref<4x150xf32, #tpu.memory_space<vmem>>, vector<1x20xf32>,
    %85 = vector.extract_strided_slice %44 {offsets = [19, 0], sizes = [1, 20], strides = [1, 1]} : vector<30x20xf32> to vector<1x20xf32>
    %c2_71 = arith.constant 2 : index
    %c80_72 = arith.constant 80 : index
    %86 = vector.load %arg26[%c2_71, %c80_72] : memref<4x150xf32, #tpu.memory_space<vmem>>, vector<1x20xf32>
    tpu.vector_store %arg26[%c2_71, %c80_72], %85 {strides = array<i32>} : memref<4x150xf32, #tpu.memory_space<vmem>>, vector<1x20xf32>,
    %87 = vector.extract_strided_slice %44 {offsets = [20, 0], sizes = [1, 20], strides = [1, 1]} : vector<30x20xf32> to vector<1x20xf32>
    %c2_73 = arith.constant 2 : index
    %c100_74 = arith.constant 100 : index
    %88 = vector.load %arg26[%c2_73, %c100_74] : memref<4x150xf32, #tpu.memory_space<vmem>>, vector<1x20xf32>
    tpu.vector_store %arg26[%c2_73, %c100_74], %87 {strides = array<i32>} : memref<4x150xf32, #tpu.memory_space<vmem>>, vector<1x20xf32>,
    %89 = vector.extract_strided_slice %44 {offsets = [21, 0], sizes = [1, 20], strides = [1, 1]} : vector<30x20xf32> to vector<1x20xf32>
    %c2_75 = arith.constant 2 : index
    %c120_76 = arith.constant 120 : index
    %90 = vector.load %arg26[%c2_75, %c120_76] : memref<4x150xf32, #tpu.memory_space<vmem>>, vector<1x20xf32>
    tpu.vector_store %arg26[%c2_75, %c120_76], %89 {strides = array<i32>} : memref<4x150xf32, #tpu.memory_space<vmem>>, vector<1x20xf32>,
    %91 = vector.extract_strided_slice %44 {offsets = [22, 0], sizes = [1, 10], strides = [1, 1]} : vector<30x20xf32> to vector<1x10xf32>
    %c2_77 = arith.constant 2 : index
    %c140_78 = arith.constant 140 : index
    %92 = vector.load %arg26[%c2_77, %c140_78] : memref<4x150xf32, #tpu.memory_space<vmem>>, vector<1x10xf32>
    tpu.vector_store %arg26[%c2_77, %c140_78], %91 {strides = array<i32>} : memref<4x150xf32, #tpu.memory_space<vmem>>, vector<1x10xf32>,
    %93 = vector.extract_strided_slice %44 {offsets = [22, 10], sizes = [1, 10], strides = [1, 1]} : vector<30x20xf32> to vector<1x10xf32>
    %c3_79 = arith.constant 3 : index
    %c0_80 = arith.constant 0 : index
    %94 = vector.load %arg26[%c3_79, %c0_80] : memref<4x150xf32, #tpu.memory_space<vmem>>, vector<1x10xf32>
    tpu.vector_store %arg26[%c3_79, %c0_80], %93 {strides = array<i32>} : memref<4x150xf32, #tpu.memory_space<vmem>>, vector<1x10xf32>,
    %95 = vector.extract_strided_slice %44 {offsets = [23, 0], sizes = [1, 20], strides = [1, 1]} : vector<30x20xf32> to vector<1x20xf32>
    %c3_81 = arith.constant 3 : index
    %c10_82 = arith.constant 10 : index
    %96 = vector.load %arg26[%c3_81, %c10_82] : memref<4x150xf32, #tpu.memory_space<vmem>>, vector<1x20xf32>
    tpu.vector_store %arg26[%c3_81, %c10_82], %95 {strides = array<i32>} : memref<4x150xf32, #tpu.memory_space<vmem>>, vector<1x20xf32>,
    %97 = vector.extract_strided_slice %44 {offsets = [24, 0], sizes = [1, 20], strides = [1, 1]} : vector<30x20xf32> to vector<1x20xf32>
    %c3_83 = arith.constant 3 : index
    %c30_84 = arith.constant 30 : index
    %98 = vector.load %arg26[%c3_83, %c30_84] : memref<4x150xf32, #tpu.memory_space<vmem>>, vector<1x20xf32>
    tpu.vector_store %arg26[%c3_83, %c30_84], %97 {strides = array<i32>} : memref<4x150xf32, #tpu.memory_space<vmem>>, vector<1x20xf32>,
    %99 = vector.extract_strided_slice %44 {offsets = [25, 0], sizes = [1, 20], strides = [1, 1]} : vector<30x20xf32> to vector<1x20xf32>
    %c3_85 = arith.constant 3 : index
    %c50_86 = arith.constant 50 : index
    %100 = vector.load %arg26[%c3_85, %c50_86] : memref<4x150xf32, #tpu.memory_space<vmem>>, vector<1x20xf32>
    tpu.vector_store %arg26[%c3_85, %c50_86], %99 {strides = array<i32>} : memref<4x150xf32, #tpu.memory_space<vmem>>, vector<1x20xf32>,
    %101 = vector.extract_strided_slice %44 {offsets = [26, 0], sizes = [1, 20], strides = [1, 1]} : vector<30x20xf32> to vector<1x20xf32>
    %c3_87 = arith.constant 3 : index
    %c70_88 = arith.constant 70 : index
    %102 = vector.load %arg26[%c3_87, %c70_88] : memref<4x150xf32, #tpu.memory_space<vmem>>, vector<1x20xf32>
    tpu.vector_store %arg26[%c3_87, %c70_88], %101 {strides = array<i32>} : memref<4x150xf32, #tpu.memory_space<vmem>>, vector<1x20xf32>,
    %103 = vector.extract_strided_slice %44 {offsets = [27, 0], sizes = [1, 20], strides = [1, 1]} : vector<30x20xf32> to vector<1x20xf32>
    %c3_89 = arith.constant 3 : index
    %c90_90 = arith.constant 90 : index
    %104 = vector.load %arg26[%c3_89, %c90_90] : memref<4x150xf32, #tpu.memory_space<vmem>>, vector<1x20xf32>
    tpu.vector_store %arg26[%c3_89, %c90_90], %103 {strides = array<i32>} : memref<4x150xf32, #tpu.memory_space<vmem>>, vector<1x20xf32>,
    %105 = vector.extract_strided_slice %44 {offsets = [28, 0], sizes = [1, 20], strides = [1, 1]} : vector<30x20xf32> to vector<1x20xf32>
    %c3_91 = arith.constant 3 : index
    %c110_92 = arith.constant 110 : index
    %106 = vector.load %arg26[%c3_91, %c110_92] : memref<4x150xf32, #tpu.memory_space<vmem>>, vector<1x20xf32>
    tpu.vector_store %arg26[%c3_91, %c110_92], %105 {strides = array<i32>} : memref<4x150xf32, #tpu.memory_space<vmem>>, vector<1x20xf32>,
    %107 = vector.extract_strided_slice %44 {offsets = [29, 0], sizes = [1, 20], strides = [1, 1]} : vector<30x20xf32> to vector<1x20xf32>
    %c3_93 = arith.constant 3 : index
    %c130_94 = arith.constant 130 : index
    %108 = vector.load %arg26[%c3_93, %c130_94] : memref<4x150xf32, #tpu.memory_space<vmem>>, vector<1x20xf32>
    tpu.vector_store %arg26[%c3_93, %c130_94], %107 {strides = array<i32>} : memref<4x150xf32, #tpu.memory_space<vmem>>, vector<1x20xf32>,
    %c0_95 = arith.constant 0 : index
    %c0_96 = arith.constant 0 : index
    %109 = vector.load %arg26[%c0_95, %c0_96] : memref<4x150xf32, #tpu.memory_space<vmem>>, vector<4x150xf32>
    %c0_97 = arith.constant 0 : index
    %c0_98 = arith.constant 0 : index
    %110 = vector.load %arg10[%c0_97, %c0_98] : memref<150x16xf32, #tpu.memory_space<vmem>>, vector<150x16xf32>
    %cst_99 = arith.constant dense<0.000000e+00> : vector<4x16xf32>
    %111 = tpu.matmul %109, %110, %cst_99 {dimension_numbers = #tpu.dot_dimension_numbers<[1], [0], [0], [1], [0, 0, 1, 1], [], []>} : vector<4x150xf32>, vector<150x16xf32>, vector<4x16xf32> -> vector<4x16xf32>
    %c0_100 = arith.constant 0 : index
    %c0_101 = arith.constant 0 : index
    %112 = vector.load %arg11[%c0_100, %c0_101] : memref<1x16xf32, #tpu.memory_space<vmem>>, vector<1x16xf32>
    %113 = vector.broadcast %112 : vector<1x16xf32> to vector<4x16xf32>
    %114 = arith.addf %111, %113 : vector<4x16xf32>
    %c0_102 = arith.constant 0 : index
    %c0_103 = arith.constant 0 : index
    %115 = vector.load %arg22[%c0_102, %c0_103] : memref<4x16xf32, #tpu.memory_space<vmem>>, vector<4x16xf32>
    tpu.vector_store %arg22[%c0_102, %c0_103], %114 {strides = array<i32>} : memref<4x16xf32, #tpu.memory_space<vmem>>, vector<4x16xf32>,
    %116 = vector.extract_strided_slice %114 {offsets = [0, 0], sizes = [4, 8], strides = [1, 1]} : vector<4x16xf32> to vector<4x8xf32>
    %117 = vector.extract_strided_slice %114 {offsets = [0, 8], sizes = [4, 8], strides = [1, 1]} : vector<4x16xf32> to vector<4x8xf32>
    %c0_104 = arith.constant 0 : index
    %c0_105 = arith.constant 0 : index
    %118 = vector.load %arg1[%c0_104, %c0_105] : memref<4x8xf32, #tpu.memory_space<vmem>>, vector<4x8xf32>
    %cst_106 = arith.constant 5.000000e-01 : f32
    %119 = vector.broadcast %cst_106 : f32 to vector<4x8xf32>
    %120 = arith.mulf %119, %117 : vector<4x8xf32>
    %121 = math.exp %120 : vector<4x8xf32>
    %122 = arith.mulf %118, %121 : vector<4x8xf32>
    %123 = arith.addf %116, %122 : vector<4x8xf32>
    %c0_107 = arith.constant 0 : index
    %c0_108 = arith.constant 0 : index
    %124 = vector.load %arg23[%c0_107, %c0_108] : memref<4x8xf32, #tpu.memory_space<vmem>>, vector<4x8xf32>
    tpu.vector_store %arg23[%c0_107, %c0_108], %123 {strides = array<i32>} : memref<4x8xf32, #tpu.memory_space<vmem>>, vector<4x8xf32>,
    %c0_109 = arith.constant 0 : index
    %c0_110 = arith.constant 0 : index
    %125 = vector.load %arg12[%c0_109, %c0_110] : memref<8x24xf32, #tpu.memory_space<vmem>>, vector<8x24xf32>
    %cst_111 = arith.constant dense<0.000000e+00> : vector<4x24xf32>
    %126 = tpu.matmul %123, %125, %cst_111 {dimension_numbers = #tpu.dot_dimension_numbers<[1], [0], [0], [1], [0, 0, 1, 1], [], []>} : vector<4x8xf32>, vector<8x24xf32>, vector<4x24xf32> -> vector<4x24xf32>
    %c0_112 = arith.constant 0 : index
    %c0_113 = arith.constant 0 : index
    %127 = vector.load %arg13[%c0_112, %c0_113] : memref<1x24xf32, #tpu.memory_space<vmem>>, vector<1x24xf32>
    %128 = vector.broadcast %127 : vector<1x24xf32> to vector<4x24xf32>
    %129 = arith.addf %126, %128 : vector<4x24xf32>
    %cst_114 = arith.constant 0.000000e+00 : f32
    %130 = vector.broadcast %cst_114 : f32 to vector<2x96xf32>
    %c0_115 = arith.constant 0 : index
    %c0_116 = arith.constant 0 : index
    %131 = vector.load %arg27[%c0_115, %c0_116] : memref<2x96xf32, #tpu.memory_space<vmem>>, vector<2x96xf32>
    tpu.vector_store %arg27[%c0_115, %c0_116], %130 {strides = array<i32>} : memref<2x96xf32, #tpu.memory_space<vmem>>, vector<2x96xf32>,
    %132 = vector.extract_strided_slice %129 {offsets = [0, 0], sizes = [1, 24], strides = [1, 1]} : vector<4x24xf32> to vector<1x24xf32>
    %c0_117 = arith.constant 0 : index
    %c0_118 = arith.constant 0 : index
    %133 = vector.load %arg27[%c0_117, %c0_118] : memref<2x96xf32, #tpu.memory_space<vmem>>, vector<1x24xf32>
    tpu.vector_store %arg27[%c0_117, %c0_118], %132 {strides = array<i32>} : memref<2x96xf32, #tpu.memory_space<vmem>>, vector<1x24xf32>,
    %134 = vector.extract_strided_slice %129 {offsets = [1, 0], sizes = [1, 24], strides = [1, 1]} : vector<4x24xf32> to vector<1x24xf32>
    %c0_119 = arith.constant 0 : index
    %c24 = arith.constant 24 : index
    %135 = vector.load %arg27[%c0_119, %c24] : memref<2x96xf32, #tpu.memory_space<vmem>>, vector<1x24xf32>
    tpu.vector_store %arg27[%c0_119, %c24], %134 {strides = array<i32>} : memref<2x96xf32, #tpu.memory_space<vmem>>, vector<1x24xf32>,
    %136 = vector.extract_strided_slice %129 {offsets = [2, 0], sizes = [1, 24], strides = [1, 1]} : vector<4x24xf32> to vector<1x24xf32>
    %c0_120 = arith.constant 0 : index
    %c48 = arith.constant 48 : index
    %137 = vector.load %arg27[%c0_120, %c48] : memref<2x96xf32, #tpu.memory_space<vmem>>, vector<1x24xf32>
    tpu.vector_store %arg27[%c0_120, %c48], %136 {strides = array<i32>} : memref<2x96xf32, #tpu.memory_space<vmem>>, vector<1x24xf32>,
    %138 = vector.extract_strided_slice %129 {offsets = [3, 0], sizes = [1, 24], strides = [1, 1]} : vector<4x24xf32> to vector<1x24xf32>
    %c0_121 = arith.constant 0 : index
    %c72 = arith.constant 72 : index
    %139 = vector.load %arg27[%c0_121, %c72] : memref<2x96xf32, #tpu.memory_space<vmem>>, vector<1x24xf32>
    tpu.vector_store %arg27[%c0_121, %c72], %138 {strides = array<i32>} : memref<2x96xf32, #tpu.memory_space<vmem>>, vector<1x24xf32>,
    %140 = vector.extract_strided_slice %129 {offsets = [0, 1], sizes = [1, 23], strides = [1, 1]} : vector<4x24xf32> to vector<1x23xf32>
    %c1_122 = arith.constant 1 : index
    %c0_123 = arith.constant 0 : index
    %141 = vector.load %arg27[%c1_122, %c0_123] : memref<2x96xf32, #tpu.memory_space<vmem>>, vector<1x23xf32>
    tpu.vector_store %arg27[%c1_122, %c0_123], %140 {strides = array<i32>} : memref<2x96xf32, #tpu.memory_space<vmem>>, vector<1x23xf32>,
    %142 = vector.extract_strided_slice %129 {offsets = [1, 1], sizes = [1, 23], strides = [1, 1]} : vector<4x24xf32> to vector<1x23xf32>
    %c1_124 = arith.constant 1 : index
    %c24_125 = arith.constant 24 : index
    %143 = vector.load %arg27[%c1_124, %c24_125] : memref<2x96xf32, #tpu.memory_space<vmem>>, vector<1x23xf32>
    tpu.vector_store %arg27[%c1_124, %c24_125], %142 {strides = array<i32>} : memref<2x96xf32, #tpu.memory_space<vmem>>, vector<1x23xf32>,
    %144 = vector.extract_strided_slice %129 {offsets = [2, 1], sizes = [1, 23], strides = [1, 1]} : vector<4x24xf32> to vector<1x23xf32>
    %c1_126 = arith.constant 1 : index
    %c48_127 = arith.constant 48 : index
    %145 = vector.load %arg27[%c1_126, %c48_127] : memref<2x96xf32, #tpu.memory_space<vmem>>, vector<1x23xf32>
    tpu.vector_store %arg27[%c1_126, %c48_127], %144 {strides = array<i32>} : memref<2x96xf32, #tpu.memory_space<vmem>>, vector<1x23xf32>,
    %146 = vector.extract_strided_slice %129 {offsets = [3, 1], sizes = [1, 23], strides = [1, 1]} : vector<4x24xf32> to vector<1x23xf32>
    %c1_128 = arith.constant 1 : index
    %c72_129 = arith.constant 72 : index
    %147 = vector.load %arg27[%c1_128, %c72_129] : memref<2x96xf32, #tpu.memory_space<vmem>>, vector<1x23xf32>
    tpu.vector_store %arg27[%c1_128, %c72_129], %146 {strides = array<i32>} : memref<2x96xf32, #tpu.memory_space<vmem>>, vector<1x23xf32>,
    %c0_130 = arith.constant 0 : index
    %c0_131 = arith.constant 0 : index
    %148 = vector.load %arg14[%c0_130, %c0_131] : memref<15x2xf32, #tpu.memory_space<vmem>>, vector<15x2xf32>
    %c0_132 = arith.constant 0 : index
    %c0_133 = arith.constant 0 : index
    %149 = vector.load %arg27[%c0_132, %c0_133] : memref<2x96xf32, #tpu.memory_space<vmem>>, vector<2x96xf32>
    %cst_134 = arith.constant dense<0.000000e+00> : vector<15x96xf32>
    %150 = tpu.matmul %148, %149, %cst_134 {dimension_numbers = #tpu.dot_dimension_numbers<[1], [0], [0], [1], [0, 0, 1, 1], [], []>} : vector<15x2xf32>, vector<2x96xf32>, vector<15x96xf32> -> vector<15x96xf32>
    %c0_135 = arith.constant 0 : index
    %c0_136 = arith.constant 0 : index
    %151 = vector.load %arg15[%c0_135, %c0_136] : memref<15x1xf32, #tpu.memory_space<vmem>>, vector<15x1xf32>
    %152 = vector.broadcast %151 : vector<15x1xf32> to vector<15x96xf32>
    %153 = arith.addf %150, %152 : vector<15x96xf32>
    %cst_137 = arith.constant 0.000000e+00 : f32
    %154 = vector.broadcast %cst_137 : f32 to vector<15x96xf32>
    %155 = arith.maximumf %153, %154 : vector<15x96xf32>
    %cst_138 = arith.constant 0.000000e+00 : f32
    %156 = vector.broadcast %cst_138 : f32 to vector<30x96xf32>
    %c0_139 = arith.constant 0 : index
    %c0_140 = arith.constant 0 : index
    %157 = vector.load %arg28[%c0_139, %c0_140] : memref<30x96xf32, #tpu.memory_space<vmem>>, vector<30x96xf32>
    tpu.vector_store %arg28[%c0_139, %c0_140], %156 {strides = array<i32>} : memref<30x96xf32, #tpu.memory_space<vmem>>, vector<30x96xf32>,
    %c0_141 = arith.constant 0 : index
    %c0_142 = arith.constant 0 : index
    %158 = vector.load %arg28[%c0_141, %c0_142] : memref<30x96xf32, #tpu.memory_space<vmem>>, vector<15x96xf32>
    tpu.vector_store %arg28[%c0_141, %c0_142], %155 {strides = array<i32>} : memref<30x96xf32, #tpu.memory_space<vmem>>, vector<15x96xf32>,
    %159 = vector.extract_strided_slice %155 {offsets = [0, 1], sizes = [15, 95], strides = [1, 1]} : vector<15x96xf32> to vector<15x95xf32>
    %c15_143 = arith.constant 15 : index
    %c0_144 = arith.constant 0 : index
    %160 = vector.load %arg28[%c15_143, %c0_144] : memref<30x96xf32, #tpu.memory_space<vmem>>, vector<15x95xf32>
    tpu.vector_store %arg28[%c15_143, %c0_144], %159 {strides = array<i32>} : memref<30x96xf32, #tpu.memory_space<vmem>>, vector<15x95xf32>,
    %c0_145 = arith.constant 0 : index
    %c0_146 = arith.constant 0 : index
    %161 = vector.load %arg16[%c0_145, %c0_146] : memref<30x30xf32, #tpu.memory_space<vmem>>, vector<30x30xf32>
    %c0_147 = arith.constant 0 : index
    %c0_148 = arith.constant 0 : index
    %162 = vector.load %arg28[%c0_147, %c0_148] : memref<30x96xf32, #tpu.memory_space<vmem>>, vector<30x96xf32>
    %cst_149 = arith.constant dense<0.000000e+00> : vector<30x96xf32>
    %163 = tpu.matmul %161, %162, %cst_149 {dimension_numbers = #tpu.dot_dimension_numbers<[1], [0], [0], [1], [0, 0, 1, 1], [], []>} : vector<30x30xf32>, vector<30x96xf32>, vector<30x96xf32> -> vector<30x96xf32>
    %c0_150 = arith.constant 0 : index
    %c0_151 = arith.constant 0 : index
    %164 = vector.load %arg17[%c0_150, %c0_151] : memref<30x1xf32, #tpu.memory_space<vmem>>, vector<30x1xf32>
    %165 = vector.broadcast %164 : vector<30x1xf32> to vector<30x96xf32>
    %166 = arith.addf %163, %165 : vector<30x96xf32>
    %cst_152 = arith.constant 0.000000e+00 : f32
    %167 = vector.broadcast %cst_152 : f32 to vector<30x96xf32>
    %168 = arith.maximumf %166, %167 : vector<30x96xf32>
    %c0_153 = arith.constant 0 : index
    %c0_154 = arith.constant 0 : index
    %169 = vector.load %arg18[%c0_153, %c0_154] : memref<96x88xf32, #tpu.memory_space<vmem>>, vector<96x88xf32>
    %cst_155 = arith.constant dense<0.000000e+00> : vector<30x88xf32>
    %170 = tpu.matmul %168, %169, %cst_155 {dimension_numbers = #tpu.dot_dimension_numbers<[1], [0], [0], [1], [0, 0, 1, 1], [], []>} : vector<30x96xf32>, vector<96x88xf32>, vector<30x88xf32> -> vector<30x88xf32>
    %171 = vector.extract_strided_slice %170 {offsets = [0, 0], sizes = [1, 88], strides = [1, 1]} : vector<30x88xf32> to vector<1x88xf32>
    %c0_156 = arith.constant 0 : index
    %c0_157 = arith.constant 0 : index
    %172 = vector.load %arg29[%c0_156, %c0_157] : memref<4x660xf32, #tpu.memory_space<vmem>>, vector<1x88xf32>
    tpu.vector_store %arg29[%c0_156, %c0_157], %171 {strides = array<i32>} : memref<4x660xf32, #tpu.memory_space<vmem>>, vector<1x88xf32>,
    %173 = vector.extract_strided_slice %170 {offsets = [1, 0], sizes = [1, 88], strides = [1, 1]} : vector<30x88xf32> to vector<1x88xf32>
    %c0_158 = arith.constant 0 : index
    %c88 = arith.constant 88 : index
    %174 = vector.load %arg29[%c0_158, %c88] : memref<4x660xf32, #tpu.memory_space<vmem>>, vector<1x88xf32>
    tpu.vector_store %arg29[%c0_158, %c88], %173 {strides = array<i32>} : memref<4x660xf32, #tpu.memory_space<vmem>>, vector<1x88xf32>,
    %175 = vector.extract_strided_slice %170 {offsets = [2, 0], sizes = [1, 88], strides = [1, 1]} : vector<30x88xf32> to vector<1x88xf32>
    %c0_159 = arith.constant 0 : index
    %c176 = arith.constant 176 : index
    %176 = vector.load %arg29[%c0_159, %c176] : memref<4x660xf32, #tpu.memory_space<vmem>>, vector<1x88xf32>
    tpu.vector_store %arg29[%c0_159, %c176], %175 {strides = array<i32>} : memref<4x660xf32, #tpu.memory_space<vmem>>, vector<1x88xf32>,
    %177 = vector.extract_strided_slice %170 {offsets = [3, 0], sizes = [1, 88], strides = [1, 1]} : vector<30x88xf32> to vector<1x88xf32>
    %c0_160 = arith.constant 0 : index
    %c264 = arith.constant 264 : index
    %178 = vector.load %arg29[%c0_160, %c264] : memref<4x660xf32, #tpu.memory_space<vmem>>, vector<1x88xf32>
    tpu.vector_store %arg29[%c0_160, %c264], %177 {strides = array<i32>} : memref<4x660xf32, #tpu.memory_space<vmem>>, vector<1x88xf32>,
    %179 = vector.extract_strided_slice %170 {offsets = [4, 0], sizes = [1, 88], strides = [1, 1]} : vector<30x88xf32> to vector<1x88xf32>
    %c0_161 = arith.constant 0 : index
    %c352 = arith.constant 352 : index
    %180 = vector.load %arg29[%c0_161, %c352] : memref<4x660xf32, #tpu.memory_space<vmem>>, vector<1x88xf32>
    tpu.vector_store %arg29[%c0_161, %c352], %179 {strides = array<i32>} : memref<4x660xf32, #tpu.memory_space<vmem>>, vector<1x88xf32>,
    %181 = vector.extract_strided_slice %170 {offsets = [5, 0], sizes = [1, 88], strides = [1, 1]} : vector<30x88xf32> to vector<1x88xf32>
    %c0_162 = arith.constant 0 : index
    %c440 = arith.constant 440 : index
    %182 = vector.load %arg29[%c0_162, %c440] : memref<4x660xf32, #tpu.memory_space<vmem>>, vector<1x88xf32>
    tpu.vector_store %arg29[%c0_162, %c440], %181 {strides = array<i32>} : memref<4x660xf32, #tpu.memory_space<vmem>>, vector<1x88xf32>,
    %183 = vector.extract_strided_slice %170 {offsets = [6, 0], sizes = [1, 88], strides = [1, 1]} : vector<30x88xf32> to vector<1x88xf32>
    %c0_163 = arith.constant 0 : index
    %c528 = arith.constant 528 : index
    %184 = vector.load %arg29[%c0_163, %c528] : memref<4x660xf32, #tpu.memory_space<vmem>>, vector<1x88xf32>
    tpu.vector_store %arg29[%c0_163, %c528], %183 {strides = array<i32>} : memref<4x660xf32, #tpu.memory_space<vmem>>, vector<1x88xf32>,
    %185 = vector.extract_strided_slice %170 {offsets = [7, 0], sizes = [1, 44], strides = [1, 1]} : vector<30x88xf32> to vector<1x44xf32>
    %c0_164 = arith.constant 0 : index
    %c616 = arith.constant 616 : index
    %186 = vector.load %arg29[%c0_164, %c616] : memref<4x660xf32, #tpu.memory_space<vmem>>, vector<1x44xf32>
    tpu.vector_store %arg29[%c0_164, %c616], %185 {strides = array<i32>} : memref<4x660xf32, #tpu.memory_space<vmem>>, vector<1x44xf32>,
    %187 = vector.extract_strided_slice %170 {offsets = [7, 44], sizes = [1, 44], strides = [1, 1]} : vector<30x88xf32> to vector<1x44xf32>
    %c1_165 = arith.constant 1 : index
    %c0_166 = arith.constant 0 : index
    %188 = vector.load %arg29[%c1_165, %c0_166] : memref<4x660xf32, #tpu.memory_space<vmem>>, vector<1x44xf32>
    tpu.vector_store %arg29[%c1_165, %c0_166], %187 {strides = array<i32>} : memref<4x660xf32, #tpu.memory_space<vmem>>, vector<1x44xf32>,
    %189 = vector.extract_strided_slice %170 {offsets = [8, 0], sizes = [1, 88], strides = [1, 1]} : vector<30x88xf32> to vector<1x88xf32>
    %c1_167 = arith.constant 1 : index
    %c44 = arith.constant 44 : index
    %190 = vector.load %arg29[%c1_167, %c44] : memref<4x660xf32, #tpu.memory_space<vmem>>, vector<1x88xf32>
    tpu.vector_store %arg29[%c1_167, %c44], %189 {strides = array<i32>} : memref<4x660xf32, #tpu.memory_space<vmem>>, vector<1x88xf32>,
    %191 = vector.extract_strided_slice %170 {offsets = [9, 0], sizes = [1, 88], strides = [1, 1]} : vector<30x88xf32> to vector<1x88xf32>
    %c1_168 = arith.constant 1 : index
    %c132 = arith.constant 132 : index
    %192 = vector.load %arg29[%c1_168, %c132] : memref<4x660xf32, #tpu.memory_space<vmem>>, vector<1x88xf32>
    tpu.vector_store %arg29[%c1_168, %c132], %191 {strides = array<i32>} : memref<4x660xf32, #tpu.memory_space<vmem>>, vector<1x88xf32>,
    %193 = vector.extract_strided_slice %170 {offsets = [10, 0], sizes = [1, 88], strides = [1, 1]} : vector<30x88xf32> to vector<1x88xf32>
    %c1_169 = arith.constant 1 : index
    %c220 = arith.constant 220 : index
    %194 = vector.load %arg29[%c1_169, %c220] : memref<4x660xf32, #tpu.memory_space<vmem>>, vector<1x88xf32>
    tpu.vector_store %arg29[%c1_169, %c220], %193 {strides = array<i32>} : memref<4x660xf32, #tpu.memory_space<vmem>>, vector<1x88xf32>,
    %195 = vector.extract_strided_slice %170 {offsets = [11, 0], sizes = [1, 88], strides = [1, 1]} : vector<30x88xf32> to vector<1x88xf32>
    %c1_170 = arith.constant 1 : index
    %c308 = arith.constant 308 : index
    %196 = vector.load %arg29[%c1_170, %c308] : memref<4x660xf32, #tpu.memory_space<vmem>>, vector<1x88xf32>
    tpu.vector_store %arg29[%c1_170, %c308], %195 {strides = array<i32>} : memref<4x660xf32, #tpu.memory_space<vmem>>, vector<1x88xf32>,
    %197 = vector.extract_strided_slice %170 {offsets = [12, 0], sizes = [1, 88], strides = [1, 1]} : vector<30x88xf32> to vector<1x88xf32>
    %c1_171 = arith.constant 1 : index
    %c396 = arith.constant 396 : index
    %198 = vector.load %arg29[%c1_171, %c396] : memref<4x660xf32, #tpu.memory_space<vmem>>, vector<1x88xf32>
    tpu.vector_store %arg29[%c1_171, %c396], %197 {strides = array<i32>} : memref<4x660xf32, #tpu.memory_space<vmem>>, vector<1x88xf32>,
    %199 = vector.extract_strided_slice %170 {offsets = [13, 0], sizes = [1, 88], strides = [1, 1]} : vector<30x88xf32> to vector<1x88xf32>
    %c1_172 = arith.constant 1 : index
    %c484 = arith.constant 484 : index
    %200 = vector.load %arg29[%c1_172, %c484] : memref<4x660xf32, #tpu.memory_space<vmem>>, vector<1x88xf32>
    tpu.vector_store %arg29[%c1_172, %c484], %199 {strides = array<i32>} : memref<4x660xf32, #tpu.memory_space<vmem>>, vector<1x88xf32>,
    %201 = vector.extract_strided_slice %170 {offsets = [14, 0], sizes = [1, 88], strides = [1, 1]} : vector<30x88xf32> to vector<1x88xf32>
    %c1_173 = arith.constant 1 : index
    %c572 = arith.constant 572 : index
    %202 = vector.load %arg29[%c1_173, %c572] : memref<4x660xf32, #tpu.memory_space<vmem>>, vector<1x88xf32>
    tpu.vector_store %arg29[%c1_173, %c572], %201 {strides = array<i32>} : memref<4x660xf32, #tpu.memory_space<vmem>>, vector<1x88xf32>,
    %203 = vector.extract_strided_slice %170 {offsets = [15, 0], sizes = [1, 88], strides = [1, 1]} : vector<30x88xf32> to vector<1x88xf32>
    %c2_174 = arith.constant 2 : index
    %c0_175 = arith.constant 0 : index
    %204 = vector.load %arg29[%c2_174, %c0_175] : memref<4x660xf32, #tpu.memory_space<vmem>>, vector<1x88xf32>
    tpu.vector_store %arg29[%c2_174, %c0_175], %203 {strides = array<i32>} : memref<4x660xf32, #tpu.memory_space<vmem>>, vector<1x88xf32>,
    %205 = vector.extract_strided_slice %170 {offsets = [16, 0], sizes = [1, 88], strides = [1, 1]} : vector<30x88xf32> to vector<1x88xf32>
    %c2_176 = arith.constant 2 : index
    %c88_177 = arith.constant 88 : index
    %206 = vector.load %arg29[%c2_176, %c88_177] : memref<4x660xf32, #tpu.memory_space<vmem>>, vector<1x88xf32>
    tpu.vector_store %arg29[%c2_176, %c88_177], %205 {strides = array<i32>} : memref<4x660xf32, #tpu.memory_space<vmem>>, vector<1x88xf32>,
    %207 = vector.extract_strided_slice %170 {offsets = [17, 0], sizes = [1, 88], strides = [1, 1]} : vector<30x88xf32> to vector<1x88xf32>
    %c2_178 = arith.constant 2 : index
    %c176_179 = arith.constant 176 : index
    %208 = vector.load %arg29[%c2_178, %c176_179] : memref<4x660xf32, #tpu.memory_space<vmem>>, vector<1x88xf32>
    tpu.vector_store %arg29[%c2_178, %c176_179], %207 {strides = array<i32>} : memref<4x660xf32, #tpu.memory_space<vmem>>, vector<1x88xf32>,
    %209 = vector.extract_strided_slice %170 {offsets = [18, 0], sizes = [1, 88], strides = [1, 1]} : vector<30x88xf32> to vector<1x88xf32>
    %c2_180 = arith.constant 2 : index
    %c264_181 = arith.constant 264 : index
    %210 = vector.load %arg29[%c2_180, %c264_181] : memref<4x660xf32, #tpu.memory_space<vmem>>, vector<1x88xf32>
    tpu.vector_store %arg29[%c2_180, %c264_181], %209 {strides = array<i32>} : memref<4x660xf32, #tpu.memory_space<vmem>>, vector<1x88xf32>,
    %211 = vector.extract_strided_slice %170 {offsets = [19, 0], sizes = [1, 88], strides = [1, 1]} : vector<30x88xf32> to vector<1x88xf32>
    %c2_182 = arith.constant 2 : index
    %c352_183 = arith.constant 352 : index
    %212 = vector.load %arg29[%c2_182, %c352_183] : memref<4x660xf32, #tpu.memory_space<vmem>>, vector<1x88xf32>
    tpu.vector_store %arg29[%c2_182, %c352_183], %211 {strides = array<i32>} : memref<4x660xf32, #tpu.memory_space<vmem>>, vector<1x88xf32>,
    %213 = vector.extract_strided_slice %170 {offsets = [20, 0], sizes = [1, 88], strides = [1, 1]} : vector<30x88xf32> to vector<1x88xf32>
    %c2_184 = arith.constant 2 : index
    %c440_185 = arith.constant 440 : index
    %214 = vector.load %arg29[%c2_184, %c440_185] : memref<4x660xf32, #tpu.memory_space<vmem>>, vector<1x88xf32>
    tpu.vector_store %arg29[%c2_184, %c440_185], %213 {strides = array<i32>} : memref<4x660xf32, #tpu.memory_space<vmem>>, vector<1x88xf32>,
    %215 = vector.extract_strided_slice %170 {offsets = [21, 0], sizes = [1, 88], strides = [1, 1]} : vector<30x88xf32> to vector<1x88xf32>
    %c2_186 = arith.constant 2 : index
    %c528_187 = arith.constant 528 : index
    %216 = vector.load %arg29[%c2_186, %c528_187] : memref<4x660xf32, #tpu.memory_space<vmem>>, vector<1x88xf32>
    tpu.vector_store %arg29[%c2_186, %c528_187], %215 {strides = array<i32>} : memref<4x660xf32, #tpu.memory_space<vmem>>, vector<1x88xf32>,
    %217 = vector.extract_strided_slice %170 {offsets = [22, 0], sizes = [1, 44], strides = [1, 1]} : vector<30x88xf32> to vector<1x44xf32>
    %c2_188 = arith.constant 2 : index
    %c616_189 = arith.constant 616 : index
    %218 = vector.load %arg29[%c2_188, %c616_189] : memref<4x660xf32, #tpu.memory_space<vmem>>, vector<1x44xf32>
    tpu.vector_store %arg29[%c2_188, %c616_189], %217 {strides = array<i32>} : memref<4x660xf32, #tpu.memory_space<vmem>>, vector<1x44xf32>,
    %219 = vector.extract_strided_slice %170 {offsets = [22, 44], sizes = [1, 44], strides = [1, 1]} : vector<30x88xf32> to vector<1x44xf32>
    %c3_190 = arith.constant 3 : index
    %c0_191 = arith.constant 0 : index
    %220 = vector.load %arg29[%c3_190, %c0_191] : memref<4x660xf32, #tpu.memory_space<vmem>>, vector<1x44xf32>
    tpu.vector_store %arg29[%c3_190, %c0_191], %219 {strides = array<i32>} : memref<4x660xf32, #tpu.memory_space<vmem>>, vector<1x44xf32>,
    %221 = vector.extract_strided_slice %170 {offsets = [23, 0], sizes = [1, 88], strides = [1, 1]} : vector<30x88xf32> to vector<1x88xf32>
    %c3_192 = arith.constant 3 : index
    %c44_193 = arith.constant 44 : index
    %222 = vector.load %arg29[%c3_192, %c44_193] : memref<4x660xf32, #tpu.memory_space<vmem>>, vector<1x88xf32>
    tpu.vector_store %arg29[%c3_192, %c44_193], %221 {strides = array<i32>} : memref<4x660xf32, #tpu.memory_space<vmem>>, vector<1x88xf32>,
    %223 = vector.extract_strided_slice %170 {offsets = [24, 0], sizes = [1, 88], strides = [1, 1]} : vector<30x88xf32> to vector<1x88xf32>
    %c3_194 = arith.constant 3 : index
    %c132_195 = arith.constant 132 : index
    %224 = vector.load %arg29[%c3_194, %c132_195] : memref<4x660xf32, #tpu.memory_space<vmem>>, vector<1x88xf32>
    tpu.vector_store %arg29[%c3_194, %c132_195], %223 {strides = array<i32>} : memref<4x660xf32, #tpu.memory_space<vmem>>, vector<1x88xf32>,
    %225 = vector.extract_strided_slice %170 {offsets = [25, 0], sizes = [1, 88], strides = [1, 1]} : vector<30x88xf32> to vector<1x88xf32>
    %c3_196 = arith.constant 3 : index
    %c220_197 = arith.constant 220 : index
    %226 = vector.load %arg29[%c3_196, %c220_197] : memref<4x660xf32, #tpu.memory_space<vmem>>, vector<1x88xf32>
    tpu.vector_store %arg29[%c3_196, %c220_197], %225 {strides = array<i32>} : memref<4x660xf32, #tpu.memory_space<vmem>>, vector<1x88xf32>,
    %227 = vector.extract_strided_slice %170 {offsets = [26, 0], sizes = [1, 88], strides = [1, 1]} : vector<30x88xf32> to vector<1x88xf32>
    %c3_198 = arith.constant 3 : index
    %c308_199 = arith.constant 308 : index
    %228 = vector.load %arg29[%c3_198, %c308_199] : memref<4x660xf32, #tpu.memory_space<vmem>>, vector<1x88xf32>
    tpu.vector_store %arg29[%c3_198, %c308_199], %227 {strides = array<i32>} : memref<4x660xf32, #tpu.memory_space<vmem>>, vector<1x88xf32>,
    %229 = vector.extract_strided_slice %170 {offsets = [27, 0], sizes = [1, 88], strides = [1, 1]} : vector<30x88xf32> to vector<1x88xf32>
    %c3_200 = arith.constant 3 : index
    %c396_201 = arith.constant 396 : index
    %230 = vector.load %arg29[%c3_200, %c396_201] : memref<4x660xf32, #tpu.memory_space<vmem>>, vector<1x88xf32>
    tpu.vector_store %arg29[%c3_200, %c396_201], %229 {strides = array<i32>} : memref<4x660xf32, #tpu.memory_space<vmem>>, vector<1x88xf32>,
    %231 = vector.extract_strided_slice %170 {offsets = [28, 0], sizes = [1, 88], strides = [1, 1]} : vector<30x88xf32> to vector<1x88xf32>
    %c3_202 = arith.constant 3 : index
    %c484_203 = arith.constant 484 : index
    %232 = vector.load %arg29[%c3_202, %c484_203] : memref<4x660xf32, #tpu.memory_space<vmem>>, vector<1x88xf32>
    tpu.vector_store %arg29[%c3_202, %c484_203], %231 {strides = array<i32>} : memref<4x660xf32, #tpu.memory_space<vmem>>, vector<1x88xf32>,
    %233 = vector.extract_strided_slice %170 {offsets = [29, 0], sizes = [1, 88], strides = [1, 1]} : vector<30x88xf32> to vector<1x88xf32>
    %c3_204 = arith.constant 3 : index
    %c572_205 = arith.constant 572 : index
    %234 = vector.load %arg29[%c3_204, %c572_205] : memref<4x660xf32, #tpu.memory_space<vmem>>, vector<1x88xf32>
    tpu.vector_store %arg29[%c3_204, %c572_205], %233 {strides = array<i32>} : memref<4x660xf32, #tpu.memory_space<vmem>>, vector<1x88xf32>,
    %c0_206 = arith.constant 0 : index
    %c0_207 = arith.constant 0 : index
    %235 = vector.load %arg29[%c0_206, %c0_207] : memref<4x660xf32, #tpu.memory_space<vmem>>, vector<4x660xf32>
    %c0_208 = arith.constant 0 : index
    %c0_209 = arith.constant 0 : index
    %236 = vector.load %arg19[%c0_208, %c0_209] : memref<660x32xf32, #tpu.memory_space<vmem>>, vector<660x32xf32>
    %cst_210 = arith.constant dense<0.000000e+00> : vector<4x32xf32>
    %237 = tpu.matmul %235, %236, %cst_210 {dimension_numbers = #tpu.dot_dimension_numbers<[1], [0], [0], [1], [0, 0, 1, 1], [], []>} : vector<4x660xf32>, vector<660x32xf32>, vector<4x32xf32> -> vector<4x32xf32>
    %c0_211 = arith.constant 0 : index
    %c0_212 = arith.constant 0 : index
    %238 = vector.load %arg20[%c0_211, %c0_212] : memref<1x32xf32, #tpu.memory_space<vmem>>, vector<1x32xf32>
    %239 = vector.broadcast %238 : vector<1x32xf32> to vector<4x32xf32>
    %240 = arith.addf %237, %239 : vector<4x32xf32>
    %c0_213 = arith.constant 0 : index
    %c0_214 = arith.constant 0 : index
    %241 = vector.load %arg21[%c0_213, %c0_214] : memref<4x32xf32, #tpu.memory_space<vmem>>, vector<4x32xf32>
    tpu.vector_store %arg21[%c0_213, %c0_214], %240 {strides = array<i32>} : memref<4x32xf32, #tpu.memory_space<vmem>>, vector<4x32xf32>,
    return
  }
}

</mosaic_0001>

<bundles_post_ra>
// kernel: cvae_forward.1
= control target key start
LH: loop header
LB: loop body
LE: loop exit
PB: predicated region body
PF: predicated region fallthrough
CT: control target
= control target key end

     0   :  { %s4465_s0 = inlined_call_operand.vmem [shape: f32[1,128], index: 0, kind: input, shape index: {}]   ;;  %s4466_s1 = inlined_call_operand.hbm [shape: f32[4,8], index: 1, kind: input, shape index: {}]   ;;  %s4467_s2 = inlined_call_operand.hbm [shape: f32[15,4], index: 2, kind: input, shape index: {}]   ;;  %s4468_s3 = inlined_call_operand.hbm [shape: f32[15,1], index: 3, kind: input, shape index: {}]   ;;  %s4469_s4 = inlined_call_operand.hbm [shape: f32[128,56], index: 4, kind: input, shape index: {}]   ;;  %s4470_s5 = inlined_call_operand.hbm [shape: f32[128,56], index: 5, kind: input, shape index: {}]   ;;  %s4471_s6 = inlined_call_operand.hbm [shape: f32[30,60], index: 6, kind: input, shape index: {}]   ;;  %s4472_s7 = inlined_call_operand.hbm [shape: f32[30,1], index: 7, kind: input, shape index: {}]   ;;  %s4473_s8 = inlined_call_operand.hbm [shape: f32[56,20], index: 8, kind: input, shape index: {}]   ;;  %s4474_s9 = inlined_call_operand.hbm [shape: f32[56,20], index: 9, kind: input, shape index: {}]   ;;  %s4475_s10 = inlined_call_operand.hbm [shape: f32[150,16], index: 10, kind: input, shape index: {}]   ;;  %s4476_s11 = inlined_call_operand.hbm [shape: f32[1,16], index: 11, kind: input, shape index: {}]   ;;  %s4477_s12 = inlined_call_operand.hbm [shape: f32[8,24], index: 12, kind: input, shape index: {}]   ;;  %s4478_s13 = inlined_call_operand.hbm [shape: f32[1,24], index: 13, kind: input, shape index: {}]   ;;  %s4479_s14 = inlined_call_operand.hbm [shape: f32[15,2], index: 14, kind: input, shape index: {}]   ;;  %s4480_s15 = inlined_call_operand.hbm [shape: f32[15,1], index: 15, kind: input, shape index: {}]   ;;  %s4481_s16 = inlined_call_operand.vmem [shape: f32[30,30], index: 16, kind: input, shape index: {}]   ;;  %s4482_s17 = inlined_call_operand.vmem [shape: f32[30,1], index: 17, kind: input, shape index: {}]   ;;  %s4483_s18 = inlined_call_operand.hbm [shape: f32[96,88], index: 18, kind: input, shape index: {}]   ;;  %s4484_s19 = inlined_call_operand.hbm [shape: f32[660,32], index: 19, kind: input, shape index: {}]   ;;  %s4485_s20 = inlined_call_operand.vmem [shape: f32[1,32], index: 20, kind: input, shape index: {}]   ;;  %s4486_s21 = inlined_call_operand.hbm [shape: f32[4,32], index: 21, kind: output, shape index: {0}]   ;;  %s4487_s22 = inlined_call_operand.vmem [shape: f32[4,16], index: 22, kind: output, shape index: {1}]   ;;  %s4488_s23 = inlined_call_operand.hbm [shape: f32[4,8], index: 23, kind: output, shape index: {2}]  }
   0x1   :  { %4504 = sst [smem:[#allocation49_spill]] %s4465_s0 }
   0x2   :  { %4505 = sst [smem:[#allocation50_spill]] %s4466_s1 }
   0x3   :  { %4506 = sst [smem:[#allocation51_spill]] %s4467_s2 }
   0x4   :  { %4507 = sst [smem:[#allocation52_spill]] %s4468_s3 }
   0x5   :  { %4508 = sst [smem:[#allocation53_spill]] %s4469_s4 }
   0x6   :  { %4509 = sst [smem:[#allocation54_spill]] %s4470_s5 }
   0x7   :  { %4510 = sst [smem:[#allocation55_spill]] %s4471_s6 }
   0x8   :  { %4511 = sst [smem:[#allocation56_spill]] %s4472_s7 }
   0x9   :  { %4512 = sst [smem:[#allocation57_spill]] %s4485_s20 }
   0xa   :  { %4513 = sst [smem:[#allocation58_spill]] %s4486_s21 }
   0xb   :  { %4514 = sst [smem:[#allocation59_spill]] %s4488_s23 }
   0xc   :  { %29 = vsyncpa [#allocation9], 0 }
   0xd   :  { %30 = vsyncpa [#allocation12], 0 }
   0xe   :  { %31 = vsyncpa [#allocation15], 0 }
   0xf   :  { %32 = vsyncpa [#allocation18], 0 }
  0x10   :  { %33 = vsyncpa [#allocation21], 0 }
  0x11   :  { %34 = vsyncpa [#allocation24], 0 }
  0x12   :  { %35 = vsyncpa [#allocation27], 0 }
  0x13   :  { %36 = vsyncpa [#allocation30], 0 }
  0x14   :  { %37 = vsyncpa [#allocation33], 0 }
  0x15   :  { %38 = vsyncpa [#allocation10], 0 }
  0x16   :  { %39 = vsyncpa [#allocation37], 0  ;;  %s3629_s4 = smov [#allocation11]   ;;  %s4515_s5 = sld [smem:[#allocation51_spill]] }
  0x17   :  { %s57_s30 = sshll.u32 %s3629_s4, 4  ;;  %s58_s30 = int_to_ptr.vmem [resolvable:$true] %s57_s30 }
  0x1c   :  { %s3189_s1 = scalar_lea.hbm %s4515_s5, 256 }
  0x1d   :  { %p3190_p0 = scmp.ne.s32.totalorder %s4515_s5, %s3189_s1  ;;  %p3193_p1 = scmp.lt.u32.totalorder %s3189_s1, %s4515_s5 }
  0x1f   :  { %p3195_p2 = pnand %p3193_p1, %p3190_p0 }
  0x21   :  { %3198 = shalt.err (!%p3195_p2)
}
  0x22   :  { %s3199_s7 = scalar_lea.vmem %s58_s30, 256  ;;  %p3204_p4 = scmp.lt.s32.totalorder %s58_s30, %s58_s30 }
  0x23   :  { %p3200_p3 = scmp.ne.s32.totalorder %s58_s30, %s3199_s7  ;;  %p3205_p5 = scmp.lt.s32.totalorder %s3199_s7, %s3199_s7 }
  0x25   :  { %p3206_p6 = por %p3205_p5, %p3204_p4 }
  0x27   :  { %p3207_p7 = pnand %p3206_p6, %p3200_p3 }
  0x29   :  { %3210 = shalt.err (!%p3207_p7)
}
  0x2a   :  { %s3630_s28 = smov 128   ;;  %s3631_s29 = smov 8  }
  0x2b   :  { %63 = dma.hbm_to_vmem [thread:$0]  %s4515_s5, 256, %s58_s30, [#allocation12], %s3630_s28, %s3630_s28, %s3631_s29  }
  0x2c   :  { %s3632_s4 = smov [#allocation14]   ;;  %s3633_s25 = smov [#allocation17]  }
  0x2d   :  { %s81_s24 = sshll.u32 %s3632_s4, 4  ;;  %s105_s1 = sshll.u32 %s3633_s25, 4  ;;  %s82_s24 = int_to_ptr.vmem [resolvable:$true] %s81_s24  ;;  %s106_s1 = int_to_ptr.vmem [resolvable:$true] %s105_s1 }
  0x2e   :  { %s4516_s6 = sld [smem:[#allocation53_spill]] }
  0x34   :  { %s3211_s27 = scalar_lea.hbm %s4516_s6, 2048 }
  0x35   :  { %p3212_p8 = scmp.ne.s32.totalorder %s4516_s6, %s3211_s27  ;;  %p3215_p9 = scmp.lt.u32.totalorder %s3211_s27, %s4516_s6 }
  0x37   :  { %p3217_p10 = pnand %p3215_p9, %p3212_p8 }
  0x39   :  { %3220 = shalt.err (!%p3217_p10)
}
  0x3a   :  { %s3221_s30 = scalar_lea.vmem %s82_s24, 2048  ;;  %p3226_p12 = scmp.lt.s32.totalorder %s82_s24, %s82_s24 }
  0x3b   :  { %p3222_p11 = scmp.ne.s32.totalorder %s82_s24, %s3221_s30  ;;  %p3227_p13 = scmp.lt.s32.totalorder %s3221_s30, %s3221_s30 }
  0x3d   :  { %p3228_p0 = por %p3227_p13, %p3226_p12 }
  0x3f   :  { %p3229_p1 = pnand %p3228_p0, %p3222_p11 }
  0x41   :  { %3232 = shalt.err (!%p3229_p1)
}
  0x42   :  { %87 = dma.hbm_to_vmem [thread:$0]  %s4516_s6, 2048, %s82_s24, [#allocation15], %s3630_s28, %s3630_s28, %s3631_s29  }
  0x43   :  { %s4517_s23 = sld [smem:[#allocation55_spill]] }
  0x49   :  { %s3233_s0 = scalar_lea.hbm %s4517_s23, 512 }
  0x4a   :  { %p3234_p2 = scmp.ne.s32.totalorder %s4517_s23, %s3233_s0  ;;  %p3237_p3 = scmp.lt.u32.totalorder %s3233_s0, %s4517_s23 }
  0x4c   :  { %p3239_p4 = pnand %p3237_p3, %p3234_p2 }
  0x4e   :  { %3242 = shalt.err (!%p3239_p4)
}
  0x4f   :  { %s3243_s27 = scalar_lea.vmem %s106_s1, 512  ;;  %p3248_p6 = scmp.lt.s32.totalorder %s106_s1, %s106_s1 }
  0x50   :  { %p3244_p5 = scmp.ne.s32.totalorder %s106_s1, %s3243_s27  ;;  %p3249_p7 = scmp.lt.s32.totalorder %s3243_s27, %s3243_s27 }
  0x52   :  { %p3250_p8 = por %p3249_p7, %p3248_p6 }
  0x54   :  { %p3251_p9 = pnand %p3250_p8, %p3244_p5 }
  0x56   :  { %3254 = shalt.err (!%p3251_p9)
}
  0x57   :  { %111 = dma.hbm_to_vmem [thread:$0]  %s4517_s23, 512, %s106_s1, [#allocation18], %s3630_s28, %s3630_s28, %s3631_s29  }
  0x58   :  { %s3634_s7 = smov [#allocation20]   ;;  %s3635_s5 = smov [#allocation23]  }
  0x59   :  { %s129_s30 = sshll.u32 %s3634_s7, 4  ;;  %s153_s3 = sshll.u32 %s3635_s5, 4  ;;  %s130_s30 = int_to_ptr.vmem [resolvable:$true] %s129_s30  ;;  %s154_s3 = int_to_ptr.vmem [resolvable:$true] %s153_s3 }
  0x5a   :  { %s3255_s0 = scalar_lea.hbm %s4473_s8, 896 }
  0x5b   :  { %p3256_p10 = scmp.ne.s32.totalorder %s4473_s8, %s3255_s0  ;;  %p3259_p11 = scmp.lt.u32.totalorder %s3255_s0, %s4473_s8 }
  0x5d   :  { %p3261_p12 = pnand %p3259_p11, %p3256_p10 }
  0x5f   :  { %3264 = shalt.err (!%p3261_p12)
}
  0x60   :  { %s3265_s1 = scalar_lea.vmem %s130_s30, 896  ;;  %p3270_p0 = scmp.lt.s32.totalorder %s130_s30, %s130_s30 }
  0x61   :  { %p3266_p13 = scmp.ne.s32.totalorder %s130_s30, %s3265_s1  ;;  %p3271_p1 = scmp.lt.s32.totalorder %s3265_s1, %s3265_s1 }
  0x63   :  { %p3272_p2 = por %p3271_p1, %p3270_p0 }
  0x65   :  { %p3273_p3 = pnand %p3272_p2, %p3266_p13 }
  0x67   :  { %3276 = shalt.err (!%p3273_p3)
}
  0x68   :  { %135 = dma.hbm_to_vmem [thread:$0]  %s4473_s8, 896, %s130_s30, [#allocation21], %s3630_s28, %s3630_s28, %s3631_s29  }
  0x69   :  { %s3277_s7 = scalar_lea.hbm %s4475_s10, 2432 }
  0x6a   :  { %p3278_p4 = scmp.ne.s32.totalorder %s4475_s10, %s3277_s7  ;;  %p3281_p5 = scmp.lt.u32.totalorder %s3277_s7, %s4475_s10 }
  0x6c   :  { %p3283_p6 = pnand %p3281_p5, %p3278_p4 }
  0x6e   :  { %3286 = shalt.err (!%p3283_p6)
}
  0x6f   :  { %s3287_s4 = scalar_lea.vmem %s154_s3, 2432  ;;  %p3292_p8 = scmp.lt.s32.totalorder %s154_s3, %s154_s3 }
  0x70   :  { %p3288_p7 = scmp.ne.s32.totalorder %s154_s3, %s3287_s4  ;;  %p3293_p9 = scmp.lt.s32.totalorder %s3287_s4, %s3287_s4 }
  0x72   :  { %p3294_p10 = por %p3293_p9, %p3292_p8 }
  0x74   :  { %p3295_p11 = pnand %p3294_p10, %p3288_p7 }
  0x76   :  { %3298 = shalt.err (!%p3295_p11)
}
  0x77   :  { %159 = dma.hbm_to_vmem [thread:$0]  %s4475_s10, 2432, %s154_s3, [#allocation24], %s3630_s28, %s3630_s28, %s3631_s29  }
  0x78   :  { %s3636_s25 = smov [#allocation26]   ;;  %s3637_s2 = smov [#allocation29]  }
  0x79   :  { %s176_s26 = sshll.u32 %s3636_s25, 4  ;;  %s195_s1 = sshll.u32 %s3637_s2, 4  ;;  %s177_s26 = int_to_ptr.vmem [resolvable:$true] %s176_s26  ;;  %s196_s1 = int_to_ptr.vmem [resolvable:$true] %s195_s1 }
  0x7a   :  { %s3299_s24 = scalar_lea.hbm %s4477_s12, 128 }
  0x7b   :  { %p3300_p12 = scmp.ne.s32.totalorder %s4477_s12, %s3299_s24  ;;  %p3303_p13 = scmp.lt.u32.totalorder %s3299_s24, %s4477_s12 }
  0x7d   :  { %p3305_p0 = pnand %p3303_p13, %p3300_p12 }
  0x7f   :  { %3308 = shalt.err (!%p3305_p0)
}
  0x80   :  { %s3309_s10 = scalar_lea.vmem %s177_s26, 128  ;;  %p3314_p2 = scmp.lt.s32.totalorder %s177_s26, %s177_s26 }
  0x81   :  { %p3310_p1 = scmp.ne.s32.totalorder %s177_s26, %s3309_s10  ;;  %p3315_p3 = scmp.lt.s32.totalorder %s3309_s10, %s3309_s10 }
  0x83   :  { %p3316_p4 = por %p3315_p3, %p3314_p2 }
  0x85   :  { %p3317_p5 = pnand %p3316_p4, %p3310_p1 }
  0x87   :  { %3320 = shalt.err (!%p3317_p5)
}
  0x88   :  { %179 = dma.hbm_to_vmem [thread:$0]  %s4477_s12, 128, %s177_s26, [#allocation27]  }
  0x89   :  { %s3321_s8 = scalar_lea.hbm %s4479_s14, 256 }
  0x8a   :  { %p3322_p6 = scmp.ne.s32.totalorder %s4479_s14, %s3321_s8  ;;  %p3325_p7 = scmp.lt.u32.totalorder %s3321_s8, %s4479_s14 }
  0x8c   :  { %p3327_p8 = pnand %p3325_p7, %p3322_p6 }
  0x8e   :  { %3330 = shalt.err (!%p3327_p8)
}
  0x8f   :  { %s3331_s27 = scalar_lea.vmem %s196_s1, 256  ;;  %p3336_p10 = scmp.lt.s32.totalorder %s196_s1, %s196_s1 }
  0x90   :  { %p3332_p9 = scmp.ne.s32.totalorder %s196_s1, %s3331_s27  ;;  %p3337_p11 = scmp.lt.s32.totalorder %s3331_s27, %s3331_s27 }
  0x92   :  { %p3338_p12 = por %p3337_p11, %p3336_p10 }
  0x94   :  { %p3339_p13 = pnand %p3338_p12, %p3332_p9 }
  0x96   :  { %3342 = shalt.err (!%p3339_p13)
}
  0x97   :  { %201 = dma.hbm_to_vmem [thread:$0]  %s4479_s14, 256, %s196_s1, [#allocation30], %s3630_s28, %s3630_s28, %s3631_s29  }
  0x98   :  { %s3638_s24 = smov [#allocation32]   ;;  %s3639_s7 = smov [#allocation8]  }
  0x99   :  { %s223_s6 = sshll.u32 %s3638_s24, 4  ;;  %s48_s5 = sshll.u32 %s3639_s7, 4  ;;  %s224_s6 = int_to_ptr.vmem [resolvable:$true] %s223_s6  ;;  %s49_s5 = int_to_ptr.vmem [resolvable:$true] %s48_s5 }
  0x9a   :  { %s3343_s3 = scalar_lea.hbm %s4483_s18, 1536 }
  0x9b   :  { %p3344_p0 = scmp.ne.s32.totalorder %s4483_s18, %s3343_s3  ;;  %p3347_p1 = scmp.lt.u32.totalorder %s3343_s3, %s4483_s18 }
  0x9d   :  { %p3349_p2 = pnand %p3347_p1, %p3344_p0 }
  0x9f   :  { %3352 = shalt.err (!%p3349_p2)
}
  0xa0   :  { %s3353_s14 = scalar_lea.vmem %s224_s6, 1536  ;;  %p3358_p4 = scmp.lt.s32.totalorder %s224_s6, %s224_s6 }
  0xa1   :  { %p3354_p3 = scmp.ne.s32.totalorder %s224_s6, %s3353_s14  ;;  %p3359_p5 = scmp.lt.s32.totalorder %s3353_s14, %s3353_s14 }
  0xa3   :  { %p3360_p6 = por %p3359_p5, %p3358_p4 }
  0xa5   :  { %p3361_p7 = pnand %p3360_p6, %p3354_p3 }
  0xa7   :  { %3364 = shalt.err (!%p3361_p7)
}
  0xa8   :  { %229 = dma.hbm_to_vmem [thread:$0]  %s4483_s18, 1536, %s224_s6, [#allocation33], %s3630_s28, %s3630_s28, %s3631_s29  }
  0xa9   :  { %s4518_s23 = sld [smem:[#allocation50_spill]] }
  0xaf   :  { %s3365_s27 = scalar_lea.hbm %s4518_s23, 64 }
  0xb0   :  { %p3366_p8 = scmp.ne.s32.totalorder %s4518_s23, %s3365_s27  ;;  %p3369_p9 = scmp.lt.u32.totalorder %s3365_s27, %s4518_s23 }
  0xb2   :  { %p3371_p10 = pnand %p3369_p9, %p3366_p8 }
  0xb4   :  { %3374 = shalt.err (!%p3371_p10)
}
  0xb5   :  { %s3375_s21 = scalar_lea.vmem %s49_s5, 64  ;;  %p3380_p12 = scmp.lt.s32.totalorder %s49_s5, %s49_s5 }
  0xb6   :  { %p3376_p11 = scmp.ne.s32.totalorder %s49_s5, %s3375_s21  ;;  %p3381_p13 = scmp.lt.s32.totalorder %s3375_s21, %s3375_s21 }
  0xb8   :  { %p3382_p0 = por %p3381_p13, %p3380_p12 }
  0xba   :  { %p3383_p1 = pnand %p3382_p0, %p3376_p11 }
  0xbc   :  { %3386 = shalt.err (!%p3383_p1)
}
  0xbd   :  { %51 = dma.hbm_to_vmem [thread:$0]  %s4518_s23, 64, %s49_s5, [#allocation9]  }
  0xbe   :  { %s3640_s10 = smov [#allocation13]   ;;  %s3641_s20 = smov [#allocation16]  }
  0xbf   :  { %s69_s3 = sshll.u32 %s3640_s10, 4  ;;  %s93_s0 = sshll.u32 %s3641_s20, 4  ;;  %s70_s3 = int_to_ptr.vmem [resolvable:$true] %s69_s3  ;;  %s94_s0 = int_to_ptr.vmem [resolvable:$true] %s93_s0 }
  0xc0   :  { %s4519_s14 = sld [smem:[#allocation52_spill]] }
  0xc6   :  { %s3387_s1 = scalar_lea.hbm %s4519_s14, 256 }
  0xc7   :  { %p3388_p2 = scmp.ne.s32.totalorder %s4519_s14, %s3387_s1  ;;  %p3391_p3 = scmp.lt.u32.totalorder %s3387_s1, %s4519_s14 }
  0xc9   :  { %p3393_p4 = pnand %p3391_p3, %p3388_p2 }
  0xcb   :  { %3396 = shalt.err (!%p3393_p4)
}
  0xcc   :  { %s3397_s5 = scalar_lea.vmem %s70_s3, 256  ;;  %p3402_p6 = scmp.lt.s32.totalorder %s70_s3, %s70_s3 }
  0xcd   :  { %p3398_p5 = scmp.ne.s32.totalorder %s70_s3, %s3397_s5  ;;  %p3403_p7 = scmp.lt.s32.totalorder %s3397_s5, %s3397_s5 }
  0xcf   :  { %p3404_p8 = por %p3403_p7, %p3402_p6 }
  0xd1   :  { %p3405_p9 = pnand %p3404_p8, %p3398_p5 }
  0xd3   :  { %3408 = shalt.err (!%p3405_p9)
}
  0xd4   :  { %75 = dma.hbm_to_vmem [thread:$0]  %s4519_s14, 256, %s70_s3, [#allocation12], %s3630_s28, %s3630_s28, %s3631_s29  }
  0xd5   :  { %s4520_s7 = sld [smem:[#allocation54_spill]] }
  0xdb   :  { %s3409_s21 = scalar_lea.hbm %s4520_s7, 2048 }
  0xdc   :  { %p3410_p10 = scmp.ne.s32.totalorder %s4520_s7, %s3409_s21  ;;  %p3413_p11 = scmp.lt.u32.totalorder %s3409_s21, %s4520_s7 }
  0xde   :  { %p3415_p12 = pnand %p3413_p11, %p3410_p10 }
  0xe0   :  { %3418 = shalt.err (!%p3415_p12)
}
  0xe1   :  { %s3419_s4 = scalar_lea.vmem %s94_s0, 2048  ;;  %p3424_p0 = scmp.lt.s32.totalorder %s94_s0, %s94_s0 }
  0xe2   :  { %p3420_p13 = scmp.ne.s32.totalorder %s94_s0, %s3419_s4  ;;  %p3425_p1 = scmp.lt.s32.totalorder %s3419_s4, %s3419_s4 }
  0xe4   :  { %p3426_p2 = por %p3425_p1, %p3424_p0 }
  0xe6   :  { %p3427_p3 = pnand %p3426_p2, %p3420_p13 }
  0xe8   :  { %3430 = shalt.err (!%p3427_p3)
}
  0xe9   :  { %99 = dma.hbm_to_vmem [thread:$0]  %s4520_s7, 2048, %s94_s0, [#allocation15], %s3630_s28, %s3630_s28, %s3631_s29  }
  0xea   :  { %s3642_s14 = smov [#allocation19]   ;;  %s3643_s30 = smov [#allocation22]  }
  0xeb   :  { %s117_s1 = sshll.u32 %s3642_s14, 4  ;;  %s141_s25 = sshll.u32 %s3643_s30, 4  ;;  %s118_s1 = int_to_ptr.vmem [resolvable:$true] %s117_s1  ;;  %s142_s25 = int_to_ptr.vmem [resolvable:$true] %s141_s25 }
  0xec   :  { %s4521_s5 = sld [smem:[#allocation56_spill]] }
  0xf2   :  { %s3431_s23 = scalar_lea.hbm %s4521_s5, 512 }
  0xf3   :  { %p3432_p4 = scmp.ne.s32.totalorder %s4521_s5, %s3431_s23  ;;  %p3435_p5 = scmp.lt.u32.totalorder %s3431_s23, %s4521_s5 }
  0xf5   :  { %p3437_p6 = pnand %p3435_p5, %p3432_p4 }
  0xf7   :  { %3440 = shalt.err (!%p3437_p6)
}
  0xf8   :  { %s3441_s0 = scalar_lea.vmem %s118_s1, 512  ;;  %p3446_p8 = scmp.lt.s32.totalorder %s118_s1, %s118_s1 }
  0xf9   :  { %p3442_p7 = scmp.ne.s32.totalorder %s118_s1, %s3441_s0  ;;  %p3447_p9 = scmp.lt.s32.totalorder %s3441_s0, %s3441_s0 }
  0xfb   :  { %p3448_p10 = por %p3447_p9, %p3446_p8 }
  0xfd   :  { %p3449_p11 = pnand %p3448_p10, %p3442_p7 }
  0xff   :  { %3452 = shalt.err (!%p3449_p11)
}
 0x100   :  { %123 = dma.hbm_to_vmem [thread:$0]  %s4521_s5, 512, %s118_s1, [#allocation18], %s3630_s28, %s3630_s28, %s3631_s29  }
 0x101   :  { %s3453_s20 = scalar_lea.hbm %s4474_s9, 896 }
 0x102   :  { %p3454_p12 = scmp.ne.s32.totalorder %s4474_s9, %s3453_s20  ;;  %p3457_p13 = scmp.lt.u32.totalorder %s3453_s20, %s4474_s9 }
 0x104   :  { %p3459_p0 = pnand %p3457_p13, %p3454_p12 }
 0x106   :  { %3462 = shalt.err (!%p3459_p0)
}
 0x107   :  { %s3463_s30 = scalar_lea.vmem %s142_s25, 896  ;;  %p3468_p2 = scmp.lt.s32.totalorder %s142_s25, %s142_s25 }
 0x108   :  { %p3464_p1 = scmp.ne.s32.totalorder %s142_s25, %s3463_s30  ;;  %p3469_p3 = scmp.lt.s32.totalorder %s3463_s30, %s3463_s30 }
 0x10a   :  { %p3470_p4 = por %p3469_p3, %p3468_p2 }
 0x10c   :  { %p3471_p5 = pnand %p3470_p4, %p3464_p1 }
 0x10e   :  { %3474 = shalt.err (!%p3471_p5)
}
 0x10f   :  { %147 = dma.hbm_to_vmem [thread:$0]  %s4474_s9, 896, %s142_s25, [#allocation21], %s3630_s28, %s3630_s28, %s3631_s29  }
 0x110   :  { %s3644_s27 = smov [#allocation25]   ;;  %s3645_s23 = smov [#allocation28]  }
 0x111   :  { %s166_s5 = sshll.u32 %s3644_s27, 4  ;;  %s186_s12 = sshll.u32 %s3645_s23, 4  ;;  %s167_s5 = int_to_ptr.vmem [resolvable:$true] %s166_s5  ;;  %s187_s12 = int_to_ptr.vmem [resolvable:$true] %s186_s12 }
 0x112   :  { %s3475_s21 = scalar_lea.hbm %s4476_s11, 16 }
 0x113   :  { %p3476_p6 = scmp.ne.s32.totalorder %s4476_s11, %s3475_s21  ;;  %p3479_p7 = scmp.lt.u32.totalorder %s3475_s21, %s4476_s11 }
 0x115   :  { %p3481_p8 = pnand %p3479_p7, %p3476_p6 }
 0x117   :  { %3484 = shalt.err (!%p3481_p8)
}
 0x118   :  { %s3485_s9 = scalar_lea.vmem %s167_s5, 16  ;;  %s3489_s25 = scalar_lea.vmem %s167_s5, 32 }
 0x119   :  { %p3486_p9 = scmp.ne.s32.totalorder %s167_s5, %s3485_s9  ;;  %p3490_p10 = scmp.lt.s32.totalorder %s167_s5, %s167_s5 }
 0x11a   :  { %p3491_p11 = scmp.lt.s32.totalorder %s3489_s25, %s3485_s9 }
 0x11c   :  { %p3492_p12 = por %p3491_p11, %p3490_p10 }
 0x11e   :  { %p3493_p13 = pnand %p3492_p12, %p3486_p9 }
 0x120   :  { %3496 = shalt.err (!%p3493_p13)
}
 0x121   :  { %169 = dma.hbm_to_vmem [thread:$0]  %s4476_s11, 16, %s167_s5, [#allocation24]  }
 0x122   :  { %s3497_s8 = scalar_lea.hbm %s4478_s13, 16 }
 0x123   :  { %p3498_p0 = scmp.ne.s32.totalorder %s4478_s13, %s3497_s8  ;;  %p3501_p1 = scmp.lt.u32.totalorder %s3497_s8, %s4478_s13 }
 0x125   :  { %p3503_p2 = pnand %p3501_p1, %p3498_p0 }
 0x127   :  { %3506 = shalt.err (!%p3503_p2)
}
 0x128   :  { %s3507_s27 = scalar_lea.vmem %s187_s12, 16  ;;  %s3511_s23 = scalar_lea.vmem %s187_s12, 32 }
 0x129   :  { %p3508_p3 = scmp.ne.s32.totalorder %s187_s12, %s3507_s27  ;;  %p3512_p4 = scmp.lt.s32.totalorder %s187_s12, %s187_s12 }
 0x12a   :  { %p3513_p5 = scmp.lt.s32.totalorder %s3511_s23, %s3507_s27 }
 0x12c   :  { %p3514_p6 = por %p3513_p5, %p3512_p4 }
 0x12e   :  { %p3515_p7 = pnand %p3514_p6, %p3508_p3 }
 0x130   :  { %3518 = shalt.err (!%p3515_p7)
}
 0x131   :  { %189 = dma.hbm_to_vmem [thread:$0]  %s4478_s13, 16, %s187_s12, [#allocation27]  }
 0x132   :  { %s3646_s26 = smov [#allocation31]   ;;  %s3647_s21 = smov [#allocation34]  }
 0x133   :  { %s207_s24 = sshll.u32 %s3646_s26, 4  ;;  %s235_s0 = sshll.u32 %s3647_s21, 4  ;;  %s208_s24 = int_to_ptr.vmem [resolvable:$true] %s207_s24  ;;  %s236_s0 = int_to_ptr.vmem [resolvable:$true] %s235_s0 }
 0x134   :  { %s3519_s6 = scalar_lea.hbm %s4480_s15, 256 }
 0x135   :  { %p3520_p8 = scmp.ne.s32.totalorder %s4480_s15, %s3519_s6  ;;  %p3523_p9 = scmp.lt.u32.totalorder %s3519_s6, %s4480_s15 }
 0x137   :  { %p3525_p10 = pnand %p3523_p9, %p3520_p8 }
 0x139   :  { %3528 = shalt.err (!%p3525_p10)
}
 0x13a   :  { %s3529_s13 = scalar_lea.vmem %s208_s24, 256  ;;  %p3534_p12 = scmp.lt.s32.totalorder %s208_s24, %s208_s24 }
 0x13b   :  { %p3530_p11 = scmp.ne.s32.totalorder %s208_s24, %s3529_s13  ;;  %p3535_p13 = scmp.lt.s32.totalorder %s3529_s13, %s3529_s13 }
 0x13d   :  { %p3536_p0 = por %p3535_p13, %p3534_p12 }
 0x13f   :  { %p3537_p1 = pnand %p3536_p0, %p3530_p11 }
 0x141   :  { %3540 = shalt.err (!%p3537_p1)
}
 0x142   :  { %213 = dma.hbm_to_vmem [thread:$0]  %s4480_s15, 256, %s208_s24, [#allocation30], %s3630_s28, %s3630_s28, %s3631_s29  }
 0x143   :  { %s3541_s14 = scalar_lea.hbm %s4484_s19, 10624 }
 0x144   :  { %p3542_p2 = scmp.ne.s32.totalorder %s4484_s19, %s3541_s14  ;;  %p3545_p3 = scmp.lt.u32.totalorder %s3541_s14, %s4484_s19 }
 0x146   :  { %p3547_p4 = pnand %p3545_p3, %p3542_p2 }
 0x148   :  { %3550 = shalt.err (!%p3547_p4)
}
 0x149   :  { %s3551_s23 = scalar_lea.vmem %s236_s0, 10624  ;;  %p3556_p6 = scmp.lt.s32.totalorder %s236_s0, %s236_s0 }
 0x14a   :  { %p3552_p5 = scmp.ne.s32.totalorder %s236_s0, %s3551_s23  ;;  %p3557_p7 = scmp.lt.s32.totalorder %s3551_s23, %s3551_s23 }
 0x14c   :  { %p3558_p8 = por %p3557_p7, %p3556_p6 }
 0x14e   :  { %p3559_p9 = pnand %p3558_p8, %p3552_p5 }
 0x150   :  { %3562 = shalt.err (!%p3559_p9)
}
 0x151   :  { %241 = dma.hbm_to_vmem [thread:$0]  %s4484_s19, 10624, %s236_s0, [#allocation33], %s3630_s28, %s3630_s28, %s3631_s29  }
 0x152   :  { %3607 = dma.done.wait [#allocation9], 64  }
 0x153   :  { %3608 = vsyncadd [#allocation9], 4294967232 }
 0x154   :  { %3609 = dma.done.wait [#allocation12], 512  }
 0x155   :  { %3610 = vsyncadd [#allocation12], 4294966784 }
 0x156   :  { %3611 = dma.done.wait [#allocation15], 4096  }
 0x157   :  { %3612 = vsyncadd [#allocation15], 4294963200 }
 0x158   :  { %3613 = dma.done.wait [#allocation18], 1024  }
 0x159   :  { %3614 = vsyncadd [#allocation18], 4294966272 }
 0x15a   :  { %3615 = dma.done.wait [#allocation21], 1792  }
 0x15b   :  { %3616 = vsyncadd [#allocation21], 4294965504 }
 0x15c   :  { %3617 = dma.done.wait [#allocation24], 2448  }
 0x15d   :  { %3618 = vsyncadd [#allocation24], 4294964848 }
 0x15e   :  { %3619 = dma.done.wait [#allocation27], 144  }
 0x15f   :  { %3620 = vsyncadd [#allocation27], 4294967152 }
 0x160   :  { %3621 = dma.done.wait [#allocation30], 512  }
 0x161   :  { %3622 = vsyncadd [#allocation30], 4294966784 }
 0x162   :  { %3623 = dma.done.wait [#allocation33], 12160  }
 0x163   :  { %3624 = vsyncadd [#allocation33], 4294955136  ;;  %v299_v0 = vlaneseq  ;;  %v3648_v1 = vmov 0.0   ;;  %s4522_s5 = sld [smem:[#allocation49_spill]]  ;;  %v318_v6 = vld [vmem:[#allocation11] sm:$0xff]  ;;  %vm333_vm0 = vcmask 31744  }
 0x164   :  { %296 = vst [vmem:[#allocation2] sm:$0xf] %v3648_v1  ;;  %s3649_s26 = smov 127   ;;  %s3650_s24 = smov 125   ;;  %2674 = vmatprep.mubr.msk.f32.mxu0 %vm333_vm0, %v318_v6  ;;  %v321_v7 = vld [vmem:[#allocation13] sm:$0xff]  ;;  %v421_v8 = vld [vmem:[#allocation14] sm:$0xff] }
 0x165   :  { %v300_v2 = vshrl.u32 %v299_v0, 7  ;;  %v3651_v9 = vmov 0   ;;  %v422_v10 = vld [vmem:[#allocation14 + $0x8] sm:$0xff]  ;;  %v423_v12 = vld [vmem:[#allocation14 + $0x10] sm:$0xff]  ;;  %v424_v13 = vld [vmem:[#allocation14 + $0x18] sm:$0xff]  ;;  %s3652_s21 = smov 126  }
 0x166   :  { %3182 = vset.pattern.permute.xlu0 %v3651_v9  ;;  %3181 = vset.pattern.permute.xlu1 %v3651_v9  ;;  %v2863_v11 = vpack.c.bf16 %v422_v10, %v421_v8  ;;  %v2867_v14 = vpack.c.bf16 %v424_v13, %v423_v12  ;;  %v322_v15 = vld [vmem:[#allocation13 + $0x8] sm:$0x7f]  ;;  %v425_v16 = vld [vmem:[#allocation14 + $0x20] sm:$0xff]  ;;  %v426_v17 = vld [vmem:[#allocation14 + $0x28] sm:$0xff]  ;;  %vm306_vm1 = vcmask 1032192   ;;  %vm316_vm2 = vcmask 1015808  }
 0x167   :  { %v301_v3 = vsub.s32 0, %v300_v2  ;;  %v2871_v18 = vpack.c.bf16 %v426_v17, %v425_v16  ;;  %v427_v19 = vld [vmem:[#allocation14 + $0x30] sm:$0xff]  ;;  %v428_v20 = vld [vmem:[#allocation14 + $0x38] sm:$0xff]  ;;  %v429_v22 = vld [vmem:[#allocation14 + $0x40] sm:$0xff]  ;;  %vm311_vm3 = vcmask 1024000   ;;  %vm4498_vm4 = vcmask 1043456  }
 0x168   :  { %2864 = vmatprep.subr.bf16.mxu1 %v2863_v11  ;;  %v2875_v21 = vpack.c.bf16 %v428_v20, %v427_v19  ;;  %v430_v23 = vld [vmem:[#allocation14 + $0x48] sm:$0xff]  ;;  %v431_v25 = vld [vmem:[#allocation14 + $0x50] sm:$0xff]  ;;  %v432_v26 = vld [vmem:[#allocation14 + $0x58] sm:$0xff]  ;;  %vm4500_vm5 = vcmask 457728   ;;  %vm616_vm6 = vcmask 456704   ;;  %vm613_vm7 = vcmask 453632  }
 0x169   :  { %v295_v4 = vld [vmem:[%s4522_s5] sm:$0x1]  ;;  %2866 = vmatpush3.bf16.msra.mxu1 %v2863_v11  ;;  %v2879_v24 = vpack.c.bf16 %v430_v23, %v429_v22  ;;  %v2883_v27 = vpack.c.bf16 %v432_v26, %v431_v25  ;;  %v433_v28 = vld [vmem:[#allocation14 + $0x60] sm:$0xff]  ;;  %v434_v29 = vld [vmem:[#allocation14 + $0x68] sm:$0xff]  ;;  %607 = vst.msk [vmem:[#allocation3 + $0x8] sm:$0xff] %vm4500_vm5, %v3648_v1  ;;  %vm4499_vm8 = vcmask 490496  }
 0x16a   :  { %v302_v5 = vrot.slane %v295_v4, %v301_v3  ;;  %297 = vst [vmem:[#allocation2] sm:$0x1] %v295_v4  ;;  %2868 = vmatprep.subr.bf16.mxu1 %v2867_v14  ;;  %v2887_v30 = vpack.c.bf16 %v434_v29, %v433_v28  ;;  %v512_v34 = vld [vmem:[#allocation16] sm:$0xff]  ;;  %v513_v35 = vld [vmem:[#allocation16 + $0x8] sm:$0xff]  ;;  %v514_v36 = vld [vmem:[#allocation16 + $0x10] sm:$0xff]  ;;  %vm636_vm9 = vcmask 441344  }
 0x16b   :  { %v515_v37 = vld [vmem:[#allocation16 + $0x18] sm:$0xff]  ;;  %v2895_v38 = vpack.c.bf16 %v513_v35, %v512_v34  ;;  %v319_v40 = vld [vmem:[#allocation11 + $0x8] sm:$0x7f]  ;;  %v516_v42 = vld [vmem:[#allocation16 + $0x20] sm:$0xff]  ;;  %606 = vst.msk [vmem:[#allocation3] sm:$0xff] %vm4500_vm5, %v3648_v1  ;;  %vm626_vm10 = vcmask 449536  }
 0x16c   :  { %303 = vrot.lane.b32.xlu0 %v302_v5, %s3649_s26  ;;  %313 = vrot.lane.b32.xlu1 %v302_v5, %s3650_s24  ;;  %v2899_v41 = vpack.c.bf16 %v515_v37, %v514_v36  ;;  %v517_v43 = vld [vmem:[#allocation16 + $0x28] sm:$0xff]  ;;  %v518_v45 = vld [vmem:[#allocation16 + $0x30] sm:$0xff]  ;;  %v519_v46 = vld [vmem:[#allocation16 + $0x38] sm:$0xff]  ;;  %608 = vst.msk [vmem:[#allocation3 + $0x10] sm:$0xff] %vm4500_vm5, %v3648_v1  ;;  %vm646_vm11 = vcmask 433152   ;;  %vm628_vm12 = vcmask 448512  }
 0x16d   :  { %2870 = vmatpush3.bf16.msra.mxu1 %v2867_v14  ;;  %v2903_v44 = vpack.c.bf16 %v517_v43, %v516_v42  ;;  %v2907_v47 = vpack.c.bf16 %v519_v46, %v518_v45  ;;  %v520_v48 = vld [vmem:[#allocation16 + $0x40] sm:$0xff]  ;;  %v521_v49 = vld [vmem:[#allocation16 + $0x48] sm:$0xff]  ;;  %v522_v51 = vld [vmem:[#allocation16 + $0x50] sm:$0xff]  ;;  %609 = vst.msk [vmem:[#allocation3 + $0x18] sm:$0xff] %vm4500_vm5, %v3648_v1  ;;  %vm638_vm13 = vcmask 440320   ;;  %vm648_vm14 = vcmask 432128  }
 0x16e   :  { %2872 = vmatprep.subr.bf16.mxu1 %v2871_v18  ;;  %v2911_v50 = vpack.c.bf16 %v521_v49, %v520_v48  ;;  %v523_v52 = vld [vmem:[#allocation16 + $0x58] sm:$0xff]  ;;  %v524_v54 = vld [vmem:[#allocation16 + $0x60] sm:$0xff]  ;;  %v525_v55 = vld [vmem:[#allocation16 + $0x68] sm:$0xff]  ;;  %610 = vst.msk [vmem:[#allocation3 + $0x20] sm:$0xff] %vm4500_vm5, %v3648_v1  ;;  %vm4503_vm15 = vmmov 1   ;;  %s3654_s0 = smov 10  }
 0x16f   :  { %v2915_v53 = vpack.c.bf16 %v523_v52, %v522_v51  ;;  %v2919_v56 = vpack.c.bf16 %v525_v55, %v524_v54  ;;  %v435_v57 = vld [vmem:[#allocation14 + $0x70] sm:$0xff]  ;;  %v436_v58 = vld [vmem:[#allocation14 + $0x78] sm:$0xff]  ;;  %611 = vst.msk [vmem:[#allocation3 + $0x28] sm:$0xff] %vm4500_vm5, %v3648_v1  ;;  %612 = vst.msk [vmem:[#allocation3 + $0x30] sm:$0xff] %vm4500_vm5, %v3648_v1  ;;  %s3655_s7 = smov 50   ;;  %s3656_s18 = smov 30  }
 0x170   :  { %308 = vrot.lane.b32.xlu0 %v302_v5, %s3652_s21  ;;  %325 = vperm.xlu1 %3181, %v321_v7   ;;  %v526_v59 = vld [vmem:[#allocation16 + $0x70] sm:$0xff]  ;;  %v2891_v60 = vpack.c.bf16 %v436_v58, %v435_v57  ;;  %v527_v61 = vld [vmem:[#allocation16 + $0x78] sm:$0xff]  ;;  %614 = vst.msk [vmem:[#allocation3 + $0x38] sm:$0xf] %vm613_vm7, %v3648_v1  ;;  %v662_v14 = vld [vmem:[#allocation19] sm:$0xff]  ;;  %s3657_s6 = smov 20  }
 0x171   :  { %2874 = vmatpush3.bf16.msra.mxu1 %v2871_v18  ;;  %v2923_v62 = vpack.c.bf16 %v527_v61, %v526_v59  ;;  %v650_v16 = vld [vmem:[#allocation17] sm:$0xff]  ;;  %v663_v17 = vld [vmem:[#allocation19 + $0x8] sm:$0xff]  ;;  %v665_v18 = vld [vmem:[#allocation19 + $0x18] sm:$0x3f]  ;;  %s3658_s9 = smov 70   ;;  %s3659_s25 = smov 40  }
 0x172   :  { %2876 = vmatprep.subr.bf16.mxu1 %v2875_v21  ;;  %v791_v34 = vld [vmem:[#allocation20] sm:$0xff]  ;;  %v792_v35 = vld [vmem:[#allocation20 + $0x8] sm:$0xff]  ;;  %v652_v43 = vld [vmem:[#allocation17 + $0x10] sm:$0xff]  ;;  %s3660_s10 = smov 90   ;;  %s3661_s20 = smov 60   ;;  %vm1013_vm7 = vcmask 647648  }
 0x173   :  { %v651_v42 = vld [vmem:[#allocation17 + $0x8] sm:$0xff]  ;;  %v653_v45 = vld [vmem:[#allocation17 + $0x18] sm:$0x3f]  ;;  %v795_v46 = vld [vmem:[#allocation20 + $0x20] sm:$0xff]  ;;  %s3662_s13 = smov 80   ;;  %s3664_s12 = smov 110  }
 0x174   :  { %330 = vperm.xlu0 %3182, %v322_v15   ;;  %v664_v15 = vld [vmem:[#allocation19 + $0x10] sm:$0xff]  ;;  %v896_v51 = vld [vmem:[#allocation22 + $0x8] sm:$0xff]  ;;  %v897_v59 = vld [vmem:[#allocation22 + $0x10] sm:$0xff]  ;;  %s3665_s4 = smov 120   ;;  %s3666_s3 = smov 100  }
 0x175   :  { %2878 = vmatpush3.bf16.msra.mxu1 %v2875_v21  ;;  %v797_v49 = vld [vmem:[#allocation20 + $0x30] sm:$0xff]  ;;  %s3667_s8 = smov 118   ;;  %s3668_s14 = smov 2  }
 0x176   :  { %2880 = vmatprep.subr.bf16.mxu1 %v2879_v24  ;;  %s3669_s30 = smov 12   ;;  %s3672_s27 = smov 48  }
 0x177   :  { %s3673_s23 = smov 23   ;;  %s3674_s15 = smov 72  }
 0x178   :  { %s3675_s11 = smov 47   ;;  %s3676_s19 = smov 71  }
 0x179   :  { %2882 = vmatpush3.bf16.msra.mxu1 %v2879_v24  ;;  %s3680_s1 = smov 84   ;;  %s3681_s2 = smov 4  }
 0x17a   :  { %2884 = vmatprep.subr.bf16.mxu1 %v2883_v27 }
 0x17d   :  { %2886 = vmatpush3.bf16.msra.mxu1 %v2883_v27 }
 0x17e   :  { %2888 = vmatprep.subr.bf16.mxu1 %v2887_v30 }
 0x181   :  { %2890 = vmatpush3.bf16.msra.mxu1 %v2887_v30 }
 0x182   :  { %2892 = vmatprep.subr.bf16.mxu1 %v2891_v60 }
 0x185   :  { %2894 = vmatpush3.bf16.msra.mxu1 %v2891_v60  ;;  %v898_v60 = vld [vmem:[#allocation22 + $0x18] sm:$0xff] }
 0x1de   :  { %v304_v31 = vpop.permute.xlu0 %303  ;;  %v314_v32 = vpop.permute.xlu1 %313 }
 0x1df   :  { %307 = vst.msk [vmem:[#allocation2 + $0x1] sm:$0x1] %vm306_vm1, %v304_v31  ;;  %vm991_vm1 = vcmask 155648  }
 0x1e0   :  { %317 = vst.msk [vmem:[#allocation2 + $0x3] sm:$0x1] %vm316_vm2, %v314_v32  ;;  %vm4502_vm2 = vcmask 1045504  }
 0x1e2   :  { %v309_v33 = vpop.permute.xlu0 %308 }
 0x1e3   :  { %312 = vst.msk [vmem:[#allocation2 + $0x2] sm:$0x1] %vm311_vm3, %v309_v33  ;;  %vm999_vm3 = vcmask 319648  }
 0x1ea   :  { %v320_v39 = vld [vmem:[#allocation2] sm:$0xf] }
 0x1eb   :  { %2672 = vmatprep.subr.msk.mxu0 %vm4498_vm4, %v320_v39 }
 0x1ec   :  { %2673 = vmatpush3.msk.msra.mxu0 %vm4498_vm4, %v320_v39  ;;  %v2945_v39 = vpack.c.bf16 %v792_v35, %v791_v34  ;;  %v3663_v35 = vmov 0.0|0.0  }
 0x1ed   :  { %2675 = vmatmul.mubr.msk.f32.vlgmr.msra.gmra.mrb[0].mxu0 %vm333_vm0, %v319_v40  ;;  %2896 = vmatprep.subr.bf16.mxu0 %v2895_v38  ;;  %vm2940_vm0 = vmpackc.low %vm4498_vm4, %vm4503_vm15  ;;  %v793_v40 = vld [vmem:[#allocation20 + $0x10] sm:$0xff]  ;;  %vm1070_vm4 = vcmask 565648  }
 0x1ee   :  { %2898 = vmatpush3.bf16.msra.mxu0 %v2895_v38  ;;  %2969 = vmatprep.subr.bf16.mxu1 %v3663_v35 }
 0x1ef   :  { %2900 = vmatprep.subr.bf16.mxu0 %v2899_v41  ;;  %v326_v0 = vpop.permute.xlu1 %325 }
 0x1f2   :  { %2902 = vmatpush3.bf16.msra.mxu0 %v2899_v41  ;;  %v794_v41 = vld [vmem:[#allocation20 + $0x18] sm:$0xff] }
 0x1f3   :  { %2904 = vmatprep.subr.bf16.mxu0 %v2903_v44  ;;  %v331_v63 = vpop.permute.xlu0 %330 }
 0x1f6   :  { %2906 = vmatpush3.bf16.msra.mxu0 %v2903_v44  ;;  %v2949_v44 = vpack.c.bf16 %v794_v41, %v793_v40  ;;  %v1199_v41 = vld [vmem:[#allocation23 + $0x10] sm:$0xff] }
 0x1f7   :  { %2908 = vmatprep.subr.bf16.mxu0 %v2907_v47 }
 0x1fa   :  { %2910 = vmatpush3.bf16.msra.mxu0 %v2907_v47  ;;  %v796_v47 = vld [vmem:[#allocation20 + $0x28] sm:$0xff] }
 0x1fb   :  { %2912 = vmatprep.subr.bf16.mxu0 %v2911_v50  ;;  %v2953_v48 = vpack.c.bf16 %v796_v47, %v795_v46  ;;  %v1202_v46 = vld [vmem:[#allocation23 + $0x28] sm:$0xff] }
 0x1fe   :  { %2914 = vmatpush3.bf16.msra.mxu0 %v2911_v50  ;;  %v895_v50 = vld [vmem:[#allocation22] sm:$0xff] }
 0x1ff   :  { %2916 = vmatprep.subr.bf16.mxu0 %v2915_v53  ;;  %v2957_v52 = vpack.c.bf16 %v896_v51, %v895_v50 }
 0x202   :  { %2918 = vmatpush3.bf16.msra.mxu0 %v2915_v53 }
 0x203   :  { %2920 = vmatprep.subr.bf16.mxu0 %v2919_v56 }
 0x206   :  { %2922 = vmatpush3.bf16.msra.mxu0 %v2919_v56 }
 0x207   :  { %2924 = vmatprep.subr.bf16.mxu0 %v2923_v62 }
 0x20a   :  { %2926 = vmatpush3.bf16.msra.mxu0 %v2923_v62 }
 0x2c0   :  { %v2676_v2 = vpop.f32.mrb[0].mxu0 }
 0x2c1   :  { %v416_v3 = vadd.f32 %v2676_v2, %v331_v63  ;;  %v410_v4 = vpop.f32.mrb[1].mxu0 }
 0x2c2   :  { %v411_v5 = vadd.f32 %v410_v4, %v326_v0 }
 0x2c3   :  { %v420_v7 = vmax.f32 %v416_v3, 0.0 }
 0x2c4   :  { %v419_v6 = vmax.f32 %v411_v5, 0.0  ;;  %v2961_v5 = vpack.c.bf16 %v898_v60, %v897_v59  ;;  %v1206_v59 = vld [vmem:[#allocation23 + $0x48] sm:$0xff] }
 0x2c6   :  { %2709 = vmatprep.mubr.f32.mxu1 %v419_v6  ;;  %2744 = vmatprep.mubr.f32.mxu0 %v419_v6 }
 0x2c7   :  { %2710 = vmatmul.mubr.f32.vlgmr.msra.gmra.mrb[0].mxu1 %v420_v7  ;;  %2745 = vmatmul.mubr.f32.vlgmr.msra.gmra.mrb[2].mxu0 %v420_v7  ;;  %v899_v7 = vld [vmem:[#allocation22 + $0x20] sm:$0xff] }
 0x2c8   :  { %2763 = vmatprep.mubr.msk.f32.mxu0 %vm4499_vm8, %v650_v16 }
 0x39a   :  { %v2711_v8 = vpop.f32.mrb[0].mxu1  ;;  %v2746_v9 = vpop.f32.mrb[2].mxu0 }
 0x39b   :  { %v604_v10 = vmax.f32 %v2711_v8, %v2746_v9  ;;  %v503_v11 = vpop.f32.mrb[1].mxu1  ;;  %v594_v12 = vpop.f32.mrb[3].mxu0  ;;  %v900_v8 = vld [vmem:[#allocation22 + $0x28] sm:$0xff] }
 0x39c   :  { %v603_v13 = vmax.f32 %v503_v11, %v594_v12  ;;  %v2965_v11 = vpack.c.bf16 %v900_v8, %v899_v7  ;;  %v901_v12 = vld [vmem:[#allocation22 + $0x30] sm:$0xff] }
 0x39d   :  { %617 = vst.msk [vmem:[#allocation3 + $0x8] sm:$0x7f] %vm616_vm6, %v604_v10  ;;  %vm1006_vm6 = vcmask 483648  }
 0x39e   :  { %615 = vst.msk [vmem:[#allocation3] sm:$0xff] %vm4500_vm5, %v603_v13  ;;  %630 = vrot.lane.b32.xlu0 %v603_v13, %s3652_s21  ;;  %620 = vrot.lane.b32.xlu1 %v603_v13, %s3649_s26 }
 0x3a2   :  { %640 = vrot.lane.b32.xlu0 %v603_v13, %s3650_s24  ;;  %622 = vrot.lane.b32.xlu1 %v604_v10, %s3649_s26 }
 0x3a5   :  { %v654_v24 = vld [vmem:[#allocation3] sm:$0xff] }
 0x3a6   :  { %668 = vperm.xlu0 %3182, %v662_v14   ;;  %632 = vrot.lane.b32.xlu1 %v604_v10, %s3652_s21 }
 0x3aa   :  { %678 = vperm.xlu0 %3182, %v664_v15   ;;  %642 = vrot.lane.b32.xlu1 %v604_v10, %s3650_s24 }
 0x3ae   :  { %673 = vperm.xlu1 %3181, %v663_v17  }
 0x3b2   :  { %683 = vperm.xlu1 %3181, %v665_v18  }
 0x410   :  { %v631_v19 = vpop.permute.xlu0 %630  ;;  %v621_v20 = vpop.permute.xlu1 %620 }
 0x411   :  { %637 = vst.msk [vmem:[#allocation3 + $0x1e] sm:$0xff] %vm636_vm9, %v631_v19  ;;  %vm1019_vm9 = vcmask 811648  }
 0x412   :  { %627 = vst.msk [vmem:[#allocation3 + $0xf] sm:$0xff] %vm626_vm10, %v621_v20  ;;  %vm1036_vm10 = vcmask 1041344  }
 0x414   :  { %v641_v21 = vpop.permute.xlu0 %640  ;;  %v623_v22 = vpop.permute.xlu1 %622 }
 0x415   :  { %647 = vst.msk [vmem:[#allocation3 + $0x2d] sm:$0xff] %vm646_vm11, %v641_v21  ;;  %vm4501_vm11 = vcmask 94212  }
 0x416   :  { %629 = vst.msk [vmem:[#allocation3 + $0x17] sm:$0x7f] %vm628_vm12, %v623_v22  ;;  %vm1033_vm12 = vcmask 982016  }
 0x418   :  { %v633_v23 = vpop.permute.xlu1 %632 }
 0x419   :  { %v655_v25 = vld [vmem:[#allocation3 + $0x8] sm:$0xff]  ;;  %639 = vst.msk [vmem:[#allocation3 + $0x26] sm:$0x7f] %vm638_vm13, %v633_v23  ;;  %vm1026_vm13 = vcmask 975648  }
 0x41a   :  { %v2927_v26 = vpack.c.bf16 %v655_v25, %v654_v24 }
 0x41c   :  { %2928 = vmatprep.subr.bf16.mxu0 %v2927_v26  ;;  %v643_v27 = vpop.permute.xlu1 %642 }
 0x41d   :  { %2930 = vmatpush3.bf16.msra.mxu0 %v2927_v26  ;;  %v656_v28 = vld [vmem:[#allocation3 + $0x10] sm:$0xff]  ;;  %v657_v29 = vld [vmem:[#allocation3 + $0x18] sm:$0xff]  ;;  %649 = vst.msk [vmem:[#allocation3 + $0x35] sm:$0x7f] %vm648_vm14, %v643_v27  ;;  %vm4167_vm14 = vmor %vm4501_vm11, %vm1036_vm10  ;;  %vm1093_vm10 = vcmask 1041264   ;;  %vm1090_vm11 = vcmask 900096  }
 0x41e   :  { %v2931_v30 = vpack.c.bf16 %v657_v29, %v656_v28 }
 0x420   :  { %2932 = vmatprep.subr.bf16.mxu0 %v2931_v30  ;;  %v658_v31 = vld [vmem:[#allocation3 + $0x20] sm:$0xff]  ;;  %v659_v32 = vld [vmem:[#allocation3 + $0x28] sm:$0xff] }
 0x421   :  { %2934 = vmatpush3.bf16.msra.mxu0 %v2931_v30  ;;  %v2935_v33 = vpack.c.bf16 %v659_v32, %v658_v31 }
 0x423   :  { %2936 = vmatprep.subr.bf16.mxu0 %v2935_v33 }
 0x424   :  { %v660_v36 = vld [vmem:[#allocation3 + $0x30] sm:$0xff]  ;;  %v661_v37 = vld [vmem:[#allocation3 + $0x38] sm:$0xf] }
 0x425   :  { %2938 = vmatpush3.bf16.msra.mxu0 %v2935_v33  ;;  %v2939_v38 = vpack.c.bf16 %v661_v37, %v660_v36  ;;  %v669_v54 = vpop.permute.xlu0 %668  ;;  %v1197_v36 = vld [vmem:[#allocation23] sm:$0xff]  ;;  %v1198_v37 = vld [vmem:[#allocation23 + $0x8] sm:$0xff] }
 0x427   :  { %2941 = vmatprep.subr.msk.bf16.mxu0 %vm2940_vm0, %v2939_v38 }
 0x429   :  { %2944 = vmatpush3.bf16.msk.msra.mxu0 %vm2940_vm0, %v2939_v38  ;;  %v679_v0 = vpop.permute.xlu0 %678  ;;  %v2970_v38 = vpack.c.bf16 %v1198_v37, %v1197_v36  ;;  %vm1050_vm0 = vcmask 73728  }
 0x42a   :  { %2946 = vmatprep.subr.bf16.mxu0 %v2945_v39 }
 0x42b   :  { %2971 = vmatpush1.bf16.msra.mxu1 %v2970_v38 }
 0x42c   :  { %2764 = vmatmul.mubr.msk.f32.vlgmr.msra.gmra.mrb[4].mxu0 %vm4499_vm8, %v651_v42  ;;  %2972 = vmatprep.subr.bf16.mxu1 %v3663_v35  ;;  %v1200_v42 = vld [vmem:[#allocation23 + $0x18] sm:$0xff] }
 0x42d   :  { %2766 = vmatprep.mubr.msk.f32.mxu0 %vm4499_vm8, %v652_v43  ;;  %2948 = vmatpush3.bf16.msra.mxu0 %v2945_v39  ;;  %v674_v53 = vpop.permute.xlu1 %673  ;;  %v2973_v43 = vpack.c.bf16 %v1200_v42, %v1199_v41 }
 0x42e   :  { %2950 = vmatprep.subr.bf16.mxu0 %v2949_v44 }
 0x42f   :  { %2974 = vmatpush1.bf16.msra.mxu1 %v2973_v43 }
 0x430   :  { %2767 = vmatmul.mubr.msk.f32.gmra.mrb[6].mxu0 %vm4499_vm8, %v653_v45  ;;  %v1201_v45 = vld [vmem:[#allocation23 + $0x20] sm:$0xff]  ;;  %2975 = vmatprep.subr.bf16.mxu1 %v3663_v35  ;;  %vm1094_vm8 = vcmask 12292  }
 0x431   :  { %2952 = vmatpush3.bf16.msra.mxu0 %v2949_v44  ;;  %v684_v61 = vpop.permute.xlu1 %683  ;;  %v2976_v47 = vpack.c.bf16 %v1202_v46, %v1201_v45  ;;  %vm4179_vm15 = vmor %vm1094_vm8, %vm1093_vm10  ;;  %vm1102_vm8 = vcmask 172048   ;;  %vm1431_vm10 = vcmask 575874  }
 0x432   :  { %2954 = vmatprep.subr.bf16.mxu0 %v2953_v48 }
 0x433   :  { %2977 = vmatpush1.bf16.msra.mxu1 %v2976_v47 }
 0x434   :  { %2978 = vmatprep.subr.bf16.mxu1 %v3663_v35 }
 0x435   :  { %2956 = vmatpush3.bf16.msra.mxu0 %v2953_v48 }
 0x436   :  { %2781 = vmatprep.subr.mxu0 %v797_v49 }
 0x439   :  { %2782 = vmatpush3.msra.mxu0 %v797_v49 }
 0x43a   :  { %2958 = vmatprep.subr.bf16.mxu0 %v2957_v52 }
 0x4ff   :  { %v2765_v55 = vpop.f32.mrb[4].mxu0 }
 0x500   :  { %v774_v56 = vadd.f32 %v2765_v55, %v674_v53  ;;  %v768_v57 = vpop.f32.mrb[5].mxu0  ;;  %v1204_v53 = vld [vmem:[#allocation23 + $0x38] sm:$0xff] }
 0x501   :  { %v769_v58 = vadd.f32 %v768_v57, %v669_v54 }
 0x502   :  { %v788_v2 = vmax.f32 %v774_v56, 0.0 }
 0x503   :  { %v787_v62 = vmax.f32 %v769_v58, 0.0  ;;  %v2768_v63 = vpop.f32.mrb[6].mxu0  ;;  %v1205_v58 = vld [vmem:[#allocation23 + $0x40] sm:$0xff] }
 0x504   :  { %v784_v3 = vadd.f32 %v2768_v63, %v684_v61  ;;  %v778_v4 = vpop.f32.mrb[7].mxu0  ;;  %v2982_v60 = vpack.c.bf16 %v1206_v59, %v1205_v58  ;;  %v1208_v63 = vld [vmem:[#allocation23 + $0x58] sm:$0xff] }
 0x505   :  { %v779_v6 = vadd.f32 %v778_v4, %v679_v0  ;;  %2783 = vmatprep.mubr.msk.f32.mxu0 %vm4500_vm5, %v787_v62 }
 0x506   :  { %2784 = vmatmul.mubr.msk.f32.vlgmr.msra.gmra.mrb[8].mxu0 %vm4500_vm5, %v788_v2  ;;  %v790_v10 = vmax.f32 %v784_v3, 0.0 }
 0x507   :  { %v789_v9 = vmax.f32 %v779_v6, 0.0  ;;  %2960 = vmatpush3.bf16.msra.mxu0 %v2957_v52  ;;  %v1203_v52 = vld [vmem:[#allocation23 + $0x30] sm:$0xff]  ;;  %v1210_v6 = vld [vmem:[#allocation23 + $0x68] sm:$0xff] }
 0x508   :  { %2962 = vmatprep.subr.bf16.mxu0 %v2961_v5  ;;  %v2979_v54 = vpack.c.bf16 %v1204_v53, %v1203_v52 }
 0x509   :  { %2786 = vmatprep.mubr.msk.f32.mxu0 %vm4500_vm5, %v789_v9 }
 0x50a   :  { %2787 = vmatmul.mubr.msk.f32.gmra.mrb[10].mxu0 %vm4500_vm5, %v790_v10  ;;  %2980 = vmatpush1.bf16.msra.mxu1 %v2979_v54 }
 0x50b   :  { %2964 = vmatpush3.bf16.msra.mxu0 %v2961_v5  ;;  %2803 = vmatprep.mubr.msk.f32.mxu0 %vm4500_vm5, %v787_v62  ;;  %v1207_v62 = vld [vmem:[#allocation23 + $0x50] sm:$0xff]  ;;  %v1209_v5 = vld [vmem:[#allocation23 + $0x60] sm:$0xff] }
 0x50c   :  { %2966 = vmatprep.subr.bf16.mxu0 %v2965_v11  ;;  %2981 = vmatprep.subr.bf16.mxu1 %v3663_v35  ;;  %v2988_v8 = vpack.c.bf16 %v1210_v6, %v1209_v5 }
 0x50e   :  { %2983 = vmatpush1.bf16.msra.mxu1 %v2982_v60 }
 0x50f   :  { %2968 = vmatpush3.bf16.msra.mxu0 %v2965_v11  ;;  %2984 = vmatprep.subr.bf16.mxu1 %v3663_v35 }
 0x510   :  { %2801 = vmatprep.subr.mxu0 %v901_v12 }
 0x513   :  { %2802 = vmatpush3.msra.mxu0 %v901_v12 }
 0x514   :  { %2804 = vmatmul.mubr.msk.f32.vlgmr.msra.gmra.mrb[12].mxu0 %vm4500_vm5, %v788_v2  ;;  %2809 = vmatprep.subr.mxu0 %v3648_v1  ;;  %v2985_v2 = vpack.c.bf16 %v1208_v63, %v1207_v62  ;;  %v1316_v62 = vld [vmem:[#allocation26] sm:$0xff]  ;;  %v2460_v63 = vld [vmem:[#allocation25] ss:$0 sm:$0xff] }
 0x515   :  { %2806 = vmatprep.mubr.msk.f32.mxu0 %vm4500_vm5, %v789_v9  ;;  %v1211_v9 = vld [vmem:[#allocation23 + $0x70] sm:$0xff]  ;;  %2810 = vmatpush3.msra.mxu0 %v1316_v62 }
 0x516   :  { %2986 = vmatpush1.bf16.msra.mxu1 %v2985_v2 }
 0x517   :  { %2987 = vmatprep.subr.bf16.mxu1 %v3663_v35 }
 0x518   :  { %2807 = vmatmul.mubr.msk.f32.gmra.mrb[14].mxu0 %vm4500_vm5, %v790_v10  ;;  %v1212_v10 = vld [vmem:[#allocation23 + $0x78] sm:$0xff]  ;;  %vm1077_vm5 = vcmask 729648  }
 0x519   :  { %v2991_v12 = vpack.c.bf16 %v1212_v10, %v1211_v9 }
 0x51a   :  { %2989 = vmatpush1.bf16.msra.mxu1 %v2988_v8 }
 0x51b   :  { %2990 = vmatprep.subr.bf16.mxu1 %v3663_v35 }
 0x51e   :  { %2992 = vmatpush1.bf16.msra.mxu1 %v2991_v12 }
 0x51f   :  { %2993 = vmatprep.subr.bf16.mxu1 %v3663_v35 }
 0x5d9   :  { %v2785_v13 = vpop.f32.mrb[8].mxu0 }
 0x5da   :  { %v876_v14 = vpop.f32.mrb[9].mxu0 }
 0x5dd   :  { %v2788_v15 = vpop.f32.mrb[10].mxu0 }
 0x5de   :  { %v886_v16 = vpop.f32.mrb[11].mxu0 }
 0x5e7   :  { %v2805_v17 = vpop.f32.mrb[12].mxu0 }
 0x5e8   :  { %v988_v18 = vmax.f32 %v2785_v13, %v2805_v17  ;;  %v968_v19 = vpop.f32.mrb[13].mxu0  ;;  %v1213_v13 = vld [vmem:[#allocation23 + $0x80] sm:$0xff] }
 0x5e9   :  { %v987_v20 = vmax.f32 %v876_v14, %v968_v19  ;;  %v1214_v14 = vld [vmem:[#allocation23 + $0x88] sm:$0xff] }
 0x5ea   :  { %1053 = vrot.lane.b32.xlu1 %v988_v18, %s3654_s0  ;;  %v2446_v21 = vrot.slane %v988_v18, 10  ;;  %v2445_v25 = vrot.slane %v988_v18, 9  ;;  %v4105_v26 = vcombine.high %v988_v18, %v988_v18  ;;  %v2447_v29 = vrot.slane %v988_v18, 11  ;;  %v1215_v18 = vld [vmem:[#allocation23 + $0x90] sm:$0x3f] }
 0x5eb   :  { %v2808_v22 = vpop.f32.mrb[14].mxu0  ;;  %992 = vst.msk [vmem:[#allocation4] sm:$0x1] %vm991_vm1, %v987_v20  ;;  %v2440_v28 = vrot.slane %v987_v20, 9  ;;  %v2441_v31 = vrot.slane %v987_v20, 10  ;;  %v2442_v32 = vrot.slane %v987_v20, 11  ;;  %v1015_v33 = vcombine.high %v987_v20, %v987_v20 }
 0x5ec   :  { %v4102_v23 = vmax.f32 %v2788_v15, %v2808_v22  ;;  %1067 = vrot.lane.b32.xlu0 %v2446_v21, %s3655_s7  ;;  %v978_v24 = vpop.f32.mrb[15].mxu0  ;;  %v2450_v30 = vrot.slane %v4105_v26, 11  ;;  %v2448_v34 = vrot.slane %v4105_v26, 9  ;;  %v2449_v15 = vrot.slane %v4105_v26, 10 }
 0x5ed   :  { %v4107_v27 = vmax.f32 %v886_v16, %v978_v24  ;;  %v2444_v39 = vrot.slane %v1015_v33, 10  ;;  %v2443_v40 = vrot.slane %v1015_v33, 9  ;;  %v1040_v49 = vrot.slane %v1015_v33, 7 }
 0x5ee   :  { %1060 = vrot.lane.b32.xlu1 %v2445_v25, %s3656_s18  ;;  %1107 = vst.msk [vmem:[#allocation4 + $0x2] sm:$0x1] %vm991_vm1, %v2450_v30  ;;  %v4126_v44 = vcombine.high %v4102_v23, %v4102_v23  ;;  %v2456_v48 = vrot.slane %v4102_v23, 9  ;;  %v2457_v50 = vrot.slane %v4102_v23, 10  ;;  %v2458_v55 = vrot.slane %v4102_v23, 11 }
 0x5ef   :  { %v1041_v51 = vrot.slane %v1040_v49, 4  ;;  %v1131_v56 = vcombine.high %v4107_v27, %v4107_v27  ;;  %v2451_v57 = vrot.slane %v4107_v27, 9  ;;  %v2452_v0 = vrot.slane %v4107_v27, 10 }
 0x5f0   :  { %996 = vrot.lane.b32.xlu0 %v2440_v28, %s3657_s6  ;;  %v2453_v7 = vrot.slane %v4107_v27, 11  ;;  %v2994_v16 = vpack.c.bf16 %v1214_v14, %v1213_v13  ;;  %v2459_v17 = vrot.slane %v4126_v44, 9  ;;  %vm1056_vm1 = vcmask 237648  }
 0x5f1   :  { %v2455_v61 = vrot.slane %v1131_v56, 11  ;;  %v2454_v3 = vrot.slane %v1131_v56, 9  ;;  %v1144_v4 = vrot.slane %v1131_v56, 6 }
 0x5f2   :  { %1074 = vrot.lane.b32.xlu1 %v2447_v29, %s3658_s9  ;;  %2995 = vmatpush1.bf16.msra.mxu1 %v2994_v16  ;;  %v1441_v16 = vld [vmem:[#allocation31] sm:$0xff] }
 0x5f3   :  { %v1145_v11 = vrot.slane %v1144_v4, 4  ;;  %1268 = vmatprep.subr.mxu1 %v3648_v1 }
 0x5f4   :  { %1003 = vrot.lane.b32.xlu0 %v2441_v31, %s3659_s25 }
 0x5f6   :  { %1080 = vrot.lane.b32.xlu1 %v4105_v26, %s3660_s10  ;;  %2461 = vmatpush1.msk.msra.mxu1 %vm4502_vm2, %v1215_v18  ;;  %vm1083_vm2 = vcmask 893648  }
 0x5f8   :  { %1010 = vrot.lane.b32.xlu0 %v2442_v32, %s3661_s20 }
 0x5fa   :  { %1161 = vrot.lane.b32.xlu1 %v4102_v23, %s3656_s18 }
 0x5fc   :  { %1016 = vrot.lane.b32.xlu0 %v1015_v33, %s3662_s13 }
 0x5fe   :  { %1087 = vrot.lane.b32.xlu1 %v2448_v34, %s3664_s12 }
 0x600   :  { %1109 = vrot.lane.b32.xlu0 %v4107_v27, %s3657_s6 }
 0x602   :  { %1030 = vrot.lane.b32.xlu1 %v2444_v39, %s3665_s4 }
 0x604   :  { %1023 = vrot.lane.b32.xlu0 %v2443_v40, %s3666_s3 }
 0x606   :  { %1184 = vrot.lane.b32.xlu1 %v4126_v44, %s3664_s12 }
 0x608   :  { %1167 = vrot.lane.b32.xlu0 %v2456_v48, %s3655_s7 }
 0x60a   :  { %1173 = vrot.lane.b32.xlu1 %v2457_v50, %s3658_s9 }
 0x60c   :  { %1047 = vrot.lane.b32.xlu0 %v1041_v51, %s3667_s8 }
 0x60e   :  { %1179 = vrot.lane.b32.xlu1 %v2458_v55, %s3660_s10 }
 0x610   :  { %1115 = vrot.lane.b32.xlu0 %v2451_v57, %s3659_s25 }
 0x612   :  { %1156 = vrot.lane.b32.xlu1 %v2455_v61, %s3654_s0 }
 0x614   :  { %1121 = vrot.lane.b32.xlu0 %v2452_v0, %s3661_s20 }
 0x616   :  { %1138 = vrot.lane.b32.xlu1 %v2454_v3, %s3665_s4 }
 0x618   :  { %1127 = vrot.lane.b32.xlu0 %v2453_v7, %s3662_s13  ;;  %v1304_v7 = vld [vmem:[#allocation8] sm:$0xf] }
 0x61a   :  { %1150 = vrot.lane.b32.xlu1 %v1145_v11, %s3667_s8  ;;  %s3678_s8 = smov 92  }
 0x61c   :  { %1132 = vrot.lane.b32.xlu0 %v1131_v56, %s3666_s3 }
 0x61e   :  { %1099 = vrot.lane.b32.xlu1 %v2449_v15, %s3668_s14  ;;  %v1438_v15 = vld [vmem:[#allocation29] sm:$0xff] }
 0x620   :  { %1042 = vrot.lane.b32.xlu0 %v1041_v51, %s3669_s30 }
 0x622   :  { %1192 = vrot.lane.b32.xlu1 %v2459_v17, %s3668_s14  ;;  %v1442_v17 = vld [vmem:[#allocation31 + $0x8] sm:$0x7f]  ;;  %s3679_s14 = smov 88  }
 0x624   :  { %1146 = vrot.lane.b32.xlu0 %v1145_v11, %s3669_s30  ;;  %v2463_v11 = vld [vmem:[#allocation28] ss:$0 sm:$0xff] }
 0x65c   :  { %v1054_v19 = vpop.permute.xlu1 %1053 }
 0x65e   :  { %v1068_v20 = vpop.permute.xlu0 %1067 }
 0x660   :  { %v1061_v21 = vpop.permute.xlu1 %1060 }
 0x662   :  { %v997_v22 = vpop.permute.xlu0 %996 }
 0x663   :  { %1000 = vst.msk [vmem:[#allocation4] sm:$0x1] %vm999_vm3, %v997_v22 }
 0x664   :  { %v1075_v23 = vpop.permute.xlu1 %1074 }
 0x666   :  { %v1004_v24 = vpop.permute.xlu0 %1003 }
 0x667   :  { %1007 = vst.msk [vmem:[#allocation4] sm:$0x1] %vm1006_vm6, %v1004_v24 }
 0x668   :  { %v1081_v25 = vpop.permute.xlu1 %1080 }
 0x66a   :  { %v1011_v26 = vpop.permute.xlu0 %1010 }
 0x66b   :  { %1014 = vst.msk [vmem:[#allocation4] sm:$0x1] %vm1013_vm7, %v1011_v26  ;;  %v1439_v26 = vld [vmem:[#allocation29 + $0x8] sm:$0x7f] }
 0x66c   :  { %v1162_v27 = vpop.permute.xlu1 %1161 }
 0x66e   :  { %v1017_v28 = vpop.permute.xlu0 %1016 }
 0x66f   :  { %1020 = vst.msk [vmem:[#allocation4] sm:$0x1] %vm1019_vm9, %v1017_v28 }
 0x670   :  { %v1088_v29 = vpop.permute.xlu1 %1087 }
 0x671   :  { %v1089_v41 = vrot.slane %v1088_v29, 4 }
 0x672   :  { %v1110_v30 = vpop.permute.xlu0 %1109 }
 0x673   :  { %1112 = vst.msk [vmem:[#allocation4 + $0x2] sm:$0x1] %vm999_vm3, %v1110_v30  ;;  %vm1063_vm3 = vcmask 401648   ;;  %v1091_v45 = vsel %vm1090_vm11, %v1089_v41, %v1088_v29  ;;  %v1699_v41 = vld [vmem:[#allocation32] sm:$0xff] }
 0x674   :  { %v1031_v31 = vpop.permute.xlu1 %1030 }
 0x675   :  { %v1032_v32 = vrot.slane %v1031_v31, 4 }
 0x676   :  { %v1024_v34 = vpop.permute.xlu0 %1023 }
 0x677   :  { %v1034_v36 = vsel %vm1033_vm12, %v1032_v32, %v1031_v31  ;;  %1027 = vst.msk [vmem:[#allocation4] sm:$0x1] %vm1026_vm13, %v1024_v34 }
 0x678   :  { %v1185_v37 = vpop.permute.xlu1 %1184  ;;  %1039 = vst.msk [vmem:[#allocation4] sm:$0x11] %vm4167_vm14, %v1034_v36  ;;  %v1571_v36 = vld [vmem:[%s4482_s17 + $0x8] sm:$0xff] }
 0x679   :  { %v1186_v52 = vrot.slane %v1185_v37, 4 }
 0x67a   :  { %v1168_v38 = vpop.permute.xlu0 %1167 }
 0x67b   :  { %v1187_v56 = vsel %vm1090_vm11, %v1186_v52, %v1185_v37  ;;  %vm1400_vm11 = vcmask 188416   ;;  %v1570_v37 = vld [vmem:[%s4482_s17] sm:$0xff] }
 0x67c   :  { %v1174_v39 = vpop.permute.xlu1 %1173 }
 0x67e   :  { %v1048_v40 = vpop.permute.xlu0 %1047 }
 0x67f   :  { %1051 = vst.msk [vmem:[#allocation4 + $0x1] sm:$0x1] %vm1050_vm0, %v1048_v40  ;;  %v1572_v40 = vld [vmem:[%s4482_s17 + $0x10] sm:$0xff] }
 0x680   :  { %1057 = vst.msk [vmem:[#allocation4 + $0x1] sm:$0x1] %vm1056_vm1, %v1054_v19  ;;  %v1180_v42 = vpop.permute.xlu1 %1179 }
 0x681   :  { %1064 = vst.msk [vmem:[#allocation4 + $0x1] sm:$0x1] %vm1063_vm3, %v1061_v21 }
 0x682   :  { %1071 = vst.msk [vmem:[#allocation4 + $0x1] sm:$0x1] %vm1070_vm4, %v1068_v20  ;;  %v1116_v43 = vpop.permute.xlu0 %1115 }
 0x683   :  { %1118 = vst.msk [vmem:[#allocation4 + $0x2] sm:$0x1] %vm1006_vm6, %v1116_v43  ;;  %vm1045_vm6 = vcmask 172128   ;;  %v1701_v43 = vld [vmem:[#allocation32 + $0x10] sm:$0xff] }
 0x684   :  { %1078 = vst.msk [vmem:[#allocation4 + $0x1] sm:$0x1] %vm1077_vm5, %v1075_v23  ;;  %v1157_v46 = vpop.permute.xlu1 %1156 }
 0x685   :  { %1084 = vst.msk [vmem:[#allocation4 + $0x1] sm:$0x1] %vm1083_vm2, %v1081_v25 }
 0x686   :  { %1096 = vst.msk [vmem:[#allocation4 + $0x1] sm:$0x11] %vm4179_vm15, %v1091_v45  ;;  %v1122_v47 = vpop.permute.xlu0 %1121  ;;  %v1702_v45 = vld [vmem:[#allocation32 + $0x18] sm:$0xff] }
 0x687   :  { %1124 = vst.msk [vmem:[#allocation4 + $0x2] sm:$0x1] %vm1013_vm7, %v1122_v47  ;;  %vm1314_vm7 = vcmask 60416   ;;  %v1703_v47 = vld [vmem:[#allocation32 + $0x20] sm:$0xff] }
 0x688   :  { %v1139_v48 = vpop.permute.xlu1 %1138 }
 0x689   :  { %v1140_v50 = vrot.slane %v1139_v48, 4 }
 0x68a   :  { %v1128_v49 = vpop.permute.xlu0 %1127 }
 0x68b   :  { %1130 = vst.msk [vmem:[#allocation4 + $0x2] sm:$0x1] %vm1019_vm9, %v1128_v49  ;;  %v1141_v54 = vsel %vm1033_vm12, %v1140_v50, %v1139_v48  ;;  %vm1398_vm9 = vcmask 779264   ;;  %vm1453_vm12 = vcmask 15360   ;;  %v1704_v48 = vld [vmem:[#allocation32 + $0x28] sm:$0xff]  ;;  %v1705_v50 = vld [vmem:[#allocation32 + $0x30] sm:$0xff] }
 0x68c   :  { %v1151_v51 = vpop.permute.xlu1 %1150  ;;  %1399 = vst.msk [vmem:[#allocation5] sm:$0x3] %vm1398_vm9, %v3648_v1  ;;  %v3014_v49 = vpack.c.bf16 %v1704_v48, %v1703_v47  ;;  %vm1558_vm9 = vcmask 777216   ;;  %v2071_v47 = vld [vmem:[#allocation34 + $0x20] sm:$0xff]  ;;  %v2072_v48 = vld [vmem:[#allocation34 + $0x28] sm:$0xff] }
 0x68d   :  { %1153 = vst.msk [vmem:[#allocation4 + $0x3] sm:$0x1] %vm1050_vm0, %v1151_v51  ;;  %vm1411_vm0 = vcmask 584066   ;;  %v1706_v51 = vld [vmem:[#allocation32 + $0x38] sm:$0xff] }
 0x68e   :  { %1159 = vst.msk [vmem:[#allocation4 + $0x3] sm:$0x1] %vm1056_vm1, %v1157_v46  ;;  %v1133_v53 = vpop.permute.xlu0 %1132  ;;  %vm1426_vm1 = vcmask 378049   ;;  %v3010_v46 = vpack.c.bf16 %v1702_v45, %v1701_v43  ;;  %v3018_v52 = vpack.c.bf16 %v1706_v51, %v1705_v50  ;;  %v2090_v50 = vld [vmem:[#allocation34 + $0xb8] sm:$0xff] }
 0x68f   :  { %1164 = vst.msk [vmem:[#allocation4 + $0x3] sm:$0x1] %vm1063_vm3, %v1162_v27  ;;  %vm1416_vm3 = vcmask 781891  }
 0x690   :  { %1135 = vst.msk [vmem:[#allocation4 + $0x2] sm:$0x1] %vm1026_vm13, %v1133_v53  ;;  %v1100_v55 = vpop.permute.xlu1 %1099  ;;  %vm1406_vm13 = vcmask 386241   ;;  %v1707_v53 = vld [vmem:[#allocation32 + $0x40] sm:$0xff] }
 0x691   :  { %1170 = vst.msk [vmem:[#allocation4 + $0x3] sm:$0x1] %vm1070_vm4, %v1168_v38  ;;  %vm1225_vm4 = vcmask 179200   ;;  %v1562_v38 = vld [vmem:[%s4481_s16] sm:$0xff] }
 0x692   :  { %1143 = vst.msk [vmem:[#allocation4 + $0x2] sm:$0x11] %vm4167_vm14, %v1141_v54  ;;  %v1043_v57 = vpop.permute.xlu0 %1042  ;;  %vm1421_vm14 = vcmask 180224   ;;  %v1708_v54 = vld [vmem:[#allocation32 + $0x48] sm:$0xff] }
 0x693   :  { %1103 = vst.msk [vmem:[#allocation4 + $0x5] sm:$0x1] %vm1102_vm8, %v1100_v55  ;;  %v3022_v55 = vpack.c.bf16 %v1708_v54, %v1707_v53  ;;  %v2073_v53 = vld [vmem:[#allocation34 + $0x30] sm:$0xff]  ;;  %v2074_v54 = vld [vmem:[#allocation34 + $0x38] sm:$0xff] }
 0x694   :  { %1176 = vst.msk [vmem:[#allocation4 + $0x3] sm:$0x1] %vm1077_vm5, %v1174_v39  ;;  %v1193_v58 = vpop.permute.xlu1 %1192  ;;  %vm1302_vm5 = vcmask 125952   ;;  %v1573_v39 = vld [vmem:[%s4482_s17 + $0x18] sm:$0x3f] }
 0x695   :  { %1182 = vst.msk [vmem:[#allocation4 + $0x3] sm:$0x1] %vm1083_vm2, %v1180_v42  ;;  %vm1324_vm2 = vcmask 64512   ;;  %v1700_v42 = vld [vmem:[#allocation32 + $0x8] sm:$0xff] }
 0x696   :  { %1046 = vst.msk [vmem:[#allocation4 + $0x4] sm:$0x1] %vm1045_vm6, %v1043_v57  ;;  %v1147_v59 = vpop.permute.xlu0 %1146  ;;  %v3006_v44 = vpack.c.bf16 %v1700_v42, %v1699_v41 }
 0x697   :  { %1189 = vst.msk [vmem:[#allocation4 + $0x3] sm:$0x11] %vm4179_vm15, %v1187_v56  ;;  %vm3670_vm15 = vmmov 0  }
 0x698   :  { %1195 = vst.msk [vmem:[#allocation4 + $0x7] sm:$0x1] %vm1102_vm8, %v1193_v58  ;;  %2811 = vmatprep.mubr.msk.f32.mxu0 %vm3670_vm15, %v3648_v1  ;;  %vm1436_vm8 = vcmask 773699   ;;  %vm1548_vm15 = vcmask 784384  }
 0x699   :  { %1149 = vst.msk [vmem:[#allocation4 + $0x6] sm:$0x1] %vm1045_vm6, %v1147_v59  ;;  %vm1460_vm6 = vcmask 1041408  }
 0x6a0   :  { %v1196_v60 = vld [vmem:[#allocation4] sm:$0xff] }
 0x6a1   :  { %v1224_v61 = vcombine.high %v1196_v60, %v1196_v60 }
 0x6a3   :  { %2462 = vmatprep.mubr.msk.f32.mxu1 %vm1225_vm4, %v1224_v61  ;;  %vm1541_vm4 = vcmask 785408  }
 0x6a4   :  { %1297 = vmatmul.mubr.f32.vlgmr.msra.gmra.mrb[2].mxu1 %v1196_v60  ;;  %1543 = vst.msk [vmem:[#allocation6 + $0x8] sm:$0xff] %vm1541_vm4, %v3648_v1  ;;  %1542 = vst.msk [vmem:[#allocation6] sm:$0xff] %vm1541_vm4, %v3648_v1 }
 0x6a5   :  { %1544 = vst.msk [vmem:[#allocation6 + $0x10] sm:$0xff] %vm1541_vm4, %v3648_v1 }
 0x777   :  { %v1298_v0 = vpop.f32.mrb[2].mxu1 }
 0x778   :  { %v1299_v2 = vadd.f32 %v2460_v63, %v1298_v0  ;;  %v1300_v3 = vpop.f32.mrb[3].mxu1  ;;  %v1563_v0 = vld [vmem:[%s4481_s16 + $0x8] sm:$0xff] }
 0x779   :  { %v1565_v3 = vld [vmem:[%s4481_s16 + $0x18] sm:$0x3f] }
 0x77a   :  { %1303 = vst.msk [vmem:[%s4487_s22] sm:$0xf] %vm1302_vm5, %v1299_v2  ;;  %v1305_v4 = vmul.f32 0.5, %v1299_v2  ;;  %s3671_s22 = smov 24   ;;  %vm1545_vm5 = vcmask 783360  }
 0x77b   :  { %1546 = vst.msk [vmem:[#allocation6 + $0x18] sm:$0x3f] %vm1545_vm5, %v3648_v1  ;;  %vm1831_vm5 = vcmask 1040768  }
 0x77c   :  { %v1306_v5 = vmul.f32 1.442695, %v1305_v4  ;;  %v1709_v4 = vld [vmem:[#allocation32 + $0x50] sm:$0xff] }
 0x77e   :  { %3187 = vpow2.f32 %v1306_v5  ;;  %v1710_v5 = vld [vmem:[#allocation32 + $0x58] sm:$0xff] }
 0x788   :  { %v3188_v6 = vpop.eup %3187 }
 0x789   :  { %1309 = vrot.lane.b32.xlu0 %v3188_v6, %s3665_s4  ;;  %v3026_v6 = vpack.c.bf16 %v1710_v5, %v1709_v4  ;;  %v2093_v5 = vld [vmem:[#allocation34 + $0xd0] sm:$0xff] }
 0x7fb   :  { %v1310_v8 = vpop.permute.xlu0 %1309 }
 0x7fc   :  { %v1312_v9 = vmul.f32 %v1310_v8, %v1304_v7 }
 0x7fe   :  { %v1313_v10 = vadd.f32 %v1312_v9, %v1299_v2  ;;  %v1564_v2 = vld [vmem:[%s4481_s16 + $0x10] sm:$0xff]  ;;  %s3677_s16 = smov 44  }
 0x800   :  { %2812 = vmatmul.mubr.msk.f32.vlgmr.msra.gmra.mrb[16].mxu0 %vm1324_vm2, %v1313_v10  ;;  %1315 = vst.msk [vmem:[#allocation36] sm:$0xf] %vm1314_vm7, %v1313_v10  ;;  %vm1594_vm2 = vcmask 244736   ;;  %vm1560_vm7 = vcmask 776192  }
 0x801   :  { %2816 = vmatprep.mubr.msk.f32.mxu0 %vm1453_vm12, %v1438_v15  ;;  %2827 = vmatprep.mubr.msk.f32.mxu1 %vm1594_vm2, %v1562_v38 }
 0x8d3   :  { %v1394_v12 = vpop.f32.mrb[16].mxu0 }
 0x8d4   :  { %v1395_v13 = vadd.f32 %v2463_v11, %v1394_v12  ;;  %v2813_v14 = vpop.f32.mrb[17].mxu0 }
 0x8d6   :  { %1403 = vrot.lane.b32.xlu0 %v1395_v13, %s3671_s22  ;;  %1418 = vrot.lane.b32.xlu1 %v1395_v13, %s3649_s26  ;;  %1401 = vst.msk [vmem:[#allocation5] sm:$0x1] %vm1400_vm11, %v1395_v13  ;;  %vm4527_vm11 = vmmov 1   ;;  %s3682_s22 = smov 52  }
 0x8da   :  { %1408 = vrot.lane.b32.xlu0 %v1395_v13, %s3672_s27  ;;  %1423 = vrot.lane.b32.xlu1 %v1395_v13, %s3673_s23  ;;  %s3684_s23 = smov 56  }
 0x8de   :  { %1413 = vrot.lane.b32.xlu0 %v1395_v13, %s3674_s15  ;;  %1428 = vrot.lane.b32.xlu1 %v1395_v13, %s3675_s11 }
 0x8e2   :  { %1445 = vperm.xlu0 %3182, %v1441_v16   ;;  %1433 = vrot.lane.b32.xlu1 %v1395_v13, %s3676_s19 }
 0x8e6   :  { %1450 = vperm.xlu1 %3181, %v1442_v17  }
 0x948   :  { %v1404_v18 = vpop.permute.xlu0 %1403  ;;  %v1419_v19 = vpop.permute.xlu1 %1418 }
 0x949   :  { %1407 = vst.msk [vmem:[#allocation5 - $0x1] sm:$0x2] %vm1406_vm13, %v1404_v18 }
 0x94a   :  { %1422 = vst.msk [vmem:[#allocation5 + $0x1] sm:$0x1] %vm1421_vm14, %v1419_v19  ;;  %vm1808_vm14 = vcmask 712704  }
 0x94c   :  { %v1409_v20 = vpop.permute.xlu0 %1408  ;;  %v1424_v21 = vpop.permute.xlu1 %1423 }
 0x94d   :  { %1412 = vst.msk [vmem:[#allocation5 - $0x2] sm:$0x4] %vm1411_vm0, %v1409_v20  ;;  %vm1819_vm0 = vcmask 1041088  }
 0x94e   :  { %1427 = vst.msk [vmem:[#allocation5] sm:$0x2] %vm1426_vm1, %v1424_v21  ;;  %vm1820_vm1 = vcmask 389124  }
 0x950   :  { %v1414_v22 = vpop.permute.xlu0 %1413  ;;  %v1429_v23 = vpop.permute.xlu1 %1428 }
 0x951   :  { %1417 = vst.msk [vmem:[#allocation5 - $0x3] sm:$0x8] %vm1416_vm3, %v1414_v22  ;;  %vm1816_vm3 = vcmask 719872  }
 0x952   :  { %1432 = vst.msk [vmem:[#allocation5 - $0x1] sm:$0x4] %vm1431_vm10, %v1429_v23  ;;  %v2083_v23 = vld [vmem:[#allocation34 + $0x80] sm:$0xff]  ;;  %vm1821_vm10 = vmor %vm1820_vm1, %vm1819_vm0  ;;  %vm1910_vm0 = vcmask 752640   ;;  %vm1903_vm1 = vcmask 745504  }
 0x954   :  { %v1434_v24 = vpop.permute.xlu1 %1433 }
 0x955   :  { %1437 = vst.msk [vmem:[#allocation5 - $0x2] sm:$0x8] %vm1436_vm8, %v1434_v24  ;;  %v2084_v24 = vld [vmem:[#allocation34 + $0x88] sm:$0xff]  ;;  %vm1894_vm8 = vcmask 1040736  }
 0x95c   :  { %v1440_v25 = vld [vmem:[#allocation5] sm:$0x3] }
 0x95d   :  { %2814 = vmatprep.subr.msk.mxu0 %vm1460_vm6, %v1440_v25 }
 0x95e   :  { %2815 = vmatpush3.msk.msra.mxu0 %vm1460_vm6, %v1440_v25  ;;  %v3030_v25 = vpack.c.bf16 %v2084_v24, %v2083_v23  ;;  %v2100_v23 = vld [vmem:[#allocation34 + $0x108] sm:$0xff]  ;;  %vm1895_vm6 = vcmask 28676  }
 0x95f   :  { %2817 = vmatmul.mubr.msk.f32.vlgmr.msra.gmra.mrb[18].mxu0 %vm1453_vm12, %v1439_v26  ;;  %3007 = vmatprep.subr.bf16.mxu0 %v3006_v44  ;;  %vm4528_vm12 = vcmask 1045504   ;;  %v2067_v26 = vld [vmem:[#allocation34] sm:$0xff] }
 0x960   :  { %3009 = vmatpush3.bf16.msra.mxu0 %v3006_v44  ;;  %vm3001_vm13 = vmpackc.low %vm4528_vm12, %vm4527_vm11 }
 0x961   :  { %v1446_v29 = vpop.permute.xlu0 %1445  ;;  %3011 = vmatprep.subr.bf16.mxu0 %v3010_v46  ;;  %vm4333_vm11 = vmor %vm1895_vm6, %vm1894_vm8  ;;  %vm1922_vm8 = vcmask 424960   ;;  %vm4535_vm6 = vcmask 94212  }
 0x964   :  { %3013 = vmatpush3.bf16.msra.mxu0 %v3010_v46 }
 0x965   :  { %v1451_v27 = vpop.permute.xlu1 %1450  ;;  %3015 = vmatprep.subr.bf16.mxu0 %v3014_v49 }
 0x968   :  { %3017 = vmatpush3.bf16.msra.mxu0 %v3014_v49  ;;  %v2089_v49 = vld [vmem:[#allocation34 + $0xb0] sm:$0xff] }
 0x969   :  { %3019 = vmatprep.subr.bf16.mxu0 %v3018_v52 }
 0x96c   :  { %3021 = vmatpush3.bf16.msra.mxu0 %v3018_v52 }
 0x96d   :  { %3023 = vmatprep.subr.bf16.mxu0 %v3022_v55 }
 0x970   :  { %3025 = vmatpush3.bf16.msra.mxu0 %v3022_v55 }
 0x971   :  { %3027 = vmatprep.subr.bf16.mxu0 %v3026_v6 }
 0x974   :  { %3029 = vmatpush3.bf16.msra.mxu0 %v3026_v6  ;;  %v2094_v6 = vld [vmem:[#allocation34 + $0xd8] sm:$0xff] }
 0xa32   :  { %v2818_v28 = vpop.f32.mrb[18].mxu0 }
 0xa33   :  { %v1536_v30 = vadd.f32 %v2818_v28, %v1451_v27  ;;  %v1530_v31 = vpop.f32.mrb[19].mxu0  ;;  %v2068_v27 = vld [vmem:[#allocation34 + $0x8] sm:$0xff] }
 0xa34   :  { %v1531_v32 = vadd.f32 %v1530_v31, %v1446_v29  ;;  %v3032_v28 = vpack.c.bf16 %v2068_v27, %v2067_v26  ;;  %v2085_v29 = vld [vmem:[#allocation34 + $0x90] sm:$0xff] }
 0xa35   :  { %v1540_v33 = vmax.f32 %v1536_v30, 0.0  ;;  %v2086_v30 = vld [vmem:[#allocation34 + $0x98] sm:$0xff]  ;;  %v2097_v27 = vld [vmem:[#allocation34 + $0xf0] sm:$0xff] }
 0xa36   :  { %v1539_v34 = vmax.f32 %v1531_v32, 0.0  ;;  %v3034_v31 = vpack.c.bf16 %v2086_v30, %v2085_v29  ;;  %v2069_v32 = vld [vmem:[#allocation34 + $0x10] sm:$0xff] }
 0xa37   :  { %1549 = vst.msk [vmem:[#allocation6 + $0x8] sm:$0x7f] %vm1548_vm15, %v1540_v33  ;;  %1554 = vrot.lane.b32.xlu1 %v1540_v33, %s3649_s26  ;;  %v2070_v33 = vld [vmem:[#allocation34 + $0x18] sm:$0xff]  ;;  %v2081_v30 = vld [vmem:[#allocation34 + $0x70] sm:$0xff]  ;;  %vm1832_vm15 = vcmask 61444  }
 0xa38   :  { %1547 = vst.msk [vmem:[#allocation6] sm:$0xff] %vm1541_vm4, %v1539_v34  ;;  %1552 = vrot.lane.b32.xlu0 %v1539_v34, %s3649_s26  ;;  %v3036_v34 = vpack.c.bf16 %v2070_v33, %v2069_v32  ;;  %v2117_v32 = vld [vmem:[#allocation34 + $0x190] sm:$0xff]  ;;  %vm4337_vm12 = vmor %vm1832_vm15, %vm1831_vm5  ;;  %vm1848_vm15 = vcmask 1041152  }
 0xa3b   :  { %1581 = vperm.xlu1 %3181, %v1571_v36  }
 0xa3c   :  { %1576 = vperm.xlu0 %3182, %v1570_v37  }
 0xa3f   :  { %1591 = vperm.xlu1 %3181, %v1573_v39   ;;  %v1566_v58 = vld [vmem:[#allocation6] sm:$0xff]  ;;  %v2087_v39 = vld [vmem:[#allocation34 + $0xa0] sm:$0xff] }
 0xa40   :  { %1586 = vperm.xlu0 %3182, %v1572_v40   ;;  %v2088_v40 = vld [vmem:[#allocation34 + $0xa8] sm:$0xff] }
 0xa41   :  { %v3038_v43 = vpack.c.bf16 %v2088_v40, %v2087_v39  ;;  %v2118_v39 = vld [vmem:[#allocation34 + $0x198] sm:$0xff]  ;;  %v2101_v40 = vld [vmem:[#allocation34 + $0x110] sm:$0xff] }
 0xaa9   :  { %v1555_v56 = vpop.permute.xlu1 %1554 }
 0xaaa   :  { %1561 = vst.msk [vmem:[#allocation6 + $0x17] sm:$0x7f] %vm1560_vm7, %v1555_v56  ;;  %v1553_v57 = vpop.permute.xlu0 %1552  ;;  %vm1885_vm7 = vcmask 352256  }
 0xaab   :  { %1559 = vst.msk [vmem:[#allocation6 + $0xf] sm:$0xff] %vm1558_vm9, %v1553_v57  ;;  %v3040_v57 = vpack.c.bf16 %v2072_v48, %v2071_v47  ;;  %v2119_v48 = vld [vmem:[#allocation34 + $0x1a0] sm:$0xff]  ;;  %vm1828_vm9 = vcmask 392192  }
 0xab1   :  { %v1569_v61 = vld [vmem:[#allocation6 + $0x18] sm:$0x3f] }
 0xab2   :  { %v1567_v59 = vld [vmem:[#allocation6 + $0x8] sm:$0xff]  ;;  %v1568_v60 = vld [vmem:[#allocation6 + $0x10] sm:$0xff] }
 0xab3   :  { %v2996_v62 = vpack.c.bf16 %v1567_v59, %v1566_v58  ;;  %v3000_v63 = vpack.c.bf16 %v1569_v61, %v1568_v60  ;;  %v3042_v58 = vpack.c.bf16 %v2090_v50, %v2089_v49  ;;  %v2091_v59 = vld [vmem:[#allocation34 + $0xc0] sm:$0xff]  ;;  %v2092_v60 = vld [vmem:[#allocation34 + $0xc8] sm:$0xff]  ;;  %v3044_v61 = vpack.c.bf16 %v2074_v54, %v2073_v53 }
 0xab4   :  { %v2120_v49 = vld [vmem:[#allocation34 + $0x1a8] sm:$0xff]  ;;  %v2103_v50 = vld [vmem:[#allocation34 + $0x120] sm:$0xff] }
 0xab5   :  { %2997 = vmatprep.subr.bf16.mxu1 %v2996_v62 }
 0xab6   :  { %2999 = vmatpush3.bf16.msra.mxu1 %v2996_v62 }
 0xab7   :  { %3002 = vmatprep.subr.msk.bf16.mxu1 %vm3001_vm13, %v3000_v63 }
 0xaba   :  { %3005 = vmatpush3.bf16.msk.msra.mxu1 %vm3001_vm13, %v3000_v63  ;;  %v1582_v7 = vpop.permute.xlu1 %1581  ;;  %vm1913_vm13 = vcmask 1041120  }
 0xabb   :  { %v1577_v8 = vpop.permute.xlu0 %1576  ;;  %3031 = vmatprep.subr.bf16.mxu1 %v3030_v25 }
 0xabd   :  { %2828 = vmatmul.mubr.msk.f32.vlgmr.msra.gmra.mrb[4].mxu1 %vm1594_vm2, %v1563_v0  ;;  %v3046_v0 = vpack.c.bf16 %v2092_v60, %v2091_v59  ;;  %v2105_v59 = vld [vmem:[#allocation34 + $0x130] sm:$0xff]  ;;  %v2106_v60 = vld [vmem:[#allocation34 + $0x138] sm:$0xff] }
 0xabe   :  { %2830 = vmatprep.mubr.msk.f32.mxu1 %vm1594_vm2, %v1564_v2  ;;  %v1592_v13 = vpop.permute.xlu1 %1591  ;;  %3033 = vmatpush3.bf16.msra.mxu1 %v3032_v28  ;;  %v2075_v2 = vld [vmem:[#allocation34 + $0x40] sm:$0xff]  ;;  %v2098_v28 = vld [vmem:[#allocation34 + $0xf8] sm:$0xff] }
 0xabf   :  { %v1587_v16 = vpop.permute.xlu0 %1586  ;;  %3035 = vmatprep.subr.bf16.mxu1 %v3034_v31  ;;  %v2082_v31 = vld [vmem:[#allocation34 + $0x78] sm:$0xff] }
 0xac0   :  { %v3060_v47 = vpack.c.bf16 %v2082_v31, %v2081_v30 }
 0xac1   :  { %2831 = vmatmul.mubr.msk.f32.gmra.mrb[6].mxu1 %vm1594_vm2, %v1565_v3  ;;  %v2076_v3 = vld [vmem:[#allocation34 + $0x48] sm:$0xff]  ;;  %vm1891_vm2 = vcmask 359424  }
 0xac2   :  { %3037 = vmatpush3.bf16.msra.mxu1 %v3036_v34  ;;  %v3058_v34 = vpack.c.bf16 %v2098_v28, %v2097_v27  ;;  %v2114_v27 = vld [vmem:[#allocation34 + $0x178] sm:$0xff] }
 0xac3   :  { %3039 = vmatprep.subr.bf16.mxu1 %v3038_v43 }
 0xac6   :  { %3041 = vmatpush3.bf16.msra.mxu1 %v3040_v57 }
 0xac7   :  { %3043 = vmatprep.subr.bf16.mxu1 %v3042_v58 }
 0xaca   :  { %3045 = vmatpush3.bf16.msra.mxu1 %v3044_v61 }
 0xacb   :  { %3047 = vmatprep.subr.bf16.mxu1 %v3046_v0  ;;  %v2124_v0 = vld [vmem:[#allocation34 + $0x1c8] sm:$0xff] }
 0xb90   :  { %v2829_v9 = vpop.f32.mrb[4].mxu1 }
 0xb91   :  { %v1682_v10 = vadd.f32 %v2829_v9, %v1582_v7  ;;  %v1676_v11 = vpop.f32.mrb[5].mxu1  ;;  %v3048_v7 = vpack.c.bf16 %v2076_v3, %v2075_v2  ;;  %v3050_v9 = vpack.c.bf16 %v2094_v6, %v2093_v5  ;;  %v2107_v3 = vld [vmem:[#allocation34 + $0x140] sm:$0xff]  ;;  %v2108_v5 = vld [vmem:[#allocation34 + $0x148] sm:$0xff] }
 0xb92   :  { %v1677_v12 = vadd.f32 %v1676_v11, %v1577_v8  ;;  %v2078_v11 = vld [vmem:[#allocation34 + $0x58] sm:$0xff] }
 0xb93   :  { %v1696_v17 = vmax.f32 %v1682_v10, 0.0  ;;  %v2077_v10 = vld [vmem:[#allocation34 + $0x50] sm:$0xff]  ;;  %3049 = vmatpush3.bf16.msra.mxu1 %v3048_v7  ;;  %v3080_v7 = vpack.c.bf16 %v2108_v5, %v2107_v3 }
 0xb94   :  { %v1695_v14 = vmax.f32 %v1677_v12, 0.0  ;;  %v2832_v15 = vpop.f32.mrb[6].mxu1  ;;  %3051 = vmatprep.subr.bf16.mxu1 %v3050_v9  ;;  %v2125_v9 = vld [vmem:[#allocation34 + $0x1d0] sm:$0xff] }
 0xb95   :  { %v1692_v18 = vadd.f32 %v2832_v15, %v1592_v13  ;;  %v1686_v19 = vpop.f32.mrb[7].mxu1  ;;  %v2095_v13 = vld [vmem:[#allocation34 + $0xe0] sm:$0xff]  ;;  %v3052_v15 = vpack.c.bf16 %v2078_v11, %v2077_v10  ;;  %v2126_v10 = vld [vmem:[#allocation34 + $0x1d8] sm:$0xff] }
 0xb96   :  { %v1687_v20 = vadd.f32 %v1686_v19, %v1587_v16  ;;  %2857 = vmatprep.mubr.msk.f32.mxu0 %vm1541_vm4, %v1695_v14  ;;  %v2096_v14 = vld [vmem:[#allocation34 + $0xe8] sm:$0xff]  ;;  %v2079_v16 = vld [vmem:[#allocation34 + $0x60] sm:$0xff] }
 0xb97   :  { %2858 = vmatmul.mubr.msk.f32.vlgmr.msra.gmra.mrb[20].mxu0 %vm1541_vm4, %v1696_v17  ;;  %v1698_v22 = vmax.f32 %v1692_v18, 0.0  ;;  %v2080_v17 = vld [vmem:[#allocation34 + $0x68] sm:$0xff]  ;;  %v2115_v18 = vld [vmem:[#allocation34 + $0x180] sm:$0xff]  ;;  %3053 = vmatpush3.bf16.msra.mxu1 %v3052_v15 }
 0xb98   :  { %v1697_v21 = vmax.f32 %v1687_v20, 0.0  ;;  %v3054_v20 = vpack.c.bf16 %v2096_v14, %v2095_v13  ;;  %v3056_v29 = vpack.c.bf16 %v2080_v17, %v2079_v16  ;;  %v2109_v13 = vld [vmem:[#allocation34 + $0x150] sm:$0xff]  ;;  %v2110_v14 = vld [vmem:[#allocation34 + $0x158] sm:$0xff]  ;;  %v2127_v17 = vld [vmem:[#allocation34 + $0x1e0] sm:$0xff] }
 0xb99   :  { %v3084_v16 = vpack.c.bf16 %v2110_v14, %v2109_v13  ;;  %v2132_v13 = vld [vmem:[#allocation34 + $0x208] sm:$0xff] }
 0xb9a   :  { %2860 = vmatprep.mubr.msk.f32.mxu0 %vm1541_vm4, %v1697_v21  ;;  %v2116_v21 = vld [vmem:[#allocation34 + $0x188] sm:$0xff]  ;;  %3055 = vmatprep.subr.bf16.mxu1 %v3054_v20  ;;  %v2111_v20 = vld [vmem:[#allocation34 + $0x160] sm:$0xff] }
 0xb9b   :  { %2861 = vmatmul.mubr.msk.f32.gmra.mrb[22].mxu0 %vm1541_vm4, %v1698_v22  ;;  %v2099_v22 = vld [vmem:[#allocation34 + $0x100] sm:$0xff]  ;;  %v3062_v25 = vpack.c.bf16 %v2116_v21, %v2115_v18  ;;  %3057 = vmatpush3.bf16.msra.mxu1 %v3056_v29  ;;  %v2128_v18 = vld [vmem:[#allocation34 + $0x1e8] sm:$0xff] }
 0xb9c   :  { %v3064_v26 = vpack.c.bf16 %v2100_v23, %v2099_v22  ;;  %3059 = vmatprep.subr.bf16.mxu1 %v3058_v34  ;;  %v2129_v23 = vld [vmem:[#allocation34 + $0x1f0] sm:$0xff] }
 0xb9d   :  { %3063 = vmatprep.subr.bf16.mxu0 %v3062_v25 }
 0xb9e   :  { %3065 = vmatpush3.bf16.msra.mxu0 %v3064_v26  ;;  %v2113_v26 = vld [vmem:[#allocation34 + $0x170] sm:$0xff] }
 0xb9f   :  { %3061 = vmatpush3.bf16.msra.mxu1 %v3060_v47  ;;  %v3092_v29 = vpack.c.bf16 %v2114_v27, %v2113_v26  ;;  %v2135_v27 = vld [vmem:[#allocation34 + $0x220] sm:$0xff] }
 0xba0   :  { %3094 = vmatprep.subr.bf16.mxu1 %v3663_v35 }
 0xc6a   :  { %v4260_v36 = vpop.f32.mrb[20].mxu0 }
 0xc6b   :  { %v4264_v37 = vcombine.high %v4260_v36, %v4260_v36  ;;  %1888 = vrot.lane.b32.xlu0 %v4260_v36, %s3677_s16  ;;  %v4268_v38 = vpop.f32.mrb[21].mxu0  ;;  %v2483_v41 = vrot.slane %v4260_v36, 10  ;;  %v2482_v19 = vrot.slane %v4260_v36, 9  ;;  %v2484_v33 = vrot.slane %v4260_v36, 11 }
 0xc6c   :  { %1809 = vst.msk [vmem:[#allocation7] sm:$0x1] %vm1808_vm14, %v4268_v38  ;;  %v4276_v44 = vcombine.high %v4268_v38, %v4268_v38  ;;  %v2477_v52 = vrot.slane %v4268_v38, 9  ;;  %v2478_v62 = vrot.slane %v4268_v38, 10  ;;  %v3070_v36 = vpack.c.bf16 %v2120_v49, %v2119_v48 }
 0xc6d   :  { %v2487_v42 = vrot.slane %v4264_v37, 11  ;;  %v2485_v6 = vrot.slane %v4264_v37, 9  ;;  %v2479_v11 = vrot.slane %v4268_v38, 11  ;;  %v2112_v38 = vld [vmem:[#allocation34 + $0x168] sm:$0xff] }
 0xc6e   :  { %v4278_v45 = vpop.f32.mrb[22].mxu0  ;;  %v1870_v56 = vrot.slane %v4276_v44, 7  ;;  %v2480_v57 = vrot.slane %v4276_v44, 9  ;;  %v3088_v22 = vpack.c.bf16 %v2112_v38, %v2111_v20  ;;  %v2481_v30 = vrot.slane %v4276_v44, 10  ;;  %v2134_v20 = vld [vmem:[#allocation34 + $0x218] sm:$0xff] }
 0xc6f   :  { %1907 = vrot.lane.b32.xlu0 %v2483_v41, %s3678_s8  ;;  %v4280_v46 = vpop.f32.mrb[23].mxu0  ;;  %1959 = vst.msk [vmem:[#allocation7 + $0x2] sm:$0x1] %vm1808_vm14, %v2487_v42  ;;  %v2493_v55 = vrot.slane %v4278_v45, 9  ;;  %v2102_v41 = vld [vmem:[#allocation34 + $0x118] sm:$0xff]  ;;  %v3066_v42 = vpack.c.bf16 %v2118_v39, %v2117_v32  ;;  %v2494_v53 = vrot.slane %v4278_v45, 10  ;;  %v2049_v15 = vcombine.high %v4278_v45, %v4278_v45 }
 0xc70   :  { %1961 = vrot.lane.b32.xlu1 %v4280_v46, %s3679_s14  ;;  %v4286_v51 = vcombine.high %v4280_v46, %v4280_v46  ;;  %v4293_v4 = vrot.slane %v1870_v56, 4  ;;  %v2488_v12 = vrot.slane %v4280_v46, 9  ;;  %v3068_v43 = vpack.c.bf16 %v2102_v41, %v2101_v40  ;;  %v2122_v56 = vld [vmem:[#allocation34 + $0x1b8] sm:$0xff] }
 0xc71   :  { %3067 = vmatprep.subr.bf16.mxu0 %v3066_v42  ;;  %v2490_v61 = vrot.slane %v4280_v46, 11  ;;  %v2489_v21 = vrot.slane %v4280_v46, 10  ;;  %v2495_v28 = vrot.slane %v4278_v45, 11  ;;  %v2486_v46 = vrot.slane %v4264_v37, 10 }
 0xc72   :  { %v2002_v63 = vrot.slane %v4286_v51, 6  ;;  %v2492_v24 = vrot.slane %v4286_v51, 11  ;;  %3069 = vmatpush3.bf16.msra.mxu0 %v3068_v43  ;;  %v2496_v31 = vrot.slane %v2049_v15, 9  ;;  %vm1914_vm14 = vcmask 421892  }
 0xc73   :  { %1813 = vrot.lane.b32.xlu0 %v2477_v52, %s3679_s14  ;;  %v2104_v52 = vld [vmem:[#allocation34 + $0x128] sm:$0xff]  ;;  %3071 = vmatprep.subr.bf16.mxu0 %v3070_v36 }
 0xc74   :  { %2029 = vrot.lane.b32.xlu1 %v2493_v55, %s3678_s8  ;;  %v4297_v8 = vrot.slane %v2002_v63, 4  ;;  %v3072_v54 = vpack.c.bf16 %v2104_v52, %v2103_v50  ;;  %v2121_v55 = vld [vmem:[#allocation34 + $0x1b0] sm:$0xff]  ;;  %v2123_v63 = vld [vmem:[#allocation34 + $0x1c0] sm:$0xff] }
 0xc75   :  { %v3074_v58 = vpack.c.bf16 %v2122_v56, %v2121_v55  ;;  %v3078_v2 = vpack.c.bf16 %v2124_v0, %v2123_v63 }
 0xc76   :  { %3073 = vmatpush3.bf16.msra.mxu0 %v3072_v54 }
 0xc77   :  { %1825 = vrot.lane.b32.xlu0 %v2478_v62, %s3672_s27  ;;  %v3076_v62 = vpack.c.bf16 %v2106_v60, %v2105_v59  ;;  %3075 = vmatprep.subr.bf16.mxu0 %v3074_v58 }
 0xc78   :  { %1882 = vrot.lane.b32.xlu1 %v4293_v4, %s3680_s1 }
 0xc7a   :  { %3077 = vmatpush3.bf16.msra.mxu0 %v3076_v62 }
 0xc7b   :  { %2010 = vrot.lane.b32.xlu0 %v4297_v8, %s3680_s1  ;;  %3079 = vmatprep.subr.bf16.mxu0 %v3078_v2 }
 0xc7c   :  { %1969 = vrot.lane.b32.xlu1 %v2488_v12, %s3672_s27  ;;  %s3683_s27 = smov 96   ;;  %v3082_v12 = vpack.c.bf16 %v2126_v10, %v2125_v9 }
 0xc7e   :  { %3081 = vmatpush3.bf16.msra.mxu0 %v3080_v7 }
 0xc7f   :  { %1900 = vrot.lane.b32.xlu0 %v2482_v19, %s3681_s2  ;;  %3083 = vmatprep.subr.bf16.mxu0 %v3082_v12  ;;  %v3086_v19 = vpack.c.bf16 %v2128_v18, %v2127_v17  ;;  %v2131_v12 = vld [vmem:[#allocation34 + $0x200] sm:$0xff] }
 0xc80   :  { %2016 = vrot.lane.b32.xlu1 %v2492_v24, %s3677_s16  ;;  %v2130_v24 = vld [vmem:[#allocation34 + $0x1f8] sm:$0xff]  ;;  %v3095_v17 = vpack.c.bf16 %v2132_v13, %v2131_v12  ;;  %v2145_v12 = vld [vmem:[#allocation34 + $0x270] sm:$0xff] }
 0xc81   :  { %v3090_v25 = vpack.c.bf16 %v2130_v24, %v2129_v23  ;;  %v2146_v13 = vld [vmem:[#allocation34 + $0x278] sm:$0xff] }
 0xc82   :  { %3085 = vmatpush3.bf16.msra.mxu0 %v3084_v16 }
 0xc83   :  { %1919 = vrot.lane.b32.xlu0 %v2484_v33, %s3682_s22  ;;  %3087 = vmatprep.subr.bf16.mxu0 %v3086_v19  ;;  %v2133_v19 = vld [vmem:[#allocation34 + $0x210] sm:$0xff] }
 0xc84   :  { %2023 = vrot.lane.b32.xlu1 %v4278_v45, %s3681_s2  ;;  %v2491_v45 = vrot.slane %v4286_v51, 9  ;;  %v3098_v24 = vpack.c.bf16 %v2134_v20, %v2133_v19 }
 0xc86   :  { %3089 = vmatpush3.bf16.msra.mxu0 %v3088_v22 }
 0xc87   :  { %1843 = vrot.lane.b32.xlu0 %v4276_v44, %s3683_s27  ;;  %3091 = vmatprep.subr.bf16.mxu0 %v3090_v25 }
 0xc88   :  { %2037 = vrot.lane.b32.xlu1 %v2494_v53, %s3682_s22 }
 0xc8a   :  { %3093 = vmatpush3.bf16.msra.mxu0 %v3092_v29 }
 0xc8b   :  { %1854 = vrot.lane.b32.xlu0 %v2480_v57, %s3684_s23 }
 0xc8c   :  { %1983 = vrot.lane.b32.xlu1 %v2490_v61, %s3683_s27 }
 0xc8f   :  { %1990 = vrot.lane.b32.xlu0 %v4286_v51, %s3684_s23 }
 0xc90   :  { %1936 = vrot.lane.b32.xlu1 %v2485_v6, %s3666_s3 }
 0xc93   :  { %1837 = vrot.lane.b32.xlu0 %v2479_v11, %s3631_s29 }
 0xc94   :  { %2050 = vrot.lane.b32.xlu1 %v2049_v15, %s3666_s3  ;;  %s3685_s3 = smov 104  }
 0xc97   :  { %1929 = vrot.lane.b32.xlu0 %v4264_v37, %s3669_s30 }
 0xc98   :  { %1977 = vrot.lane.b32.xlu1 %v2489_v21, %s3631_s29  ;;  %s3686_s29 = smov 16  }
 0xc9b   :  { %1872 = vrot.lane.b32.xlu0 %v4293_v4, %s3685_s3 }
 0xc9c   :  { %2045 = vrot.lane.b32.xlu1 %v2495_v28, %s3669_s30  ;;  %v2136_v28 = vld [vmem:[#allocation34 + $0x228] sm:$0xff] }
 0xc9f   :  { %2004 = vrot.lane.b32.xlu0 %v4297_v8, %s3685_s3 }
 0xca0   :  { %1948 = vrot.lane.b32.xlu1 %v2486_v46, %s3661_s20 }
 0xca3   :  { %1865 = vrot.lane.b32.xlu0 %v2481_v30, %s3686_s29 }
 0xca4   :  { %2058 = vrot.lane.b32.xlu1 %v2496_v31, %s3661_s20  ;;  %s3687_s20 = smov [#allocation36]  }
 0xca5   :  { %s2401_s30 = sshll.u32 %s3687_s20, 4  ;;  %s2402_s30 = int_to_ptr.vmem [resolvable:$true] %s2401_s30 }
 0xca6   :  { %s3563_s15 = scalar_lea.vmem %s2402_s30, 64  ;;  %p3568_p11 = scmp.lt.s32.totalorder %s2402_s30, %s2402_s30 }
 0xca7   :  { %p3564_p10 = scmp.ne.s32.totalorder %s2402_s30, %s3563_s15  ;;  %p3569_p12 = scmp.lt.s32.totalorder %s3563_s15, %s3563_s15 }
 0xca8   :  { %1998 = vrot.lane.b32.xlu1 %v2491_v45, %s3686_s29 }
 0xca9   :  { %p3570_p13 = por %p3569_p12, %p3568_p11 }
 0xcab   :  { %p3571_p0 = pnand %p3570_p13, %p3564_p10 }
 0xcdd   :  { %v1889_v4 = vpop.permute.xlu0 %1888 }
 0xcde   :  { %v1890_v40 = vrot.slane %v1889_v4, 4 }
 0xce0   :  { %v1892_v49 = vsel %vm1891_vm2, %v1890_v40, %v1889_v4 }
 0xce1   :  { %v1908_v32 = vpop.permute.xlu0 %1907 }
 0xce2   :  { %v1962_v37 = vpop.permute.xlu1 %1961  ;;  %v1909_v52 = vrot.slane %v1908_v32, 4 }
 0xce3   :  { %v1963_v8 = vrot.slane %v1962_v37, 4 }
 0xce4   :  { %v1911_v58 = vsel %vm1910_vm0, %v1909_v52, %v1908_v32 }
 0xce5   :  { %v1964_v33 = vsel %vm1816_vm3, %v1963_v8, %v1962_v37  ;;  %v1814_v34 = vpop.permute.xlu0 %1813  ;;  %v3101_v37 = vpack.c.bf16 %v2136_v28, %v2135_v27 }
 0xce6   :  { %1966 = vst.msk [vmem:[#allocation7 + $0x2] sm:$0x11] %vm1821_vm10, %v1964_v33  ;;  %v1815_v44 = vrot.slane %v1814_v34, 4  ;;  %v2030_v39 = vpop.permute.xlu1 %2029  ;;  %v2137_v33 = vld [vmem:[#allocation34 + $0x230] sm:$0xff] }
 0xce7   :  { %v2031_v60 = vrot.slane %v2030_v39, 4 }
 0xce8   :  { %v1817_v51 = vsel %vm1816_vm3, %v1815_v44, %v1814_v34  ;;  %vm4349_vm3 = vmor %vm1914_vm14, %vm1913_vm13  ;;  %vm1942_vm13 = vcmask 1041184   ;;  %vm1943_vm14 = vcmask 487428   ;;  %v2138_v34 = vld [vmem:[#allocation34 + $0x238] sm:$0xff] }
 0xce9   :  { %1822 = vst.msk [vmem:[#allocation7] sm:$0x11] %vm1821_vm10, %v1817_v51  ;;  %v1826_v41 = vpop.permute.xlu0 %1825  ;;  %vm1925_vm10 = vcmask 1040800   ;;  %v2032_v3 = vsel %vm1910_vm0, %v2031_v60, %v2030_v39  ;;  %v3104_v42 = vpack.c.bf16 %v2138_v34, %v2137_v33 }
 0xcea   :  { %v1827_v47 = vrot.slane %v1826_v41, 4  ;;  %v1883_v48 = vpop.permute.xlu1 %1882  ;;  %vm1926_vm5 = vmor %vm4535_vm6, %vm1925_vm10  ;;  %vm1932_vm10 = vcmask 811104  }
 0xceb   :  { %1886 = vst.msk [vmem:[#allocation7 + $0x1] sm:$0x1] %vm1885_vm7, %v1883_v48  ;;  %v2140_v48 = vld [vmem:[#allocation34 + $0x248] sm:$0xff] }
 0xcec   :  { %v1829_v36 = vsel %vm1828_vm9, %v1827_v47, %v1826_v41  ;;  %1897 = vst.msk [vmem:[#allocation7 + $0x1] sm:$0x11] %vm4333_vm11, %v1892_v49  ;;  %v2139_v47 = vld [vmem:[#allocation34 + $0x240] sm:$0xff] }
 0xced   :  { %1834 = vst.msk [vmem:[#allocation7 + $0x4] sm:$0x11] %vm4337_vm12, %v1829_v36  ;;  %v2011_v50 = vpop.permute.xlu0 %2010 }
 0xcee   :  { %2013 = vst.msk [vmem:[#allocation7 + $0x3] sm:$0x1] %vm1885_vm7, %v2011_v50  ;;  %v1970_v53 = vpop.permute.xlu1 %1969  ;;  %vm1859_vm7 = vcmask 1040832   ;;  %v3107_v50 = vpack.c.bf16 %v2140_v48, %v2139_v47 }
 0xcef   :  { %v1971_v54 = vrot.slane %v1970_v53, 4 }
 0xcf1   :  { %v1972_v56 = vsel %vm1828_vm9, %v1971_v54, %v1970_v53  ;;  %v1901_v57 = vpop.permute.xlu0 %1900  ;;  %vm1860_vm9 = vcmask 126980   ;;  %v2141_v53 = vld [vmem:[#allocation34 + $0x250] sm:$0xff]  ;;  %v2142_v54 = vld [vmem:[#allocation34 + $0x258] sm:$0xff] }
 0xcf2   :  { %1974 = vst.msk [vmem:[#allocation7 + $0x6] sm:$0x11] %vm4337_vm12, %v1972_v56  ;;  %v2017_v59 = vpop.permute.xlu1 %2016  ;;  %vm4373_vm0 = vmor %vm1860_vm9, %vm1859_vm7  ;;  %vm1868_vm9 = vcmask 843904   ;;  %v3110_v60 = vpack.c.bf16 %v2142_v54, %v2141_v53 }
 0xcf3   :  { %1904 = vst.msk [vmem:[#allocation7 + $0x5] sm:$0x1] %vm1903_vm1, %v1901_v57  ;;  %v2018_v61 = vrot.slane %v2017_v59, 4 }
 0xcf4   :  { %1916 = vst.msk [vmem:[#allocation7 + $0x5] sm:$0x11] %vm4349_vm3, %v1911_v58 }
 0xcf5   :  { %v2019_v62 = vsel %vm1891_vm2, %v2018_v61, %v2017_v59  ;;  %v1920_v63 = vpop.permute.xlu0 %1919  ;;  %vm1849_vm2 = vcmask 454660  }
 0xcf6   :  { %2021 = vst.msk [vmem:[#allocation7 + $0x3] sm:$0x11] %vm4333_vm11, %v2019_v62  ;;  %v1921_v0 = vrot.slane %v1920_v63, 4  ;;  %v2024_v2 = vpop.permute.xlu1 %2023  ;;  %vm1840_vm11 = vcmask 778304   ;;  %vm4368_vm12 = vmor %vm1849_vm2, %vm1848_vm15  ;;  %vm1878_vm15 = vcmask 1041216   ;;  %vm1875_vm2 = vcmask 850944  }
 0xcf7   :  { %2026 = vst.msk [vmem:[#allocation7 + $0x7] sm:$0x1] %vm1903_vm1, %v2024_v2  ;;  %vm4540_vm1 = vcmask 457728  }
 0xcf8   :  { %v1923_v5 = vsel %vm1922_vm8, %v1921_v0, %v1920_v63  ;;  %2034 = vst.msk [vmem:[#allocation7 + $0x7] sm:$0x11] %vm4349_vm3, %v2032_v3  ;;  %vm1939_vm3 = vcmask 818176   ;;  %vm4543_vm6 = vmmov %vm4540_vm1  ;;  %v2143_v63 = vld [vmem:[#allocation34 + $0x260] sm:$0xff]  ;;  %v2144_v0 = vld [vmem:[#allocation34 + $0x268] sm:$0xff] }
 0xcf9   :  { %1927 = vst.msk [vmem:[#allocation7 + $0x9] sm:$0x11] %vm1926_vm5, %v1923_v5  ;;  %v1844_v6 = vpop.permute.xlu0 %1843 }
 0xcfa   :  { %v2038_v7 = vpop.permute.xlu1 %2037  ;;  %v1845_v21 = vrot.slane %v1844_v6, 4 }
 0xcfb   :  { %v2039_v9 = vrot.slane %v2038_v7, 4 }
 0xcfc   :  { %v1846_v29 = vsel %vm1541_vm4, %v1845_v21, %v1844_v6 }
 0xcfd   :  { %v2040_v10 = vsel %vm1922_vm8, %v2039_v9, %v2038_v7  ;;  %v1855_v11 = vpop.permute.xlu0 %1854  ;;  %vm4384_vm8 = vmor %vm1943_vm14, %vm1942_vm13  ;;  %vm2165_vm14 = vcmask 162816  }
 0xcfe   :  { %2042 = vst.msk [vmem:[#allocation7 + $0xb] sm:$0x11] %vm1926_vm5, %v2040_v10  ;;  %v1984_v14 = vpop.permute.xlu1 %1983  ;;  %v1856_v22 = vrot.slane %v1855_v11, 4  ;;  %vm1953_vm5 = vcmask 1040864   ;;  %v3113_v10 = vpack.c.bf16 %v2144_v0, %v2143_v63 }
 0xcff   :  { %v2064_v15 = vld [vmem:[#allocation7] sm:$0xff]  ;;  %v1985_v45 = vrot.slane %v1984_v14, 4 }
 0xd00   :  { %v2160_v16 = vcombine.high %v2064_v15, %v2064_v15  ;;  %v1857_v31 = vsel %vm4540_vm1, %v1856_v22, %v1855_v11 }
 0xd01   :  { %v1991_v18 = vpop.permute.xlu0 %1990  ;;  %v1986_v40 = vsel %vm1541_vm4, %v1985_v45, %v1984_v14  ;;  %vm1879_vm4 = vcmask 159748  }
 0xd02   :  { %2235 = vmatprep.mubr.f32.mxu1 %v2160_v16  ;;  %v1937_v38 = vpop.permute.xlu1 %1936  ;;  %v1992_v4 = vrot.slane %v1991_v18, 4  ;;  %vm4409_vm7 = vmor %vm1879_vm4, %vm1953_vm5  ;;  %v3116_v16 = vpack.c.bf16 %v2146_v13, %v2145_v12 }
 0xd03   :  { %2236 = vmatmul.mubr.f32.vlgmr.msra.gmra.mrb[8].mxu1 %v2064_v15  ;;  %v1938_v46 = vrot.slane %v1937_v38, 4 }
 0xd04   :  { %3096 = vmatpush1.bf16.msra.mxu1 %v3095_v17  ;;  %v1993_v41 = vsel %vm4543_vm6, %v1992_v4, %v1991_v18  ;;  %v2147_v17 = vld [vmem:[#allocation34 + $0x280] sm:$0xff]  ;;  %v2148_v18 = vld [vmem:[#allocation34 + $0x288] sm:$0xff] }
 0xd05   :  { %v1838_v25 = vpop.permute.xlu0 %1837  ;;  %3097 = vmatprep.subr.bf16.mxu1 %v3663_v35  ;;  %v1940_v44 = vsel %vm1939_vm3, %v1938_v46, %v1937_v38  ;;  %v3119_v19 = vpack.c.bf16 %v2148_v18, %v2147_v17  ;;  %v2149_v38 = vld [vmem:[#allocation34 + $0x290] sm:$0xf] }
 0xd06   :  { %1841 = vst.msk [vmem:[#allocation7 + $0x8] sm:$0x1] %vm1840_vm11, %v1838_v25  ;;  %v2051_v30 = vpop.permute.xlu1 %2050 }
 0xd07   :  { %1851 = vst.msk [vmem:[#allocation7 + $0x8] sm:$0x11] %vm4368_vm12, %v1846_v29  ;;  %v2052_v51 = vrot.slane %v2051_v30, 4 }
 0xd08   :  { %3099 = vmatpush1.bf16.msra.mxu1 %v3098_v24  ;;  %1862 = vst.msk [vmem:[#allocation7 + $0xc] sm:$0x11] %vm4373_vm0, %v1857_v31 }
 0xd09   :  { %v1930_v8 = vpop.permute.xlu0 %1929  ;;  %3100 = vmatprep.subr.bf16.mxu1 %v3663_v35  ;;  %v2053_v36 = vsel %vm1939_vm3, %v2052_v51, %v2051_v30 }
 0xd0a   :  { %1933 = vst.msk [vmem:[#allocation7 + $0xd] sm:$0x1] %vm1932_vm10, %v1930_v8  ;;  %v1978_v39 = vpop.permute.xlu1 %1977 }
 0xd0b   :  { %1945 = vst.msk [vmem:[#allocation7 + $0xd] sm:$0x11] %vm4384_vm8, %v1940_v44 }
 0xd0c   :  { %1980 = vst.msk [vmem:[#allocation7 + $0xa] sm:$0x1] %vm1840_vm11, %v1978_v39  ;;  %3102 = vmatpush1.bf16.msra.mxu1 %v3101_v37  ;;  %vm4414_vm11 = vmor %vm1879_vm4, %vm1878_vm15 }
 0xd0d   :  { %1988 = vst.msk [vmem:[#allocation7 + $0xa] sm:$0x11] %vm4368_vm12, %v1986_v40  ;;  %v1873_v43 = vpop.permute.xlu0 %1872  ;;  %3103 = vmatprep.subr.bf16.mxu1 %v3663_v35  ;;  %vm4548_vm12 = vcmask 490496  }
 0xd0e   :  { %1995 = vst.msk [vmem:[#allocation7 + $0xe] sm:$0x11] %vm4373_vm0, %v1993_v41  ;;  %v2046_v49 = vpop.permute.xlu1 %2045  ;;  %v1874_v55 = vrot.slane %v1873_v43, 4  ;;  %vm4549_vm13 = vmmov %vm4548_vm12  ;;  %vm4550_vm0 = vcmask 1043456  }
 0xd0f   :  { %2048 = vst.msk [vmem:[#allocation7 + $0xf] sm:$0x1] %vm1932_vm10, %v2046_v49 }
 0xd10   :  { %2055 = vst.msk [vmem:[#allocation7 + $0xf] sm:$0x11] %vm4384_vm8, %v2053_v36  ;;  %3105 = vmatpush1.bf16.msra.mxu1 %v3104_v42  ;;  %v1876_v2 = vsel %vm1875_vm2, %v1874_v55, %v1873_v43 }
 0xd11   :  { %v2005_v52 = vpop.permute.xlu0 %2004  ;;  %3106 = vmatprep.subr.bf16.mxu1 %v3663_v35 }
 0xd12   :  { %v1949_v56 = vpop.permute.xlu1 %1948  ;;  %v2006_v5 = vrot.slane %v2005_v52, 4 }
 0xd13   :  { %v1950_v58 = vrot.slane %v1949_v56, 4 }
 0xd14   :  { %3108 = vmatpush1.bf16.msra.mxu1 %v3107_v50  ;;  %v2007_v15 = vsel %vm1875_vm2, %v2006_v5, %v2005_v52 }
 0xd15   :  { %v1951_v61 = vsel %vm4548_vm12, %v1950_v58, %v1949_v56  ;;  %v1866_v62 = vpop.permute.xlu0 %1865  ;;  %3109 = vmatprep.subr.bf16.mxu1 %v3663_v35 }
 0xd16   :  { %1955 = vst.msk [vmem:[#allocation7 + $0x11] sm:$0x11] %vm4409_vm7, %v1951_v61  ;;  %v2059_v3 = vpop.permute.xlu1 %2058 }
 0xd17   :  { %1869 = vst.msk [vmem:[#allocation7 + $0x10] sm:$0x1] %vm1868_vm9, %v1866_v62  ;;  %v2060_v6 = vrot.slane %v2059_v3, 4  ;;  %v2065_v7 = vld [vmem:[#allocation7 + $0x8] sm:$0xff] }
 0xd18   :  { %1881 = vst.msk [vmem:[#allocation7 + $0x10] sm:$0x11] %vm4414_vm11, %v1876_v2  ;;  %3111 = vmatpush1.bf16.msra.mxu1 %v3110_v60  ;;  %v2161_v9 = vcombine.high %v2065_v7, %v2065_v7 }
 0xd19   :  { %v2061_v11 = vsel %vm4549_vm13, %v2060_v6, %v2059_v3  ;;  %3112 = vmatprep.subr.bf16.mxu1 %v3663_v35 }
 0xd1a   :  { %2063 = vst.msk [vmem:[#allocation7 + $0x13] sm:$0x11] %vm4409_vm7, %v2061_v11  ;;  %2305 = vmatprep.mubr.f32.mxu0 %v2161_v9  ;;  %v1999_v14 = vpop.permute.xlu1 %1998 }
 0xd1b   :  { %2001 = vst.msk [vmem:[#allocation7 + $0x12] sm:$0x1] %vm1868_vm9, %v1999_v14  ;;  %2306 = vmatmul.mubr.f32.vlgmr.msra.gmra.mrb[24].mxu0 %v2065_v7 }
 0xd1c   :  { %2009 = vst.msk [vmem:[#allocation7 + $0x12] sm:$0x11] %vm4414_vm11, %v2007_v15  ;;  %3114 = vmatpush1.bf16.msra.mxu1 %v3113_v10 }
 0xd1d   :  { %3115 = vmatprep.subr.bf16.mxu1 %v3663_v35 }
 0xd20   :  { %3117 = vmatpush1.bf16.msra.mxu1 %v3116_v16 }
 0xd21   :  { %3118 = vmatprep.subr.bf16.mxu1 %v3663_v35 }
 0xd23   :  { %v2066_v20 = vld [vmem:[#allocation7 + $0x10] sm:$0xff] }
 0xd24   :  { %3120 = vmatpush1.bf16.msra.mxu1 %v3119_v19  ;;  %v2162_v21 = vcombine.high %v2066_v20, %v2066_v20 }
 0xd25   :  { %2347 = vmatprep.subr.mxu1 %v3648_v1 }
 0xd26   :  { %2499 = vmatprep.mubr.msk.f32.mxu1 %vm2165_vm14, %v2162_v21 }
 0xd28   :  { %2498 = vmatpush1.msk.msra.mxu1 %vm4550_vm0, %v2149_v38 }
 0xd29   :  { %2376 = vmatmul.mubr.f32.vlgmr.msra.gmra.mrb[10].mxu1 %v2066_v20 }
 0xd2a   :  { %3574 = shalt.err (!%p3571_p0)
}
 0xd2b   :  { %s4551_s28 = sld [smem:[#allocation59_spill]] }
 0xd31   :  { %s3575_s5 = scalar_lea.hbm %s4551_s28, 64 }
 0xd32   :  { %p3576_p1 = scmp.ne.s32.totalorder %s4551_s28, %s3575_s5  ;;  %p3579_p2 = scmp.lt.u32.totalorder %s3575_s5, %s4551_s28 }
 0xd34   :  { %p3581_p3 = pnand %p3579_p2, %p3576_p1 }
 0xd36   :  { %3584 = shalt.err (!%p3581_p3)
}
 0xd37   :  { %2404 = dma.vmem_to_hbm [thread:$0]  %s2402_s30, 64, %s4551_s28, [#allocation37]   ;;  %vm2381_vm1 = vcmask 257024  }
 0xd38   :  { %s4552_s17 = sld [smem:[#allocation57_spill]]  ;;  %s3688_s25 = smov [#allocation35]  }
 0xd39   :  { %s2389_s10 = sshll.u32 %s3688_s25, 4  ;;  %s2390_s10 = int_to_ptr.vmem [resolvable:$true] %s2389_s10 }
 0xd3a   :  { %s3585_s13 = scalar_lea.vmem %s2390_s10, 64  ;;  %p3590_p5 = scmp.lt.s32.totalorder %s2390_s10, %s2390_s10 }
 0xd3b   :  { %p3586_p4 = scmp.ne.s32.totalorder %s2390_s10, %s3585_s13  ;;  %p3591_p6 = scmp.lt.s32.totalorder %s3585_s13, %s3585_s13 }
 0xd3d   :  { %p3592_p7 = por %p3591_p6, %p3590_p5 }
 0xd3e   :  { %v2497_v23 = vld [vmem:[%s4552_s17] ss:$0 sm:$0xff] }
 0xd3f   :  { %p3593_p8 = pnand %p3592_p7, %p3586_p4 }
 0xdd6   :  { %v2634_v1 = vpop.f32.mrb[8].mxu1 }
 0xdd7   :  { %v2635_v35 = vpop.f32.mrb[9].mxu1 }
 0xdd8   :  { %v2636_v22 = vadd.f32 %v2635_v35, %v2634_v1 }
 0xdda   :  { %v2238_v26 = vadd.f32 %v2636_v22, %v2497_v23 }
 0xdee   :  { %v2669_v24 = vpop.f32.mrb[24].mxu0 }
 0xdef   :  { %v2670_v25 = vpop.f32.mrb[25].mxu0 }
 0xdf0   :  { %v2671_v27 = vadd.f32 %v2670_v25, %v2669_v24 }
 0xdf2   :  { %v2308_v28 = vadd.f32 %v2671_v27, %v2238_v26 }
 0xdfc   :  { %v2377_v29 = vpop.f32.mrb[10].mxu1 }
 0xdfd   :  { %v2378_v46 = vadd.f32 %v2377_v29, %v2308_v28  ;;  %v2379_v30 = vpop.f32.mrb[11].mxu1 }
 0xdff   :  { %2382 = vst.msk [vmem:[#allocation35] sm:$0xf] %vm2381_vm1, %v2378_v46 }
 0xe00   :  { %3596 = shalt.err (!%p3593_p8)
}
 0xe01   :  { %s4553_s16 = sld [smem:[#allocation58_spill]] }
 0xe07   :  { %s3597_s8 = scalar_lea.hbm %s4553_s16, 64 }
 0xe08   :  { %p3598_p9 = scmp.ne.s32.totalorder %s4553_s16, %s3597_s8  ;;  %p3601_p10 = scmp.lt.u32.totalorder %s3597_s8, %s4553_s16 }
 0xe0a   :  { %p3603_p11 = pnand %p3601_p10, %p3598_p9 }
 0xe0c   :  { %3606 = shalt.err (!%p3603_p11)
}
 0xe0d   :  { %2392 = dma.vmem_to_hbm [thread:$0]  %s2390_s10, 64, %s4553_s16, [#allocation10]  }
 0xe0e   :  { %3625 = dma.done.wait [#allocation10], 64  }
 0xe0f   :  { %3626 = vsyncadd [#allocation10], 4294967232 }
 0xe10   :  { %3627 = dma.done.wait [#allocation37], 64  }
 0xe11   :  { %3628 = vsyncadd [#allocation37], 4294967232 }
 0xe12   :  { %2413 = vsyncpa [#allocation9], 1 }
 0xe13   :  { %2414 = vsyncpa [#allocation12], 1 }
 0xe14   :  { %2415 = vsyncpa [#allocation15], 1 }
 0xe15   :  { %2416 = vsyncpa [#allocation18], 1 }
 0xe16   :  { %2417 = vsyncpa [#allocation21], 1 }
 0xe17   :  { %2418 = vsyncpa [#allocation24], 1 }
 0xe18   :  { %2419 = vsyncpa [#allocation27], 1 }
 0xe19   :  { %2420 = vsyncpa [#allocation30], 1 }
 0xe1a   :  { %2421 = vsyncpa [#allocation33], 1 }
 0xe1b   :  { %2422 = vsyncpa [#allocation10], 1 }
 0xe1c   :  { %2423 = vsyncpa [#allocation37], 1 }

</bundles_post_ra>
